<compile_context>
chip_gen: v7x
topology: tpu7x:2x2x1
jax: 0.10.0
libtpu: 0.0.40
codegen_flags: <defaults>
</compile_context>

<pallas_src>
import jax
import jax.numpy as jnp
from jax.experimental import pallas as pl
from jax.experimental.pallas import tpu as pltpu

LATENT = 100
LATENT_PAD = 128          # 100 -> 128 (one full lane group)
H1, H2, H3 = 256, 512, 1024
OUT = 784
OUT_PAD = 896             # w4 columns padded 784 -> 7*128 (aligned matmul N)
TB = 256                  # batch tile for the large-batch path
SINGLE_SHOT_MAX = 256     # no-grid, fully VMEM-resident path up to this batch


def generator_kernel(x_ref,
                     w1_ref, b1_ref,
                     w2_ref, b2_ref,
                     w3_ref, b3_ref,
                     w4_ref, b4_ref,
                     o_ref):
    # Linear(128 -> 256) + ReLU   (bf16 operands, f32 MXU accumulation)
    h = jnp.dot(x_ref[...].astype(jnp.bfloat16), w1_ref[...],
                preferred_element_type=jnp.float32)
    h = jnp.maximum(h + b1_ref[...], 0.0)
    # Linear(256 -> 512) + ReLU
    h = jnp.dot(h.astype(jnp.bfloat16), w2_ref[...],
                preferred_element_type=jnp.float32)
    h = jnp.maximum(h + b2_ref[...], 0.0)
    # Linear(512 -> 1024) + ReLU
    h = jnp.dot(h.astype(jnp.bfloat16), w3_ref[...],
                preferred_element_type=jnp.float32)
    h = jnp.maximum(h + b3_ref[...], 0.0)
    # Linear(1024 -> 896[=784 padded]) + Tanh
    h = jnp.dot(h.astype(jnp.bfloat16), w4_ref[...],
                preferred_element_type=jnp.float32)
    h = jnp.tanh(h + b4_ref[...])
    # In-kernel unpad 896 -> 784: static slice + masked store.  Avoids the
    # wrapper-side slice that cost an extra full HBM pass over the output.
    o_ref[...] = h[:, :OUT]


def _cost_estimate(batch):
    flops = 2 * batch * (LATENT_PAD * H1 + H1 * H2 + H2 * H3 + H3 * OUT_PAD)
    w_bytes = 2 * (LATENT_PAD * H1 + H1 * H2 + H2 * H3 + H3 * OUT_PAD)  # bf16
    b_bytes = 4 * (H1 + H2 + H3 + OUT_PAD)
    act_bytes = 4 * batch * (LATENT_PAD + OUT)
    return pl.CostEstimate(flops=flops,
                           transcendentals=batch * OUT_PAD,
                           bytes_accessed=w_bytes + b_bytes + act_bytes)


def generator_forward(x, params):
    """x: (B, 100) float32 -> (B, 1, 28, 28) float32 (NCHW, like PyTorch)."""
    B = x.shape[0]
    (w1, b1), (w2, b2), (w3, b3), (w4, b4) = params

    # Zero-pad latent 100 -> 128 (w1's padded rows are zero -> identical math).
    xp = jnp.pad(x.astype(jnp.float32), ((0, 0), (0, LATENT_PAD - LATENT)))
    weight_args = (w1, b1, w2, b2, w3, b3, w4, b4)

    if B <= SINGLE_SHOT_MAX:
        # Single-shot: everything resident in VMEM, no grid, no double-buffer.
        vmem_spec = pl.BlockSpec(memory_space=pltpu.MemorySpace.VMEM)
        out = pl.pallas_call(
            generator_kernel,
            out_shape=jax.ShapeDtypeStruct((B, OUT), jnp.float32),
            in_specs=[vmem_spec] * (1 + len(weight_args)),
            out_specs=vmem_spec,
            compiler_params=pltpu.CompilerParams(vmem_limit_bytes=32 << 20),
            cost_estimate=_cost_estimate(B),
        )(xp, *weight_args)
    else:
        # Batch-tiled path: weights stay VMEM-resident (constant index_map),
        # batch tiles stream; axis marked "parallel" for multi-TC sharding
        # (v7x gets both TensorCores busy, e.g. B=512 -> 2 parallel steps).
        Bp = pl.cdiv(B, TB) * TB
        if Bp != B:
            xp = jnp.pad(xp, ((0, Bp - B), (0, 0)))

        def resident(a):
            # Constant block index -> fetched once, resident across the grid.
            return pl.BlockSpec(a.shape, lambda i: (0, 0))

        out = pl.pallas_call(
            generator_kernel,
            out_shape=jax.ShapeDtypeStruct((Bp, OUT), jnp.float32),
            grid=(Bp // TB,),
            in_specs=[pl.BlockSpec((TB, LATENT_PAD), lambda i: (i, 0))]
                     + [resident(a) for a in weight_args],
            out_specs=pl.BlockSpec((TB, OUT), lambda i: (i, 0)),
            compiler_params=pltpu.CompilerParams(
                dimension_semantics=("parallel",),
                vmem_limit_bytes=32 << 20,
            ),
            cost_estimate=_cost_estimate(Bp),
        )(xp, *weight_args)
        if Bp != B:
            out = out[:B]

    return out.reshape(B, 1, 28, 28)


def generator_reference(x, params):
    """Pure-JAX reference doing the same bf16-weight / f32-accum math."""
    (w1, b1), (w2, b2), (w3, b3), (w4, b4) = params
    xp = jnp.pad(x.astype(jnp.float32), ((0, 0), (0, LATENT_PAD - LATENT)))
    h = jnp.dot(xp.astype(jnp.bfloat16), w1,
                preferred_element_type=jnp.float32) + b1
    h = jnp.maximum(h, 0.0)
    h = jnp.dot(h.astype(jnp.bfloat16), w2,
                preferred_element_type=jnp.float32) + b2
    h = jnp.maximum(h, 0.0)
    h = jnp.dot(h.astype(jnp.bfloat16), w3,
                preferred_element_type=jnp.float32) + b3
    h = jnp.maximum(h, 0.0)
    h = jnp.tanh(jnp.dot(h.astype(jnp.bfloat16), w4,
                         preferred_element_type=jnp.float32) + b4)
    return h[:, :OUT].reshape(x.shape[0], 1, 28, 28)


def init_params(key):
    """PyTorch nn.Linear-style init (uniform +-1/sqrt(fan_in)).
    Weights stored transposed vs PyTorch, i.e. (in, out), zero-padded to
    lane-dense shapes, and cast ONCE to bfloat16. Biases kept f32."""
    dims = [(LATENT, H1), (H1, H2), (H2, H3), (H3, OUT)]
    pad_in = {LATENT: LATENT_PAD}
    pad_out = {OUT: OUT_PAD}
    params = []
    for fan_in, fan_out in dims:
        key, kw, kb = jax.random.split(key, 3)
        bound = 1.0 / jnp.sqrt(jnp.float32(fan_in))
        w = jax.random.uniform(kw, (fan_in, fan_out), jnp.float32,
                               minval=-bound, maxval=bound)
        b = jax.random.uniform(kb, (1, fan_out), jnp.float32,
                               minval=-bound, maxval=bound)
        # Zero-pad ragged dims so padded lanes contribute exactly zero.
        in_p = pad_in.get(fan_in, fan_in)
        out_p = pad_out.get(fan_out, fan_out)
        w = jnp.pad(w, ((0, in_p - fan_in), (0, out_p - fan_out)))
        b = jnp.pad(b, ((0, 0), (0, out_p - fan_out)))
        params.append((w.astype(jnp.bfloat16), b))
    return params


if __name__ == "__main__":
    key = jax.random.PRNGKey(0)
    k_x, k_x2, k_p = jax.random.split(key, 3)

    params = init_params(k_p)

    # Small batch: single-shot no-grid path.
    B = 2
    x = jax.random.normal(k_x, (B, LATENT), jnp.float32)
    out = jax.block_until_ready(generator_forward(x, params))
    assert out.shape == (B, 1, 28, 28), out.shape
    assert out.dtype == jnp.float32
    assert bool(jnp.all(jnp.abs(out) <= 1.0 + 1e-6))
    ref = generator_reference(x, params)
    err = float(jnp.max(jnp.abs(out - ref)))
    assert err < 1e-2, err

    # Larger batch: batch-tiled "parallel" grid path (weights VMEM-resident),
    # non-multiple-of-TB batch exercises the pad + slice-back path.
    B2 = 384
    x2 = jax.random.normal(k_x2, (B2, LATENT), jnp.float32)
    out2 = jax.block_until_ready(generator_forward(x2, params))
    assert out2.shape == (B2, 1, 28, 28), out2.shape
    ref2 = generator_reference(x2, params)
    err2 = float(jnp.max(jnp.abs(out2 - ref2)))
    assert err2 < 1e-2, err2

    print("KERNEL_OK")
</pallas_src>

<mosaic_0001>
module attributes {stable_mosaic.version = 11 : i64} {
  func.func @generator_kernel(%arg0: memref<2x128xf32, #tpu.memory_space<vmem>>, %arg1: memref<128x256xbf16, #tpu.memory_space<vmem>>, %arg2: memref<1x256xf32, #tpu.memory_space<vmem>>, %arg3: memref<256x512xbf16, #tpu.memory_space<vmem>>, %arg4: memref<1x512xf32, #tpu.memory_space<vmem>>, %arg5: memref<512x1024xbf16, #tpu.memory_space<vmem>>, %arg6: memref<1x1024xf32, #tpu.memory_space<vmem>>, %arg7: memref<1024x896xbf16, #tpu.memory_space<vmem>>, %arg8: memref<1x896xf32, #tpu.memory_space<vmem>>, %arg9: memref<2x784xf32, #tpu.memory_space<vmem>>) attributes {dimension_semantics = [], scalar_prefetch = 0 : i64, scratch_operands = 0 : i64, tpu.core_type = #tpu.core_type<tc>} {
    %c0 = arith.constant 0 : index
    %c0_0 = arith.constant 0 : index
    %0 = vector.load %arg0[%c0, %c0_0] : memref<2x128xf32, #tpu.memory_space<vmem>>, vector<2x128xf32>
    %1 = arith.truncf %0 : vector<2x128xf32> to vector<2x128xbf16>
    %c0_1 = arith.constant 0 : index
    %c0_2 = arith.constant 0 : index
    %2 = vector.load %arg1[%c0_1, %c0_2] : memref<128x256xbf16, #tpu.memory_space<vmem>>, vector<128x256xbf16>
    %cst = arith.constant dense<0.000000e+00> : vector<2x256xf32>
    %3 = tpu.matmul %1, %2, %cst {dimension_numbers = #tpu.dot_dimension_numbers<[1], [0], [0], [1], [0, 0, 1, 1], [], []>} : vector<2x128xbf16>, vector<128x256xbf16>, vector<2x256xf32> -> vector<2x256xf32>
    %c0_3 = arith.constant 0 : index
    %c0_4 = arith.constant 0 : index
    %4 = vector.load %arg2[%c0_3, %c0_4] : memref<1x256xf32, #tpu.memory_space<vmem>>, vector<1x256xf32>
    %5 = vector.broadcast %4 : vector<1x256xf32> to vector<2x256xf32>
    %6 = arith.addf %3, %5 : vector<2x256xf32>
    %cst_5 = arith.constant 0.000000e+00 : f32
    %7 = vector.broadcast %cst_5 : f32 to vector<2x256xf32>
    %8 = arith.maximumf %6, %7 : vector<2x256xf32>
    %9 = arith.truncf %8 : vector<2x256xf32> to vector<2x256xbf16>
    %c0_6 = arith.constant 0 : index
    %c0_7 = arith.constant 0 : index
    %10 = vector.load %arg3[%c0_6, %c0_7] : memref<256x512xbf16, #tpu.memory_space<vmem>>, vector<256x512xbf16>
    %cst_8 = arith.constant dense<0.000000e+00> : vector<2x512xf32>
    %11 = tpu.matmul %9, %10, %cst_8 {dimension_numbers = #tpu.dot_dimension_numbers<[1], [0], [0], [1], [0, 0, 1, 1], [], []>} : vector<2x256xbf16>, vector<256x512xbf16>, vector<2x512xf32> -> vector<2x512xf32>
    %c0_9 = arith.constant 0 : index
    %c0_10 = arith.constant 0 : index
    %12 = vector.load %arg4[%c0_9, %c0_10] : memref<1x512xf32, #tpu.memory_space<vmem>>, vector<1x512xf32>
    %13 = vector.broadcast %12 : vector<1x512xf32> to vector<2x512xf32>
    %14 = arith.addf %11, %13 : vector<2x512xf32>
    %cst_11 = arith.constant 0.000000e+00 : f32
    %15 = vector.broadcast %cst_11 : f32 to vector<2x512xf32>
    %16 = arith.maximumf %14, %15 : vector<2x512xf32>
    %17 = arith.truncf %16 : vector<2x512xf32> to vector<2x512xbf16>
    %c0_12 = arith.constant 0 : index
    %c0_13 = arith.constant 0 : index
    %18 = vector.load %arg5[%c0_12, %c0_13] : memref<512x1024xbf16, #tpu.memory_space<vmem>>, vector<512x1024xbf16>
    %cst_14 = arith.constant dense<0.000000e+00> : vector<2x1024xf32>
    %19 = tpu.matmul %17, %18, %cst_14 {dimension_numbers = #tpu.dot_dimension_numbers<[1], [0], [0], [1], [0, 0, 1, 1], [], []>} : vector<2x512xbf16>, vector<512x1024xbf16>, vector<2x1024xf32> -> vector<2x1024xf32>
    %c0_15 = arith.constant 0 : index
    %c0_16 = arith.constant 0 : index
    %20 = vector.load %arg6[%c0_15, %c0_16] : memref<1x1024xf32, #tpu.memory_space<vmem>>, vector<1x1024xf32>
    %21 = vector.broadcast %20 : vector<1x1024xf32> to vector<2x1024xf32>
    %22 = arith.addf %19, %21 : vector<2x1024xf32>
    %cst_17 = arith.constant 0.000000e+00 : f32
    %23 = vector.broadcast %cst_17 : f32 to vector<2x1024xf32>
    %24 = arith.maximumf %22, %23 : vector<2x1024xf32>
    %25 = arith.truncf %24 : vector<2x1024xf32> to vector<2x1024xbf16>
    %c0_18 = arith.constant 0 : index
    %c0_19 = arith.constant 0 : index
    %26 = vector.load %arg7[%c0_18, %c0_19] : memref<1024x896xbf16, #tpu.memory_space<vmem>>, vector<1024x896xbf16>
    %cst_20 = arith.constant dense<0.000000e+00> : vector<2x896xf32>
    %27 = tpu.matmul %25, %26, %cst_20 {dimension_numbers = #tpu.dot_dimension_numbers<[1], [0], [0], [1], [0, 0, 1, 1], [], []>} : vector<2x1024xbf16>, vector<1024x896xbf16>, vector<2x896xf32> -> vector<2x896xf32>
    %c0_21 = arith.constant 0 : index
    %c0_22 = arith.constant 0 : index
    %28 = vector.load %arg8[%c0_21, %c0_22] : memref<1x896xf32, #tpu.memory_space<vmem>>, vector<1x896xf32>
    %29 = vector.broadcast %28 : vector<1x896xf32> to vector<2x896xf32>
    %30 = arith.addf %27, %29 : vector<2x896xf32>
    %31 = math.tanh %30 : vector<2x896xf32>
    %32 = vector.extract_strided_slice %31 {offsets = [0, 0], sizes = [2, 784], strides = [1, 1]} : vector<2x896xf32> to vector<2x784xf32>
    %c0_23 = arith.constant 0 : index
    %c0_24 = arith.constant 0 : index
    %33 = vector.load %arg9[%c0_23, %c0_24] : memref<2x784xf32, #tpu.memory_space<vmem>>, vector<2x784xf32>
    tpu.vector_store %arg9[%c0_23, %c0_24], %32 {strides = array<i32>} : memref<2x784xf32, #tpu.memory_space<vmem>>, vector<2x784xf32>,
    return
  }
}

</mosaic_0001>

<bundles_post_ra>
// kernel: tpu_custom_call.1
= control target key start
LH: loop header
LB: loop body
LE: loop exit
PB: predicated region body
PF: predicated region fallthrough
CT: control target
= control target key end

     0   :  { %14 = vsyncpa [#allocation3], 0  ;;  %s8633_s0 = inlined_call_operand.hbm [shape: f32[2,128], index: 0, kind: input, shape index: {}]   ;;  %s8634_s1 = inlined_call_operand.hbm [shape: bf16[128,256], index: 1, kind: input, shape index: {}]   ;;  %s8635_s2 = inlined_call_operand.hbm [shape: f32[1,256], index: 2, kind: input, shape index: {}]   ;;  %s8636_s3 = inlined_call_operand.hbm [shape: bf16[256,512], index: 3, kind: input, shape index: {}]   ;;  %s8637_s4 = inlined_call_operand.hbm [shape: f32[1,512], index: 4, kind: input, shape index: {}]   ;;  %s8638_s5 = inlined_call_operand.hbm [shape: bf16[512,1024], index: 5, kind: input, shape index: {}]   ;;  %s8639_s6 = inlined_call_operand.hbm [shape: f32[1,1024], index: 6, kind: input, shape index: {}]   ;;  %s8640_s7 = inlined_call_operand.hbm [shape: bf16[1024,896], index: 7, kind: input, shape index: {}]   ;;  %s8641_s8 = inlined_call_operand.hbm [shape: f32[1,896], index: 8, kind: input, shape index: {}]   ;;  %s8642_s9 = inlined_call_operand.hbm [shape: f32[2,784], index: 9, kind: output, shape index: {}]  }
   0x1   :  { %15 = vsyncpa [#allocation6], 0 }
   0x2   :  { %16 = vsyncpa [#allocation9], 0 }
   0x3   :  { %17 = vsyncpa [#allocation12], 0 }
   0x4   :  { %18 = vsyncpa [#allocation15], 0 }
   0x5   :  { %19 = vsyncpa [#allocation4], 0  ;;  %s8263_s30 = smov [#allocation5]   ;;  %s8031_s13 = scalar_lea.hbm %s8634_s1, 2048 }
   0x6   :  { %s35_s10 = sshll.u32 %s8263_s30, 4  ;;  %p8032_p0 = scmp.ne.s32.totalorder %s8634_s1, %s8031_s13  ;;  %s36_s10 = int_to_ptr.vmem [resolvable:$true] %s35_s10 }
   0x7   :  { %p8035_p1 = scmp.lt.u32.totalorder %s8031_s13, %s8634_s1 }
   0x9   :  { %p8037_p2 = pnand %p8035_p1, %p8032_p0 }
   0xb   :  { %8040 = shalt.err (!%p8037_p2)
}
   0xc   :  { %s8041_s18 = scalar_lea.vmem %s36_s10, 2048  ;;  %p8046_p4 = scmp.lt.s32.totalorder %s36_s10, %s36_s10 }
   0xd   :  { %p8042_p3 = scmp.ne.s32.totalorder %s36_s10, %s8041_s18  ;;  %p8047_p5 = scmp.lt.s32.totalorder %s8041_s18, %s8041_s18 }
   0xf   :  { %p8048_p6 = por %p8047_p5, %p8046_p4 }
  0x11   :  { %p8049_p7 = pnand %p8048_p6, %p8042_p3 }
  0x13   :  { %8052 = shalt.err (!%p8049_p7)
}
  0x14   :  { %s8264_s19 = smov 128   ;;  %s8265_s20 = smov 8  }
  0x15   :  { %41 = dma.hbm_to_vmem [thread:$0]  %s8634_s1, 2048, %s36_s10, [#allocation6], %s8264_s19, %s8264_s19, %s8265_s20  }
  0x16   :  { %s8266_s23 = smov [#allocation8]   ;;  %s8053_s27 = scalar_lea.hbm %s8636_s3, 8192 }
  0x17   :  { %s57_s24 = sshll.u32 %s8266_s23, 4  ;;  %p8054_p8 = scmp.ne.s32.totalorder %s8636_s3, %s8053_s27  ;;  %s58_s24 = int_to_ptr.vmem [resolvable:$true] %s57_s24 }
  0x18   :  { %p8057_p9 = scmp.lt.u32.totalorder %s8053_s27, %s8636_s3 }
  0x1a   :  { %p8059_p10 = pnand %p8057_p9, %p8054_p8 }
  0x1c   :  { %8062 = shalt.err (!%p8059_p10)
}
  0x1d   :  { %s8063_s12 = scalar_lea.vmem %s58_s24, 8192  ;;  %p8068_p12 = scmp.lt.s32.totalorder %s58_s24, %s58_s24 }
  0x1e   :  { %p8064_p11 = scmp.ne.s32.totalorder %s58_s24, %s8063_s12  ;;  %p8069_p13 = scmp.lt.s32.totalorder %s8063_s12, %s8063_s12 }
  0x20   :  { %p8070_p0 = por %p8069_p13, %p8068_p12 }
  0x22   :  { %p8071_p1 = pnand %p8070_p0, %p8064_p11 }
  0x24   :  { %8074 = shalt.err (!%p8071_p1)
}
  0x25   :  { %s8267_s1 = smov 256   ;;  %s8268_s10 = smov 16  }
  0x26   :  { %63 = dma.hbm_to_vmem [thread:$0]  %s8636_s3, 8192, %s58_s24, [#allocation9], %s8267_s1, %s8267_s1, %s8268_s10  }
  0x27   :  { %s8269_s15 = smov [#allocation11]   ;;  %s8075_s19 = scalar_lea.hbm %s8638_s5, 32768 }
  0x28   :  { %s79_s16 = sshll.u32 %s8269_s15, 4  ;;  %p8076_p2 = scmp.ne.s32.totalorder %s8638_s5, %s8075_s19  ;;  %s80_s16 = int_to_ptr.vmem [resolvable:$true] %s79_s16 }
  0x29   :  { %p8079_p3 = scmp.lt.u32.totalorder %s8075_s19, %s8638_s5 }
  0x2b   :  { %p8081_p4 = pnand %p8079_p3, %p8076_p2 }
  0x2d   :  { %8084 = shalt.err (!%p8081_p4)
}
  0x2e   :  { %s8085_s25 = scalar_lea.vmem %s80_s16, 32768  ;;  %p8090_p6 = scmp.lt.s32.totalorder %s80_s16, %s80_s16 }
  0x2f   :  { %p8086_p5 = scmp.ne.s32.totalorder %s80_s16, %s8085_s25  ;;  %p8091_p7 = scmp.lt.s32.totalorder %s8085_s25, %s8085_s25 }
  0x31   :  { %p8092_p8 = por %p8091_p7, %p8090_p6 }
  0x33   :  { %p8093_p9 = pnand %p8092_p8, %p8086_p5 }
  0x35   :  { %8096 = shalt.err (!%p8093_p9)
}
  0x36   :  { %s8270_s3 = smov 512   ;;  %s8271_s24 = smov 32  }
  0x37   :  { %85 = dma.hbm_to_vmem [thread:$0]  %s8638_s5, 32768, %s80_s16, [#allocation12], %s8270_s3, %s8270_s3, %s8271_s24  }
  0x38   :  { %s8272_s28 = smov [#allocation14]   ;;  %s8097_s12 = scalar_lea.hbm %s8640_s7, 57344 }
  0x39   :  { %s101_s29 = sshll.u32 %s8272_s28, 4  ;;  %p8098_p10 = scmp.ne.s32.totalorder %s8640_s7, %s8097_s12  ;;  %s102_s29 = int_to_ptr.vmem [resolvable:$true] %s101_s29 }
  0x3a   :  { %p8101_p11 = scmp.lt.u32.totalorder %s8097_s12, %s8640_s7 }
  0x3c   :  { %p8103_p12 = pnand %p8101_p11, %p8098_p10 }
  0x3e   :  { %8106 = shalt.err (!%p8103_p12)
}
  0x3f   :  { %s8107_s15 = scalar_lea.vmem %s102_s29, 57344  ;;  %p8112_p0 = scmp.lt.s32.totalorder %s102_s29, %s102_s29 }
  0x40   :  { %p8108_p13 = scmp.ne.s32.totalorder %s102_s29, %s8107_s15  ;;  %p8113_p1 = scmp.lt.s32.totalorder %s8107_s15, %s8107_s15 }
  0x42   :  { %p8114_p2 = por %p8113_p1, %p8112_p0 }
  0x44   :  { %p8115_p3 = pnand %p8114_p2, %p8108_p13 }
  0x46   :  { %8118 = shalt.err (!%p8115_p3)
}
  0x47   :  { %s8273_s5 = smov 448   ;;  %s8274_s16 = smov 28  }
  0x48   :  { %107 = dma.hbm_to_vmem [thread:$0]  %s8640_s7, 57344, %s102_s29, [#allocation15], %s8273_s5, %s8273_s5, %s8274_s16  }
  0x49   :  { %s8275_s19 = smov [#allocation2]   ;;  %s8276_s21 = smov [#allocation7]  }
  0x4a   :  { %s26_s20 = sshll.u32 %s8275_s19, 4  ;;  %s48_s22 = sshll.u32 %s8276_s21, 4  ;;  %s27_s20 = int_to_ptr.vmem [resolvable:$true] %s26_s20  ;;  %s49_s22 = int_to_ptr.vmem [resolvable:$true] %s48_s22 }
  0x4b   :  { %s8119_s3 = scalar_lea.hbm %s8633_s0, 32 }
  0x4c   :  { %p8120_p4 = scmp.ne.s32.totalorder %s8633_s0, %s8119_s3  ;;  %p8123_p5 = scmp.lt.u32.totalorder %s8119_s3, %s8633_s0 }
  0x4e   :  { %p8125_p6 = pnand %p8123_p5, %p8120_p4 }
  0x50   :  { %8128 = shalt.err (!%p8125_p6)
}
  0x51   :  { %s8129_s7 = scalar_lea.vmem %s27_s20, 32  ;;  %p8134_p8 = scmp.lt.s32.totalorder %s27_s20, %s27_s20 }
  0x52   :  { %p8130_p7 = scmp.ne.s32.totalorder %s27_s20, %s8129_s7  ;;  %p8135_p9 = scmp.lt.s32.totalorder %s8129_s7, %s8129_s7 }
  0x54   :  { %p8136_p10 = por %p8135_p9, %p8134_p8 }
  0x56   :  { %p8137_p11 = pnand %p8136_p10, %p8130_p7 }
  0x58   :  { %8140 = shalt.err (!%p8137_p11)
}
  0x59   :  { %29 = dma.hbm_to_vmem [thread:$0]  %s8633_s0, 32, %s27_s20, [#allocation3]  }
  0x5a   :  { %s8141_s1 = scalar_lea.hbm %s8635_s2, 32 }
  0x5b   :  { %p8142_p12 = scmp.ne.s32.totalorder %s8635_s2, %s8141_s1  ;;  %p8145_p13 = scmp.lt.u32.totalorder %s8141_s1, %s8635_s2 }
  0x5d   :  { %p8147_p0 = pnand %p8145_p13, %p8142_p12 }
  0x5f   :  { %8150 = shalt.err (!%p8147_p0)
}
  0x60   :  { %s8151_s5 = scalar_lea.vmem %s49_s22, 32  ;;  %p8156_p2 = scmp.lt.s32.totalorder %s49_s22, %s49_s22 }
  0x61   :  { %p8152_p1 = scmp.ne.s32.totalorder %s49_s22, %s8151_s5  ;;  %p8157_p3 = scmp.lt.s32.totalorder %s8151_s5, %s8151_s5 }
  0x63   :  { %p8158_p4 = por %p8157_p3, %p8156_p2 }
  0x65   :  { %p8159_p5 = pnand %p8158_p4, %p8152_p1 }
  0x67   :  { %8162 = shalt.err (!%p8159_p5)
}
  0x68   :  { %51 = dma.hbm_to_vmem [thread:$0]  %s8635_s2, 32, %s49_s22, [#allocation6]  }
  0x69   :  { %s8277_s17 = smov [#allocation10]   ;;  %s8278_s19 = smov [#allocation13]  }
  0x6a   :  { %s70_s18 = sshll.u32 %s8277_s17, 4  ;;  %s92_s20 = sshll.u32 %s8278_s19, 4  ;;  %s71_s18 = int_to_ptr.vmem [resolvable:$true] %s70_s18  ;;  %s93_s20 = int_to_ptr.vmem [resolvable:$true] %s92_s20 }
  0x6b   :  { %s8163_s25 = scalar_lea.hbm %s8637_s4, 64 }
  0x6c   :  { %p8164_p6 = scmp.ne.s32.totalorder %s8637_s4, %s8163_s25  ;;  %p8167_p7 = scmp.lt.u32.totalorder %s8163_s25, %s8637_s4 }
  0x6e   :  { %p8169_p8 = pnand %p8167_p7, %p8164_p6 }
  0x70   :  { %8172 = shalt.err (!%p8169_p8)
}
  0x71   :  { %s8173_s2 = scalar_lea.vmem %s71_s18, 64  ;;  %p8178_p10 = scmp.lt.s32.totalorder %s71_s18, %s71_s18 }
  0x72   :  { %p8174_p9 = scmp.ne.s32.totalorder %s71_s18, %s8173_s2  ;;  %p8179_p11 = scmp.lt.s32.totalorder %s8173_s2, %s8173_s2 }
  0x74   :  { %p8180_p12 = por %p8179_p11, %p8178_p10 }
  0x76   :  { %p8181_p13 = pnand %p8180_p12, %p8174_p9 }
  0x78   :  { %8184 = shalt.err (!%p8181_p13)
}
  0x79   :  { %73 = dma.hbm_to_vmem [thread:$0]  %s8637_s4, 64, %s71_s18, [#allocation9]  }
  0x7a   :  { %s8185_s30 = scalar_lea.hbm %s8639_s6, 128 }
  0x7b   :  { %p8186_p0 = scmp.ne.s32.totalorder %s8639_s6, %s8185_s30  ;;  %p8189_p1 = scmp.lt.u32.totalorder %s8185_s30, %s8639_s6 }
  0x7d   :  { %p8191_p2 = pnand %p8189_p1, %p8186_p0 }
  0x7f   :  { %8194 = shalt.err (!%p8191_p2)
}
  0x80   :  { %s8195_s13 = scalar_lea.vmem %s93_s20, 128  ;;  %p8200_p4 = scmp.lt.s32.totalorder %s93_s20, %s93_s20 }
  0x81   :  { %p8196_p3 = scmp.ne.s32.totalorder %s93_s20, %s8195_s13  ;;  %p8201_p5 = scmp.lt.s32.totalorder %s8195_s13, %s8195_s13 }
  0x83   :  { %p8202_p6 = por %p8201_p5, %p8200_p4 }
  0x85   :  { %p8203_p7 = pnand %p8202_p6, %p8196_p3 }
  0x87   :  { %8206 = shalt.err (!%p8203_p7)
}
  0x88   :  { %95 = dma.hbm_to_vmem [thread:$0]  %s8639_s6, 128, %s93_s20, [#allocation12]  }
  0x89   :  { %s8279_s15 = smov [#allocation16]   ;;  %s8207_s17 = scalar_lea.hbm %s8641_s8, 112 }
  0x8a   :  { %s114_s5 = sshll.u32 %s8279_s15, 4  ;;  %p8208_p8 = scmp.ne.s32.totalorder %s8641_s8, %s8207_s17  ;;  %s115_s5 = int_to_ptr.vmem [resolvable:$true] %s114_s5 }
  0x8b   :  { %p8211_p9 = scmp.lt.u32.totalorder %s8207_s17, %s8641_s8 }
  0x8d   :  { %p8213_p10 = pnand %p8211_p9, %p8208_p8 }
  0x8f   :  { %8216 = shalt.err (!%p8213_p10)
}
  0x90   :  { %s8217_s25 = scalar_lea.vmem %s115_s5, 112  ;;  %s8221_s6 = scalar_lea.vmem %s115_s5, 128 }
  0x91   :  { %p8218_p11 = scmp.ne.s32.totalorder %s115_s5, %s8217_s25  ;;  %p8222_p12 = scmp.lt.s32.totalorder %s115_s5, %s115_s5 }
  0x92   :  { %p8223_p13 = scmp.lt.s32.totalorder %s8221_s6, %s8217_s25 }
  0x94   :  { %p8224_p0 = por %p8223_p13, %p8222_p12 }
  0x96   :  { %p8225_p1 = pnand %p8224_p0, %p8218_p11 }
  0x98   :  { %8228 = shalt.err (!%p8225_p1)
}
  0x99   :  { %117 = dma.hbm_to_vmem [thread:$0]  %s8641_s8, 112, %s115_s5, [#allocation15]  }
  0x9a   :  { %8251 = dma.done.wait [#allocation3], 32  }
  0x9b   :  { %8252 = vsyncadd [#allocation3], 4294967264 }
  0x9c   :  { %8253 = dma.done.wait [#allocation6], 2080  }
  0x9d   :  { %8254 = vsyncadd [#allocation6], 4294965216 }
  0x9e   :  { %8255 = dma.done.wait [#allocation9], 8256  }
  0x9f   :  { %8256 = vsyncadd [#allocation9], 4294959040 }
  0xa0   :  { %8257 = dma.done.wait [#allocation12], 32896  }
  0xa1   :  { %8258 = vsyncadd [#allocation12], 4294934400 }
  0xa2   :  { %8259 = dma.done.wait [#allocation15], 57456  }
  0xa3   :  { %8260 = vsyncadd [#allocation15], 4294909840  ;;  %v8280_v0 = vmov 0   ;;  %v7257_v1 = vld [vmem:[#allocation5 + $0x4] ss:$8 sps:$4 sm:$0xff]   ;;  %vm6274_vm0 = vcmask 1041408  }
  0xa4   :  { %288 = vmatprep.mubr.bf16.mxu0 %v8280_v0  ;;  %v7259_v2 = vld [vmem:[#allocation5] ss:$8 sps:$4 sm:$0xff]   ;;  %256 = vmatprep.subr.bf16.mxu0 %v7257_v1  ;;  %v7260_v3 = vld [vmem:[#allocation5 + $0x14] ss:$8 sps:$4 sm:$0xff]   ;;  %v7262_v4 = vld [vmem:[#allocation5 + $0x10] ss:$8 sps:$4 sm:$0xff]  }
  0xa5   :  { %257 = vmatpush1.bf16.msra.mxu0 %v7259_v2  ;;  %v7263_v5 = vld [vmem:[#allocation5 + $0x24] ss:$8 sps:$4 sm:$0xff]   ;;  %v7265_v6 = vld [vmem:[#allocation5 + $0x20] ss:$8 sps:$4 sm:$0xff]   ;;  %v7266_v7 = vld [vmem:[#allocation5 + $0x34] ss:$8 sps:$4 sm:$0xff]  }
  0xa6   :  { %258 = vmatprep.subr.bf16.mxu0 %v7260_v3  ;;  %v7268_v8 = vld [vmem:[#allocation5 + $0x30] ss:$8 sps:$4 sm:$0xff]   ;;  %v7269_v9 = vld [vmem:[#allocation5 + $0x44] ss:$8 sps:$4 sm:$0xff]   ;;  %v7271_v10 = vld [vmem:[#allocation5 + $0x40] ss:$8 sps:$4 sm:$0xff]  }
  0xa7   :  { %v7272_v11 = vld [vmem:[#allocation5 + $0x54] ss:$8 sps:$4 sm:$0xff]   ;;  %v7274_v12 = vld [vmem:[#allocation5 + $0x50] ss:$8 sps:$4 sm:$0xff]   ;;  %v7275_v13 = vld [vmem:[#allocation5 + $0x64] ss:$8 sps:$4 sm:$0xff]  }
  0xa8   :  { %v7277_v14 = vld [vmem:[#allocation5 + $0x60] ss:$8 sps:$4 sm:$0xff]   ;;  %v7278_v15 = vld [vmem:[#allocation5 + $0x74] ss:$8 sps:$4 sm:$0xff]   ;;  %v7280_v16 = vld [vmem:[#allocation5 + $0x70] ss:$8 sps:$4 sm:$0xff]  }
  0xa9   :  { %259 = vmatpush1.bf16.msra.mxu0 %v7262_v4  ;;  %v146_v17 = vld [vmem:[#allocation2] sm:$0x3]  ;;  %v7283_v18 = vld [vmem:[#allocation8 + $0x4] ss:$16 sps:$4 sm:$0xff]   ;;  %v7281_v19 = vld [vmem:[#allocation8] ss:$16 sps:$4 sm:$0xff]  }
  0xaa   :  { %260 = vmatprep.subr.bf16.mxu0 %v7263_v5  ;;  %v147_v20 = vpack.c.bf16 %v146_v17, %v146_v17  ;;  %v7286_v21 = vld [vmem:[#allocation8 + $0x24] ss:$16 sps:$4 sm:$0xff]   ;;  %v7284_v22 = vld [vmem:[#allocation8 + $0x20] ss:$16 sps:$4 sm:$0xff]   ;;  %v7331_v51 = vld [vmem:[#allocation8 + $0xc] ss:$16 sps:$4 sm:$0xff]  }
  0xab   :  { %v7289_v23 = vld [vmem:[#allocation8 + $0x44] ss:$16 sps:$4 sm:$0xff]   ;;  %v7287_v24 = vld [vmem:[#allocation8 + $0x40] ss:$16 sps:$4 sm:$0xff]   ;;  %vm6275_vm1 = vcmask 1043458   ;;  %vm6277_vm3 = vcmask 128004  }
  0xac   :  { %v7292_v25 = vld [vmem:[#allocation8 + $0x64] ss:$16 sps:$4 sm:$0xff]   ;;  %v7290_v26 = vld [vmem:[#allocation8 + $0x60] ss:$16 sps:$4 sm:$0xff]   ;;  %vm6276_vm2 = vmor %vm6275_vm1, %vm6274_vm0  ;;  %s8282_s8 = smov [#allocation17]  }
  0xad   :  { %261 = vmatpush1.bf16.msra.mxu0 %v7265_v6  ;;  %v7295_v27 = vld [vmem:[#allocation8 + $0x84] ss:$16 sps:$4 sm:$0xff]   ;;  %v7293_v28 = vld [vmem:[#allocation8 + $0x80] ss:$16 sps:$4 sm:$0xff]   ;;  %s6286_s24 = sshll.u32 %s8282_s8, 4  ;;  %vm6278_vm4 = vmor %vm6277_vm3, %vm6276_vm2  ;;  %s6287_s24 = int_to_ptr.vmem [resolvable:$true] %s6286_s24 }
  0xae   :  { %262 = vmatprep.subr.bf16.mxu0 %v7266_v7  ;;  %v7298_v29 = vld [vmem:[#allocation8 + $0xa4] ss:$16 sps:$4 sm:$0xff]   ;;  %v7296_v30 = vld [vmem:[#allocation8 + $0xa0] ss:$16 sps:$4 sm:$0xff]   ;;  %s8229_s26 = scalar_lea.vmem %s6287_s24, 224  ;;  %p8234_p3 = scmp.lt.s32.totalorder %s6287_s24, %s6287_s24 }
  0xaf   :  { %v7301_v31 = vld [vmem:[#allocation8 + $0xc4] ss:$16 sps:$4 sm:$0xff]   ;;  %v7299_v32 = vld [vmem:[#allocation8 + $0xc0] ss:$16 sps:$4 sm:$0xff]   ;;  %p8230_p2 = scmp.ne.s32.totalorder %s6287_s24, %s8229_s26  ;;  %p8235_p4 = scmp.lt.s32.totalorder %s8229_s26, %s8229_s26 }
  0xb0   :  { %v7304_v33 = vld [vmem:[#allocation8 + $0xe4] ss:$16 sps:$4 sm:$0xff]   ;;  %v7302_v34 = vld [vmem:[#allocation8 + $0xe0] ss:$16 sps:$4 sm:$0xff]  }
  0xb1   :  { %263 = vmatpush1.bf16.msra.mxu0 %v7268_v8  ;;  %v7307_v35 = vld [vmem:[#allocation8 + $0x104] ss:$16 sps:$4 sm:$0xff]   ;;  %v7305_v36 = vld [vmem:[#allocation8 + $0x100] ss:$16 sps:$4 sm:$0xff]   ;;  %p8236_p5 = por %p8235_p4, %p8234_p3 }
  0xb2   :  { %264 = vmatprep.subr.bf16.mxu0 %v7269_v9  ;;  %v7310_v37 = vld [vmem:[#allocation8 + $0x124] ss:$16 sps:$4 sm:$0xff]   ;;  %v7308_v38 = vld [vmem:[#allocation8 + $0x120] ss:$16 sps:$4 sm:$0xff]  }
  0xb3   :  { %v7313_v39 = vld [vmem:[#allocation8 + $0x144] ss:$16 sps:$4 sm:$0xff]   ;;  %v7311_v40 = vld [vmem:[#allocation8 + $0x140] ss:$16 sps:$4 sm:$0xff]   ;;  %p8237_p6 = pnand %p8236_p5, %p8230_p2 }
  0xb4   :  { %v7316_v41 = vld [vmem:[#allocation8 + $0x164] ss:$16 sps:$4 sm:$0xff]   ;;  %v7314_v42 = vld [vmem:[#allocation8 + $0x160] ss:$16 sps:$4 sm:$0xff]  }
  0xb5   :  { %265 = vmatpush1.bf16.msra.mxu0 %v7271_v10  ;;  %v7319_v43 = vld [vmem:[#allocation8 + $0x184] ss:$16 sps:$4 sm:$0xff]   ;;  %v7317_v44 = vld [vmem:[#allocation8 + $0x180] ss:$16 sps:$4 sm:$0xff]  }
  0xb6   :  { %266 = vmatprep.subr.bf16.mxu0 %v7272_v11  ;;  %v7322_v45 = vld [vmem:[#allocation8 + $0x1a4] ss:$16 sps:$4 sm:$0xff]   ;;  %v7320_v46 = vld [vmem:[#allocation8 + $0x1a0] ss:$16 sps:$4 sm:$0xff]  }
  0xb7   :  { %v7325_v47 = vld [vmem:[#allocation8 + $0x1c4] ss:$16 sps:$4 sm:$0xff]   ;;  %v7323_v48 = vld [vmem:[#allocation8 + $0x1c0] ss:$16 sps:$4 sm:$0xff]  }
  0xb8   :  { %v7328_v49 = vld [vmem:[#allocation8 + $0x1e4] ss:$16 sps:$4 sm:$0xff]   ;;  %v7326_v50 = vld [vmem:[#allocation8 + $0x1e0] ss:$16 sps:$4 sm:$0xff]  }
  0xb9   :  { %267 = vmatpush1.bf16.msra.mxu0 %v7274_v12  ;;  %v797_v52 = vld [vmem:[#allocation11] sm:$0xff] }
  0xba   :  { %268 = vmatprep.subr.bf16.mxu0 %v7275_v13  ;;  %v801_v53 = vld [vmem:[#allocation11 + $0x20] sm:$0xff] }
  0xbb   :  { %v6380_v54 = vcombine.high %v797_v52, %v801_v53  ;;  %v6379_v55 = vcombine.low %v797_v52, %v801_v53  ;;  %v805_v56 = vld [vmem:[#allocation11 + $0x40] sm:$0xff] }
  0xbc   :  { %v809_v57 = vld [vmem:[#allocation11 + $0x60] sm:$0xff] }
  0xbd   :  { %269 = vmatpush1.bf16.msra.mxu0 %v7277_v14  ;;  %v6388_v58 = vcombine.high %v805_v56, %v809_v57  ;;  %2375 = vmatprep.subr.bf16.mxu1 %v6380_v54  ;;  %v6387_v59 = vcombine.low %v805_v56, %v809_v57  ;;  %v813_v60 = vld [vmem:[#allocation11 + $0x80] sm:$0xff] }
  0xbe   :  { %270 = vmatprep.subr.bf16.mxu0 %v7278_v15  ;;  %2376 = vmatpush1.bf16.msra.mxu1 %v6379_v55  ;;  %v817_v61 = vld [vmem:[#allocation11 + $0xa0] sm:$0xff] }
  0xbf   :  { %2377 = vmatprep.subr.bf16.mxu1 %v6388_v58  ;;  %v6396_v62 = vcombine.high %v813_v60, %v817_v61  ;;  %v6395_v63 = vcombine.low %v813_v60, %v817_v61  ;;  %v821_v0 = vld [vmem:[#allocation11 + $0xc0] sm:$0xff] }
  0xc0   :  { %v825_v1 = vld [vmem:[#allocation11 + $0xe0] sm:$0xff] }
  0xc1   :  { %271 = vmatpush1.bf16.msra.mxu0 %v7280_v16  ;;  %v6404_v2 = vcombine.high %v821_v0, %v825_v1  ;;  %v6403_v3 = vcombine.low %v821_v0, %v825_v1  ;;  %v829_v4 = vld [vmem:[#allocation11 + $0x100] sm:$0xff]  ;;  %v7337_v0 = vld [vmem:[#allocation8 + $0x4c] ss:$16 sps:$4 sm:$0xff]  }
  0xc2   :  { %707 = vmatprep.subr.bf16.mxu0 %v7283_v18  ;;  %2378 = vmatpush1.bf16.msra.mxu1 %v6387_v59  ;;  %v833_v5 = vld [vmem:[#allocation11 + $0x120] sm:$0xff] }
  0xc3   :  { %2379 = vmatprep.subr.bf16.mxu1 %v6396_v62  ;;  %v6412_v6 = vcombine.high %v829_v4, %v833_v5  ;;  %v6411_v7 = vcombine.low %v829_v4, %v833_v5  ;;  %v837_v8 = vld [vmem:[#allocation11 + $0x140] sm:$0xff]  ;;  %v7334_v62 = vld [vmem:[#allocation8 + $0x2c] ss:$16 sps:$4 sm:$0xff]  }
  0xc4   :  { %289 = vmatmul.mubr.bf16.vlgmr.msra.gmra.mrb[0].mxu0 %v147_v20  ;;  %v841_v9 = vld [vmem:[#allocation11 + $0x160] sm:$0xff]  ;;  %v7343_v4 = vld [vmem:[#allocation8 + $0x8c] ss:$16 sps:$4 sm:$0xff]  }
  0xc5   :  { %708 = vmatpush1.bf16.msra.mxu0 %v7281_v19  ;;  %v6420_v10 = vcombine.high %v837_v8, %v841_v9  ;;  %v6419_v11 = vcombine.low %v837_v8, %v841_v9  ;;  %v845_v12 = vld [vmem:[#allocation11 + $0x180] sm:$0xff]  ;;  %v7349_v8 = vld [vmem:[#allocation8 + $0xcc] ss:$16 sps:$4 sm:$0xff]  }
  0xc6   :  { %709 = vmatprep.subr.bf16.mxu0 %v7286_v21  ;;  %2380 = vmatpush1.bf16.msra.mxu1 %v6395_v63  ;;  %v849_v13 = vld [vmem:[#allocation11 + $0x1a0] sm:$0xff] }
  0xc7   :  { %2381 = vmatprep.subr.bf16.mxu1 %v6404_v2  ;;  %v6428_v14 = vcombine.high %v845_v12, %v849_v13  ;;  %v6427_v15 = vcombine.low %v845_v12, %v849_v13  ;;  %v853_v16 = vld [vmem:[#allocation11 + $0x1c0] sm:$0xff]  ;;  %v7340_v2 = vld [vmem:[#allocation8 + $0x6c] ss:$16 sps:$4 sm:$0xff]  }
  0xc8   :  { %v857_v17 = vld [vmem:[#allocation11 + $0x1e0] sm:$0xff]  ;;  %v7355_v12 = vld [vmem:[#allocation8 + $0x10c] ss:$16 sps:$4 sm:$0xff]  }
  0xc9   :  { %710 = vmatpush1.bf16.msra.mxu0 %v7284_v22  ;;  %v6436_v18 = vcombine.high %v853_v16, %v857_v17  ;;  %v6435_v19 = vcombine.low %v853_v16, %v857_v17  ;;  %v861_v20 = vld [vmem:[#allocation11 + $0x200] sm:$0xff]  ;;  %v7361_v16 = vld [vmem:[#allocation8 + $0x14c] ss:$16 sps:$4 sm:$0xff]  }
  0xca   :  { %711 = vmatprep.subr.bf16.mxu0 %v7289_v23  ;;  %2382 = vmatpush1.bf16.msra.mxu1 %v6403_v3  ;;  %v865_v21 = vld [vmem:[#allocation11 + $0x220] sm:$0xff] }
  0xcb   :  { %2383 = vmatprep.subr.bf16.mxu1 %v6412_v6  ;;  %v6444_v22 = vcombine.high %v861_v20, %v865_v21  ;;  %v6443_v23 = vcombine.low %v861_v20, %v865_v21  ;;  %v7329_v60 = vld [vmem:[#allocation8 + $0x8] ss:$16 sps:$4 sm:$0xff]   ;;  %v7346_v6 = vld [vmem:[#allocation8 + $0xac] ss:$16 sps:$4 sm:$0xff]  }
  0xcc   :  { %v7332_v63 = vld [vmem:[#allocation8 + $0x28] ss:$16 sps:$4 sm:$0xff]   ;;  %v7367_v20 = vld [vmem:[#allocation8 + $0x18c] ss:$16 sps:$4 sm:$0xff]  }
  0xcd   :  { %712 = vmatpush1.bf16.msra.mxu0 %v7287_v24  ;;  %v869_v24 = vld [vmem:[#allocation11 + $0x240] sm:$0xff] }
  0xce   :  { %713 = vmatprep.subr.bf16.mxu0 %v7292_v25  ;;  %2384 = vmatpush1.bf16.msra.mxu1 %v6411_v7  ;;  %v873_v25 = vld [vmem:[#allocation11 + $0x260] sm:$0xff] }
  0xcf   :  { %2385 = vmatprep.subr.bf16.mxu1 %v6420_v10  ;;  %v7335_v1 = vld [vmem:[#allocation8 + $0x48] ss:$16 sps:$4 sm:$0xff]   ;;  %v7352_v10 = vld [vmem:[#allocation8 + $0xec] ss:$16 sps:$4 sm:$0xff]  }
  0xd0   :  { %v7338_v3 = vld [vmem:[#allocation8 + $0x68] ss:$16 sps:$4 sm:$0xff]  }
  0xd1   :  { %714 = vmatpush1.bf16.msra.mxu0 %v7290_v26  ;;  %v6452_v26 = vcombine.high %v869_v24, %v873_v25  ;;  %v7341_v5 = vld [vmem:[#allocation8 + $0x88] ss:$16 sps:$4 sm:$0xff]  }
  0xd2   :  { %715 = vmatprep.subr.bf16.mxu0 %v7295_v27  ;;  %2386 = vmatpush1.bf16.msra.mxu1 %v6419_v11  ;;  %v6451_v27 = vcombine.low %v869_v24, %v873_v25  ;;  %v7344_v7 = vld [vmem:[#allocation8 + $0xa8] ss:$16 sps:$4 sm:$0xff]   ;;  %v7373_v24 = vld [vmem:[#allocation8 + $0x1cc] ss:$16 sps:$4 sm:$0xff]  }
  0xd3   :  { %2387 = vmatprep.subr.bf16.mxu1 %v6428_v14  ;;  %v7347_v9 = vld [vmem:[#allocation8 + $0xc8] ss:$16 sps:$4 sm:$0xff]   ;;  %v7358_v14 = vld [vmem:[#allocation8 + $0x12c] ss:$16 sps:$4 sm:$0xff]  }
  0xd4   :  { %v7350_v11 = vld [vmem:[#allocation8 + $0xe8] ss:$16 sps:$4 sm:$0xff]  }
  0xd5   :  { %716 = vmatpush1.bf16.msra.mxu0 %v7293_v28  ;;  %v877_v28 = vld [vmem:[#allocation11 + $0x280] sm:$0xff] }
  0xd6   :  { %717 = vmatprep.subr.bf16.mxu0 %v7298_v29  ;;  %2388 = vmatpush1.bf16.msra.mxu1 %v6427_v15  ;;  %v881_v29 = vld [vmem:[#allocation11 + $0x2a0] sm:$0xff] }
  0xd7   :  { %2389 = vmatprep.subr.bf16.mxu1 %v6436_v18  ;;  %v7353_v13 = vld [vmem:[#allocation8 + $0x108] ss:$16 sps:$4 sm:$0xff]   ;;  %v7364_v18 = vld [vmem:[#allocation8 + $0x16c] ss:$16 sps:$4 sm:$0xff]  }
  0xd8   :  { %v7356_v15 = vld [vmem:[#allocation8 + $0x128] ss:$16 sps:$4 sm:$0xff]  }
  0xd9   :  { %718 = vmatpush1.bf16.msra.mxu0 %v7296_v30  ;;  %v6460_v30 = vcombine.high %v877_v28, %v881_v29  ;;  %v7359_v17 = vld [vmem:[#allocation8 + $0x148] ss:$16 sps:$4 sm:$0xff]  }
  0xda   :  { %719 = vmatprep.subr.bf16.mxu0 %v7301_v31  ;;  %2390 = vmatpush1.bf16.msra.mxu1 %v6435_v19  ;;  %v166_v31 = vlaneseq  ;;  %v7362_v19 = vld [vmem:[#allocation8 + $0x168] ss:$16 sps:$4 sm:$0xff]  }
  0xdb   :  { %2391 = vmatprep.subr.bf16.mxu1 %v6444_v22  ;;  %v7365_v21 = vld [vmem:[#allocation8 + $0x188] ss:$16 sps:$4 sm:$0xff]   ;;  %v7370_v22 = vld [vmem:[#allocation8 + $0x1ac] ss:$16 sps:$4 sm:$0xff]  }
  0xdc   :  { %v7371_v25 = vld [vmem:[#allocation8 + $0x1c8] ss:$16 sps:$4 sm:$0xff]  }
  0xdd   :  { %720 = vmatpush1.bf16.msra.mxu0 %v7299_v32  ;;  %v6459_v32 = vcombine.low %v877_v28, %v881_v29  ;;  %v802_v28 = vld [vmem:[#allocation11 + $0x28] sm:$0xff]  ;;  %v7374_v29 = vld [vmem:[#allocation8 + $0x1e8] ss:$16 sps:$4 sm:$0xff]  }
  0xde   :  { %721 = vmatprep.subr.bf16.mxu0 %v7304_v33  ;;  %2392 = vmatpush1.bf16.msra.mxu1 %v6443_v23  ;;  %v885_v33 = vld [vmem:[#allocation11 + $0x2c0] sm:$0xff] }
  0xdf   :  { %2393 = vmatprep.subr.bf16.mxu1 %v6452_v26  ;;  %v7368_v23 = vld [vmem:[#allocation8 + $0x1a8] ss:$16 sps:$4 sm:$0xff]   ;;  %v7376_v26 = vld [vmem:[#allocation8 + $0x1ec] ss:$16 sps:$4 sm:$0xff]  }
  0xe1   :  { %722 = vmatpush1.bf16.msra.mxu0 %v7302_v34  ;;  %v889_v34 = vld [vmem:[#allocation11 + $0x2e0] sm:$0xff] }
  0xe2   :  { %723 = vmatprep.subr.bf16.mxu0 %v7307_v35  ;;  %2394 = vmatpush1.bf16.msra.mxu1 %v6451_v27  ;;  %v6468_v35 = vcombine.high %v885_v33, %v889_v34  ;;  %v798_v27 = vld [vmem:[#allocation11 + $0x8] sm:$0xff] }
  0xe3   :  { %2395 = vmatprep.subr.bf16.mxu1 %v6460_v30  ;;  %v6382_v30 = vcombine.high %v798_v27, %v802_v28 }
  0xe5   :  { %724 = vmatpush1.bf16.msra.mxu0 %v7305_v36  ;;  %v8441_v36 = vshrl.u32 %v166_v31, 7  ;;  %v806_v31 = vld [vmem:[#allocation11 + $0x48] sm:$0xff] }
  0xe6   :  { %725 = vmatprep.subr.bf16.mxu0 %v7310_v37  ;;  %2396 = vmatpush1.bf16.msra.mxu1 %v6459_v32  ;;  %v6467_v37 = vcombine.low %v885_v33, %v889_v34  ;;  %v810_v32 = vld [vmem:[#allocation11 + $0x68] sm:$0xff]  ;;  %v6381_v33 = vcombine.low %v798_v27, %v802_v28 }
  0xe7   :  { %2397 = vmatprep.subr.bf16.mxu1 %v6468_v35  ;;  %v6390_v34 = vcombine.high %v806_v31, %v810_v32  ;;  %v814_v35 = vld [vmem:[#allocation11 + $0x88] sm:$0xff] }
  0xe9   :  { %726 = vmatpush1.bf16.msra.mxu0 %v7308_v38  ;;  %v893_v38 = vld [vmem:[#allocation11 + $0x300] sm:$0xff] }
  0xea   :  { %727 = vmatprep.subr.bf16.mxu0 %v7313_v39  ;;  %v897_v39 = vld [vmem:[#allocation11 + $0x320] sm:$0xff]  ;;  %2398 = vmatpush1.bf16.msra.mxu1 %v6467_v37  ;;  %v818_v37 = vld [vmem:[#allocation11 + $0xa8] sm:$0xff] }
  0xed   :  { %728 = vmatpush1.bf16.msra.mxu0 %v7311_v40  ;;  %v6476_v40 = vcombine.high %v893_v38, %v897_v39 }
  0xee   :  { %729 = vmatprep.subr.bf16.mxu0 %v7316_v41  ;;  %v8444_v41 = vsub.s32 0, %v8441_v36 }
  0xef   :  { %2399 = vmatprep.subr.bf16.mxu1 %v6476_v40  ;;  %v822_v40 = vld [vmem:[#allocation11 + $0xc8] sm:$0xff] }
  0xf1   :  { %730 = vmatpush1.bf16.msra.mxu0 %v7314_v42  ;;  %v6475_v42 = vcombine.low %v893_v38, %v897_v39  ;;  %v6389_v38 = vcombine.low %v806_v31, %v810_v32  ;;  %v6398_v39 = vcombine.high %v814_v35, %v818_v37 }
  0xf2   :  { %731 = vmatprep.subr.bf16.mxu0 %v7319_v43  ;;  %v164_v43 = vld [vmem:[#allocation7] sm:$0x3] }
  0xf3   :  { %2400 = vmatpush1.bf16.msra.mxu1 %v6475_v42  ;;  %v826_v42 = vld [vmem:[#allocation11 + $0xe8] sm:$0xff] }
  0xf5   :  { %732 = vmatpush1.bf16.msra.mxu0 %v7317_v44  ;;  %v8447_v44 = vsub.s32 1, %v8441_v36 }
  0xf6   :  { %733 = vmatprep.subr.bf16.mxu0 %v7322_v45  ;;  %v901_v45 = vld [vmem:[#allocation11 + $0x340] sm:$0xff] }
  0xf9   :  { %734 = vmatpush1.bf16.msra.mxu0 %v7320_v46  ;;  %v905_v46 = vld [vmem:[#allocation11 + $0x360] sm:$0xff] }
  0xfa   :  { %735 = vmatprep.subr.bf16.mxu0 %v7325_v47  ;;  %v6484_v47 = vcombine.high %v901_v45, %v905_v46 }
  0xfc   :  { %2401 = vmatprep.subr.bf16.mxu1 %v6484_v47  ;;  %v834_v47 = vld [vmem:[#allocation11 + $0x128] sm:$0xff] }
  0xfd   :  { %736 = vmatpush1.bf16.msra.mxu0 %v7323_v48  ;;  %v169_v48 = vrot.slane %v164_v43, %v8444_v41 }
  0xfe   :  { %737 = vmatprep.subr.bf16.mxu0 %v7328_v49  ;;  %v6483_v49 = vcombine.low %v901_v45, %v905_v46  ;;  %v6406_v45 = vcombine.high %v822_v40, %v826_v42  ;;  %v830_v46 = vld [vmem:[#allocation11 + $0x108] sm:$0xff] }
 0x100   :  { %2402 = vmatpush1.bf16.msra.mxu1 %v6483_v49  ;;  %v6414_v49 = vcombine.high %v830_v46, %v834_v47 }
 0x101   :  { %738 = vmatpush1.bf16.msra.mxu0 %v7326_v50  ;;  %v173_v50 = vrot.slane %v164_v43, %v8447_v44  ;;  %v6397_v43 = vcombine.low %v814_v35, %v818_v37 }
 0x102   :  { %748 = vmatprep.subr.bf16.mxu0 %v7331_v51 }
 0x197   :  { %v290_v51 = vpop.f32.mrb[0].mxu0 }
 0x198   :  { %v291_v52 = vadd.f32 %v290_v51, %v169_v48  ;;  %v292_v53 = vpop.f32.mrb[1].mxu0  ;;  %v6405_v48 = vcombine.low %v822_v40, %v826_v42  ;;  %v842_v51 = vld [vmem:[#allocation11 + $0x168] sm:$0xff] }
 0x199   :  { %v293_v54 = vadd.f32 %v292_v53, %v173_v50  ;;  %v294_v55 = vpop.f32.mrb[2].mxu0  ;;  %v838_v50 = vld [vmem:[#allocation11 + $0x148] sm:$0xff] }
 0x19a   :  { %v297_v56 = vmax.f32 %v291_v52, 0.0  ;;  %v295_v57 = vpop.f32.mrb[3].mxu0  ;;  %v6413_v52 = vcombine.low %v830_v46, %v834_v47  ;;  %v6422_v53 = vcombine.high %v838_v50, %v842_v51  ;;  %v850_v55 = vld [vmem:[#allocation11 + $0x1a8] sm:$0xff] }
 0x19b   :  { %v298_v58 = vmax.f32 %v293_v54, 0.0  ;;  %v846_v54 = vld [vmem:[#allocation11 + $0x188] sm:$0xff]  ;;  %v909_v57 = vld [vmem:[#allocation11 + $0x380] sm:$0xff] }
 0x19c   :  { %v8451_v61 = vpack.c.bf16 %v297_v56, %v297_v56  ;;  %v6421_v56 = vcombine.low %v838_v50, %v842_v51  ;;  %v8471_v50 = vld [vmem:[#allocation10] sm:$0xf] }
 0x19d   :  { %v300_v59 = vpack.c.bf16 %v298_v58, %v298_v58  ;;  %v913_v58 = vld [vmem:[#allocation11 + $0x3a0] sm:$0xff]  ;;  %v370_v51 = vrot.slane %v8471_v50, %v8444_v41 }
 0x19f   :  { %739 = vmatprep.mubr.bf16.mxu0 %v300_v59 }
 0x1a0   :  { %740 = vmatmul.mubr.bf16.vlgmr.msra.gmra.mrb[4].mxu0 %v8451_v61 }
 0x1a1   :  { %749 = vmatpush1.bf16.msra.mxu0 %v7329_v60  ;;  %780 = vmatprep.mubr.bf16.mxu0 %v300_v59  ;;  %v6430_v59 = vcombine.high %v846_v54, %v850_v55  ;;  %v6492_v60 = vcombine.high %v909_v57, %v913_v58 }
 0x1a2   :  { %750 = vmatprep.subr.bf16.mxu0 %v7334_v62  ;;  %v858_v62 = vld [vmem:[#allocation11 + $0x1e8] sm:$0xff] }
 0x1a3   :  { %2403 = vmatprep.subr.bf16.mxu1 %v6492_v60  ;;  %v933_v60 = vld [vmem:[#allocation11 + $0x440] sm:$0xff] }
 0x1a5   :  { %751 = vmatpush1.bf16.msra.mxu0 %v7332_v63  ;;  %v6491_v63 = vcombine.low %v909_v57, %v913_v58 }
 0x1a6   :  { %752 = vmatprep.subr.bf16.mxu0 %v7337_v0  ;;  %v6429_v0 = vcombine.low %v846_v54, %v850_v55 }
 0x1a7   :  { %2404 = vmatpush1.bf16.msra.mxu1 %v6491_v63  ;;  %v934_v63 = vld [vmem:[#allocation11 + $0x448] sm:$0xff] }
 0x1a9   :  { %753 = vmatpush1.bf16.msra.mxu0 %v7335_v1  ;;  %v917_v1 = vld [vmem:[#allocation11 + $0x3c0] sm:$0xff] }
 0x1aa   :  { %754 = vmatprep.subr.bf16.mxu0 %v7340_v2  ;;  %v921_v2 = vld [vmem:[#allocation11 + $0x3e0] sm:$0xff] }
 0x1ad   :  { %755 = vmatpush1.bf16.msra.mxu0 %v7338_v3 }
 0x1ae   :  { %756 = vmatprep.subr.bf16.mxu0 %v7343_v4  ;;  %v6500_v4 = vcombine.high %v917_v1, %v921_v2 }
 0x1b0   :  { %2405 = vmatprep.subr.bf16.mxu1 %v6500_v4 }
 0x1b1   :  { %757 = vmatpush1.bf16.msra.mxu0 %v7341_v5  ;;  %v862_v5 = vld [vmem:[#allocation11 + $0x208] sm:$0xff] }
 0x1b2   :  { %758 = vmatprep.subr.bf16.mxu0 %v7346_v6  ;;  %v866_v6 = vld [vmem:[#allocation11 + $0x228] sm:$0xff] }
 0x1b5   :  { %759 = vmatpush1.bf16.msra.mxu0 %v7344_v7  ;;  %v6499_v7 = vcombine.low %v917_v1, %v921_v2 }
 0x1b6   :  { %760 = vmatprep.subr.bf16.mxu0 %v7349_v8 }
 0x1b7   :  { %2406 = vmatpush1.bf16.msra.mxu1 %v6499_v7  ;;  %v942_v7 = vld [vmem:[#allocation11 + $0x488] sm:$0xff] }
 0x1b9   :  { %761 = vmatpush1.bf16.msra.mxu0 %v7347_v9  ;;  %v8455_v9 = vld [vmem:[#allocation11 + $0x400] sm:$0xff] }
 0x1ba   :  { %762 = vmatprep.subr.bf16.mxu0 %v7352_v10  ;;  %v8457_v10 = vld [vmem:[#allocation11 + $0x420] sm:$0xff] }
 0x1bd   :  { %763 = vmatpush1.bf16.msra.mxu0 %v7350_v11  ;;  %v8459_v11 = vld [vmem:[#allocation11 + $0x408] sm:$0xff] }
 0x1be   :  { %764 = vmatprep.subr.bf16.mxu0 %v7355_v12  ;;  %v6446_v12 = vcombine.high %v862_v5, %v866_v6 }
 0x1c1   :  { %765 = vmatpush1.bf16.msra.mxu0 %v7353_v13  ;;  %v6508_v13 = vcombine.high %v8455_v9, %v8457_v10 }
 0x1c2   :  { %766 = vmatprep.subr.bf16.mxu0 %v7358_v14  ;;  %v8463_v14 = vld [vmem:[#allocation11 + $0x428] sm:$0xff] }
 0x1c3   :  { %2416 = vmatprep.subr.bf16.mxu1 %v6508_v13 }
 0x1c5   :  { %767 = vmatpush1.bf16.msra.mxu0 %v7356_v15  ;;  %v870_v15 = vld [vmem:[#allocation11 + $0x248] sm:$0xff] }
 0x1c6   :  { %768 = vmatprep.subr.bf16.mxu0 %v7361_v16  ;;  %v874_v16 = vld [vmem:[#allocation11 + $0x268] sm:$0xff] }
 0x1c9   :  { %769 = vmatpush1.bf16.msra.mxu0 %v7359_v17  ;;  %v6507_v17 = vcombine.low %v8455_v9, %v8457_v10 }
 0x1ca   :  { %770 = vmatprep.subr.bf16.mxu0 %v7364_v18  ;;  %v6509_v18 = vcombine.low %v8459_v11, %v8463_v14 }
 0x1cd   :  { %771 = vmatpush1.bf16.msra.mxu0 %v7362_v19  ;;  %v6445_v19 = vcombine.low %v862_v5, %v866_v6  ;;  %v941_v5 = vld [vmem:[#allocation11 + $0x480] sm:$0xff] }
 0x1ce   :  { %772 = vmatprep.subr.bf16.mxu0 %v7367_v20  ;;  %v6454_v20 = vcombine.high %v870_v15, %v874_v16  ;;  %v945_v6 = vld [vmem:[#allocation11 + $0x4a0] sm:$0xff] }
 0x1d1   :  { %773 = vmatpush1.bf16.msra.mxu0 %v7365_v21  ;;  %v878_v21 = vld [vmem:[#allocation11 + $0x288] sm:$0xff] }
 0x1d2   :  { %774 = vmatprep.subr.bf16.mxu0 %v7370_v22  ;;  %v882_v22 = vld [vmem:[#allocation11 + $0x2a8] sm:$0xff] }
 0x1d3   :  { %v6461_v27 = vcombine.low %v878_v21, %v882_v22 }
 0x1d5   :  { %775 = vmatpush1.bf16.msra.mxu0 %v7368_v23  ;;  %v6453_v23 = vcombine.low %v870_v15, %v874_v16  ;;  %v6524_v15 = vcombine.high %v941_v5, %v945_v6 }
 0x1d6   :  { %776 = vmatprep.subr.bf16.mxu0 %v7373_v24  ;;  %v6462_v24 = vcombine.high %v878_v21, %v882_v22  ;;  %v950_v21 = vld [vmem:[#allocation11 + $0x4c8] sm:$0xff] }
 0x1d7   :  { %v954_v22 = vld [vmem:[#allocation11 + $0x4e8] sm:$0xff] }
 0x1d8   :  { %v6534_v10 = vcombine.high %v950_v21, %v954_v22 }
 0x1d9   :  { %777 = vmatpush1.bf16.msra.mxu0 %v7371_v25  ;;  %v886_v25 = vld [vmem:[#allocation11 + $0x2c8] sm:$0xff] }
 0x1da   :  { %778 = vmatprep.subr.bf16.mxu0 %v7376_v26  ;;  %v890_v26 = vld [vmem:[#allocation11 + $0x2e8] sm:$0xff] }
 0x1db   :  { %v6470_v28 = vcombine.high %v886_v25, %v890_v26  ;;  %v6469_v31 = vcombine.low %v886_v25, %v890_v26  ;;  %v6533_v26 = vcombine.low %v950_v21, %v954_v22 }
 0x1dd   :  { %779 = vmatpush1.bf16.msra.mxu0 %v7374_v29  ;;  %v894_v29 = vld [vmem:[#allocation11 + $0x308] sm:$0xff] }
 0x1de   :  { %2457 = vmatprep.subr.bf16.mxu0 %v6382_v30  ;;  %v898_v30 = vld [vmem:[#allocation11 + $0x328] sm:$0xff] }
 0x1df   :  { %v6478_v32 = vcombine.high %v894_v29, %v898_v30  ;;  %v6477_v35 = vcombine.low %v894_v29, %v898_v30  ;;  %v965_v29 = vld [vmem:[#allocation11 + $0x540] sm:$0xff] }
 0x1e0   :  { %781 = vmatmul.mubr.bf16.vlgmr.msra.gmra.mrb[8].mxu0 %v8451_v61  ;;  %v854_v61 = vld [vmem:[#allocation11 + $0x1c8] sm:$0xff]  ;;  %v969_v30 = vld [vmem:[#allocation11 + $0x560] sm:$0xff] }
 0x1e1   :  { %2458 = vmatpush1.bf16.msra.mxu0 %v6381_v33  ;;  %v6438_v3 = vcombine.high %v854_v61, %v858_v62  ;;  %v6437_v8 = vcombine.low %v854_v61, %v858_v62  ;;  %v902_v33 = vld [vmem:[#allocation11 + $0x348] sm:$0xff]  ;;  %v937_v62 = vld [vmem:[#allocation11 + $0x460] sm:$0xff] }
 0x1e2   :  { %2459 = vmatprep.subr.bf16.mxu0 %v6390_v34  ;;  %v906_v34 = vld [vmem:[#allocation11 + $0x368] sm:$0xff] }
 0x1e3   :  { %v6486_v37 = vcombine.high %v902_v33, %v906_v34  ;;  %v6485_v40 = vcombine.low %v902_v33, %v906_v34 }
 0x1e5   :  { %2460 = vmatpush1.bf16.msra.mxu0 %v6389_v38  ;;  %v910_v38 = vld [vmem:[#allocation11 + $0x388] sm:$0xff] }
 0x1e6   :  { %2461 = vmatprep.subr.bf16.mxu0 %v6398_v39  ;;  %v914_v39 = vld [vmem:[#allocation11 + $0x3a8] sm:$0xff] }
 0x1e7   :  { %v6494_v42 = vcombine.high %v910_v38, %v914_v39  ;;  %v6493_v46 = vcombine.low %v910_v38, %v914_v39  ;;  %v973_v38 = vld [vmem:[#allocation11 + $0x580] sm:$0xff] }
 0x1e8   :  { %v977_v39 = vld [vmem:[#allocation11 + $0x5a0] sm:$0xff] }
 0x1e9   :  { %2462 = vmatpush1.bf16.msra.mxu0 %v6397_v43  ;;  %v918_v43 = vld [vmem:[#allocation11 + $0x3c8] sm:$0xff] }
 0x1ea   :  { %2463 = vmatprep.subr.bf16.mxu0 %v6406_v45  ;;  %v922_v45 = vld [vmem:[#allocation11 + $0x3e8] sm:$0xff] }
 0x1eb   :  { %v6502_v47 = vcombine.high %v918_v43, %v922_v45 }
 0x1ed   :  { %2464 = vmatpush1.bf16.msra.mxu0 %v6405_v48  ;;  %v6501_v48 = vcombine.low %v918_v43, %v922_v45  ;;  %v6547_v43 = vcombine.low %v965_v29, %v969_v30 }
 0x1ee   :  { %2465 = vmatprep.subr.bf16.mxu0 %v6414_v49  ;;  %v6510_v49 = vcombine.high %v8459_v11, %v8463_v14  ;;  %v957_v11 = vld [vmem:[#allocation11 + $0x500] sm:$0xff] }
 0x1ef   :  { %v961_v14 = vld [vmem:[#allocation11 + $0x520] sm:$0xff] }
 0x1f0   :  { %v6539_v33 = vcombine.low %v957_v11, %v961_v14 }
 0x1f1   :  { %2466 = vmatpush1.bf16.msra.mxu0 %v6413_v52  ;;  %v374_v52 = vrot.slane %v8471_v50, %v8447_v44 }
 0x1f2   :  { %2467 = vmatprep.subr.bf16.mxu0 %v6422_v53 }
 0x1f5   :  { %2468 = vmatpush1.bf16.msra.mxu0 %v6421_v56 }
 0x1f6   :  { %2469 = vmatprep.subr.bf16.mxu0 %v6430_v59 }
 0x1f9   :  { %2470 = vmatpush1.bf16.msra.mxu0 %v6429_v0  ;;  %v938_v0 = vld [vmem:[#allocation11 + $0x468] sm:$0xff] }
 0x1fa   :  { %2471 = vmatprep.subr.bf16.mxu0 %v6438_v3  ;;  %v6516_v3 = vcombine.high %v933_v60, %v937_v62  ;;  %v6518_v4 = vcombine.high %v934_v63, %v938_v0  ;;  %v6517_v13 = vcombine.low %v934_v63, %v938_v0 }
 0x1fd   :  { %2472 = vmatpush1.bf16.msra.mxu0 %v6437_v8  ;;  %v946_v8 = vld [vmem:[#allocation11 + $0x4a8] sm:$0xff] }
 0x1fe   :  { %2473 = vmatprep.subr.bf16.mxu0 %v6446_v12  ;;  %v6515_v12 = vcombine.low %v933_v60, %v937_v62  ;;  %v6526_v16 = vcombine.high %v942_v7, %v946_v8  ;;  %v994_v60 = vld [vmem:[#allocation11 + $0x628] sm:$0xff] }
 0x201   :  { %2474 = vmatpush1.bf16.msra.mxu0 %v6445_v19  ;;  %v949_v19 = vld [vmem:[#allocation11 + $0x4c0] sm:$0xff] }
 0x202   :  { %2475 = vmatprep.subr.bf16.mxu0 %v6454_v20  ;;  %v953_v20 = vld [vmem:[#allocation11 + $0x4e0] sm:$0xff] }
 0x203   :  { %v6532_v9 = vcombine.high %v949_v19, %v953_v20  ;;  %v6531_v25 = vcombine.low %v949_v19, %v953_v20  ;;  %v1006_v19 = vld [vmem:[#allocation11 + $0x688] sm:$0xff] }
 0x204   :  { %v1010_v20 = vld [vmem:[#allocation11 + $0x6a8] sm:$0xff] }
 0x205   :  { %2476 = vmatpush1.bf16.msra.mxu0 %v6453_v23  ;;  %v6523_v23 = vcombine.low %v941_v5, %v945_v6  ;;  %v998_v5 = vld [vmem:[#allocation11 + $0x648] sm:$0xff] }
 0x206   :  { %2477 = vmatprep.subr.bf16.mxu0 %v6462_v24  ;;  %v6525_v24 = vcombine.low %v942_v7, %v946_v8  ;;  %v1002_v6 = vld [vmem:[#allocation11 + $0x668] sm:$0xff] }
 0x207   :  { %v6581_v22 = vcombine.low %v998_v5, %v1002_v6 }
 0x209   :  { %2478 = vmatpush1.bf16.msra.mxu0 %v6461_v27  ;;  %v6540_v27 = vcombine.high %v957_v11, %v961_v14  ;;  %v1014_v11 = vld [vmem:[#allocation11 + $0x6c8] sm:$0xff] }
 0x20a   :  { %2479 = vmatprep.subr.bf16.mxu0 %v6470_v28  ;;  %v1018_v14 = vld [vmem:[#allocation11 + $0x6e8] sm:$0xff] }
 0x20d   :  { %2480 = vmatpush1.bf16.msra.mxu0 %v6469_v31  ;;  %v966_v31 = vld [vmem:[#allocation11 + $0x548] sm:$0xff] }
 0x20e   :  { %2481 = vmatprep.subr.bf16.mxu0 %v6478_v32  ;;  %v970_v32 = vld [vmem:[#allocation11 + $0x568] sm:$0xff] }
 0x20f   :  { %v6549_v45 = vcombine.low %v966_v31, %v970_v32 }
 0x211   :  { %2482 = vmatpush1.bf16.msra.mxu0 %v6477_v35  ;;  %v6548_v35 = vcombine.high %v965_v29, %v969_v30  ;;  %v1022_v29 = vld [vmem:[#allocation11 + $0x708] sm:$0xff] }
 0x212   :  { %2483 = vmatprep.subr.bf16.mxu0 %v6486_v37  ;;  %v6550_v37 = vcombine.high %v966_v31, %v970_v32  ;;  %v1026_v30 = vld [vmem:[#allocation11 + $0x728] sm:$0xff]  ;;  %v6597_v32 = vcombine.low %v1014_v11, %v1018_v14 }
 0x215   :  { %2484 = vmatpush1.bf16.msra.mxu0 %v6485_v40  ;;  %v974_v40 = vld [vmem:[#allocation11 + $0x588] sm:$0xff] }
 0x216   :  { %2485 = vmatprep.subr.bf16.mxu0 %v6494_v42  ;;  %v978_v42 = vld [vmem:[#allocation11 + $0x5a8] sm:$0xff] }
 0x219   :  { %2486 = vmatpush1.bf16.msra.mxu0 %v6493_v46  ;;  %v6556_v46 = vcombine.high %v973_v38, %v977_v39 }
 0x21a   :  { %2487 = vmatprep.subr.bf16.mxu0 %v6502_v47  ;;  %v6558_v47 = vcombine.high %v974_v40, %v978_v42 }
 0x21d   :  { %2488 = vmatpush1.bf16.msra.mxu0 %v6501_v48  ;;  %v981_v48 = vld [vmem:[#allocation11 + $0x5c0] sm:$0xff] }
 0x21e   :  { %2498 = vmatprep.subr.bf16.mxu0 %v6510_v49  ;;  %v985_v49 = vld [vmem:[#allocation11 + $0x5e0] sm:$0xff] }
 0x273   :  { %v741_v53 = vpop.f32.mrb[4].mxu0 }
 0x274   :  { %v742_v54 = vadd.f32 %v741_v53, %v370_v51  ;;  %v743_v55 = vpop.f32.mrb[5].mxu0  ;;  %v982_v51 = vld [vmem:[#allocation11 + $0x5c8] sm:$0xff]  ;;  %v6555_v53 = vcombine.low %v973_v38, %v977_v39 }
 0x275   :  { %v744_v56 = vadd.f32 %v743_v55, %v374_v52  ;;  %v745_v57 = vpop.f32.mrb[6].mxu0  ;;  %v986_v52 = vld [vmem:[#allocation11 + $0x5e8] sm:$0xff]  ;;  %v6564_v55 = vcombine.high %v981_v48, %v985_v49 }
 0x276   :  { %v789_v58 = vmax.f32 %v742_v54, 0.0  ;;  %v746_v59 = vpop.f32.mrb[7].mxu0  ;;  %v6557_v54 = vcombine.low %v974_v40, %v978_v42  ;;  %v989_v57 = vld [vmem:[#allocation11 + $0x600] sm:$0xff]  ;;  %v6565_v62 = vcombine.low %v982_v51, %v986_v52  ;;  %v1030_v38 = vld [vmem:[#allocation11 + $0x748] sm:$0xff]  ;;  %v6605_v42 = vcombine.low %v1022_v29, %v1026_v30 }
 0x277   :  { %v790_v61 = vmax.f32 %v744_v56, 0.0  ;;  %v6566_v56 = vcombine.high %v982_v51, %v986_v52  ;;  %v990_v59 = vld [vmem:[#allocation11 + $0x608] sm:$0xff]  ;;  %v8492_v51 = vsub.s32 2, %v8441_v36 }
 0x278   :  { %v8479_v2 = vpack.c.bf16 %v789_v58, %v789_v58  ;;  %v993_v58 = vld [vmem:[#allocation11 + $0x620] sm:$0xff]  ;;  %v6574_v0 = vcombine.high %v990_v59, %v994_v60  ;;  %v6573_v8 = vcombine.low %v990_v59, %v994_v60  ;;  %v1034_v39 = vld [vmem:[#allocation11 + $0x768] sm:$0xff] }
 0x279   :  { %v8477_v1 = vpack.c.bf16 %v790_v61, %v790_v61  ;;  %v6563_v61 = vcombine.low %v981_v48, %v985_v49  ;;  %v6572_v63 = vcombine.high %v989_v57, %v993_v58  ;;  %v6571_v7 = vcombine.low %v989_v57, %v993_v58  ;;  %v1038_v48 = vld [vmem:[#allocation11 + $0x788] sm:$0xff]  ;;  %v1045_v57 = vld [vmem:[#allocation11 + $0x7c0] sm:$0xff] }
 0x27a   :  { %v1042_v49 = vld [vmem:[#allocation11 + $0x7a8] sm:$0xff]  ;;  %v1049_v58 = vld [vmem:[#allocation11 + $0x7e0] sm:$0xff] }
 0x27b   :  { %2407 = vmatprep.mubr.bf16.mxu1 %v8477_v1  ;;  %2489 = vmatprep.mubr.bf16.mxu0 %v8477_v1  ;;  %v1046_v59 = vld [vmem:[#allocation11 + $0x7c8] sm:$0xff] }
 0x27c   :  { %2408 = vmatmul.mubr.bf16.vlgmr.msra.gmra.mrb[0].mxu1 %v8479_v2  ;;  %2490 = vmatmul.mubr.bf16.vlgmr.msra.gmra.mrb[12].mxu0 %v8479_v2  ;;  %v1050_v60 = vld [vmem:[#allocation11 + $0x7e8] sm:$0xff] }
 0x27d   :  { %2417 = vmatpush1.bf16.msra.mxu1 %v6507_v17  ;;  %2499 = vmatpush1.bf16.msra.mxu0 %v6509_v18  ;;  %v958_v17 = vld [vmem:[#allocation11 + $0x508] sm:$0xff] }
 0x27e   :  { %2418 = vmatprep.subr.bf16.mxu1 %v6516_v3  ;;  %2500 = vmatprep.subr.bf16.mxu0 %v6518_v4  ;;  %v962_v18 = vld [vmem:[#allocation11 + $0x528] sm:$0xff]  ;;  %v997_v3 = vld [vmem:[#allocation11 + $0x640] sm:$0xff] }
 0x27f   :  { %v6542_v28 = vcombine.high %v958_v17, %v962_v18  ;;  %v6541_v34 = vcombine.low %v958_v17, %v962_v18  ;;  %v1001_v4 = vld [vmem:[#allocation11 + $0x660] sm:$0xff]  ;;  %v6589_v18 = vcombine.low %v1006_v19, %v1010_v20 }
 0x280   :  { %v6579_v21 = vcombine.low %v997_v3, %v1001_v4 }
 0x281   :  { %2419 = vmatpush1.bf16.msra.mxu1 %v6515_v12  ;;  %2501 = vmatpush1.bf16.msra.mxu0 %v6517_v13  ;;  %v6580_v12 = vcombine.high %v997_v3, %v1001_v4  ;;  %v6582_v13 = vcombine.high %v998_v5, %v1002_v6  ;;  %v6628_v3 = vcombine.high %v1045_v57, %v1049_v58  ;;  %v799_v5 = vld [vmem:[#allocation11 + $0x10] sm:$0xff] }
 0x282   :  { %2420 = vmatprep.subr.bf16.mxu1 %v6524_v15  ;;  %2502 = vmatprep.subr.bf16.mxu0 %v6526_v16  ;;  %v1005_v15 = vld [vmem:[#allocation11 + $0x680] sm:$0xff]  ;;  %v6630_v4 = vcombine.high %v1046_v59, %v1050_v60 }
 0x283   :  { %v1009_v16 = vld [vmem:[#allocation11 + $0x6a0] sm:$0xff] }
 0x284   :  { %v6587_v17 = vcombine.low %v1005_v15, %v1009_v16 }
 0x285   :  { %2421 = vmatpush1.bf16.msra.mxu1 %v6523_v23  ;;  %2503 = vmatpush1.bf16.msra.mxu0 %v6525_v24  ;;  %v6588_v23 = vcombine.high %v1005_v15, %v1009_v16  ;;  %v6590_v24 = vcombine.high %v1006_v19, %v1010_v20  ;;  %v6627_v20 = vcombine.low %v1045_v57, %v1049_v58 }
 0x286   :  { %2422 = vmatprep.subr.bf16.mxu1 %v6532_v9  ;;  %2504 = vmatprep.subr.bf16.mxu0 %v6534_v10  ;;  %v1013_v9 = vld [vmem:[#allocation11 + $0x6c0] sm:$0xff] }
 0x287   :  { %v1017_v10 = vld [vmem:[#allocation11 + $0x6e0] sm:$0xff] }
 0x288   :  { %v6595_v31 = vcombine.low %v1013_v9, %v1017_v10 }
 0x289   :  { %2423 = vmatpush1.bf16.msra.mxu1 %v6531_v25  ;;  %2505 = vmatpush1.bf16.msra.mxu0 %v6533_v26  ;;  %v6596_v25 = vcombine.high %v1013_v9, %v1017_v10  ;;  %v6598_v26 = vcombine.high %v1014_v11, %v1018_v14  ;;  %v807_v10 = vld [vmem:[#allocation11 + $0x50] sm:$0xff]  ;;  %v808_v14 = vld [vmem:[#allocation11 + $0x58] sm:$0xff] }
 0x28a   :  { %2424 = vmatprep.subr.bf16.mxu1 %v6540_v27  ;;  %2506 = vmatprep.subr.bf16.mxu0 %v6542_v28  ;;  %v1021_v27 = vld [vmem:[#allocation11 + $0x700] sm:$0xff]  ;;  %v811_v11 = vld [vmem:[#allocation11 + $0x70] sm:$0xff] }
 0x28b   :  { %v1025_v28 = vld [vmem:[#allocation11 + $0x720] sm:$0xff] }
 0x28c   :  { %v6603_v40 = vcombine.low %v1021_v27, %v1025_v28 }
 0x28d   :  { %2425 = vmatpush1.bf16.msra.mxu1 %v6539_v33  ;;  %2507 = vmatpush1.bf16.msra.mxu0 %v6541_v34  ;;  %v6604_v33 = vcombine.high %v1021_v27, %v1025_v28  ;;  %v6606_v34 = vcombine.high %v1022_v29, %v1026_v30  ;;  %v6392_v28 = vcombine.high %v807_v10, %v811_v11  ;;  %v815_v30 = vld [vmem:[#allocation11 + $0x90] sm:$0xff] }
 0x28e   :  { %2426 = vmatprep.subr.bf16.mxu1 %v6548_v35  ;;  %2508 = vmatprep.subr.bf16.mxu0 %v6550_v37  ;;  %v1029_v35 = vld [vmem:[#allocation11 + $0x740] sm:$0xff] }
 0x28f   :  { %v1033_v37 = vld [vmem:[#allocation11 + $0x760] sm:$0xff] }
 0x290   :  { %v6611_v52 = vcombine.low %v1029_v35, %v1033_v37 }
 0x291   :  { %2427 = vmatpush1.bf16.msra.mxu1 %v6547_v43  ;;  %2509 = vmatpush1.bf16.msra.mxu0 %v6549_v45  ;;  %v6612_v43 = vcombine.high %v1029_v35, %v1033_v37  ;;  %v6614_v45 = vcombine.high %v1030_v38, %v1034_v39 }
 0x292   :  { %2428 = vmatprep.subr.bf16.mxu1 %v6556_v46  ;;  %2510 = vmatprep.subr.bf16.mxu0 %v6558_v47  ;;  %v1037_v46 = vld [vmem:[#allocation11 + $0x780] sm:$0xff] }
 0x293   :  { %v1041_v47 = vld [vmem:[#allocation11 + $0x7a0] sm:$0xff] }
 0x295   :  { %2429 = vmatpush1.bf16.msra.mxu1 %v6555_v53  ;;  %2511 = vmatpush1.bf16.msra.mxu0 %v6557_v54  ;;  %v6613_v53 = vcombine.low %v1030_v38, %v1034_v39  ;;  %v8495_v54 = vsub.s32 3, %v8441_v36  ;;  %v823_v39 = vld [vmem:[#allocation11 + $0xd0] sm:$0xff] }
 0x296   :  { %2430 = vmatprep.subr.bf16.mxu1 %v6564_v55  ;;  %2512 = vmatprep.subr.bf16.mxu0 %v6566_v56  ;;  %v6620_v55 = vcombine.high %v1037_v46, %v1041_v47  ;;  %v6622_v56 = vcombine.high %v1038_v48, %v1042_v49 }
 0x299   :  { %2431 = vmatpush1.bf16.msra.mxu1 %v6563_v61  ;;  %2513 = vmatpush1.bf16.msra.mxu0 %v6565_v62  ;;  %v378_v61 = vrot.slane %v8471_v50, %v8492_v51  ;;  %v382_v62 = vrot.slane %v8471_v50, %v8495_v54 }
 0x29a   :  { %2432 = vmatprep.subr.bf16.mxu1 %v6572_v63  ;;  %2514 = vmatprep.subr.bf16.mxu0 %v6574_v0  ;;  %v6619_v63 = vcombine.low %v1037_v46, %v1041_v47  ;;  %v6621_v0 = vcombine.low %v1038_v48, %v1042_v49  ;;  %v831_v49 = vld [vmem:[#allocation11 + $0x110] sm:$0xff] }
 0x29d   :  { %2433 = vmatpush1.bf16.msra.mxu1 %v6571_v7  ;;  %2515 = vmatpush1.bf16.msra.mxu0 %v6573_v8  ;;  %v803_v7 = vld [vmem:[#allocation11 + $0x30] sm:$0xff]  ;;  %v800_v8 = vld [vmem:[#allocation11 + $0x18] sm:$0xff] }
 0x29e   :  { %2434 = vmatprep.subr.bf16.mxu1 %v6580_v12  ;;  %2516 = vmatprep.subr.bf16.mxu0 %v6582_v13  ;;  %v804_v12 = vld [vmem:[#allocation11 + $0x38] sm:$0xff] }
 0x29f   :  { %v6385_v27 = vcombine.low %v800_v8, %v804_v12 }
 0x2a1   :  { %2435 = vmatpush1.bf16.msra.mxu1 %v6579_v21  ;;  %2517 = vmatpush1.bf16.msra.mxu0 %v6581_v22  ;;  %v6629_v21 = vcombine.low %v1046_v59, %v1050_v60  ;;  %v839_v59 = vld [vmem:[#allocation11 + $0x150] sm:$0xff] }
 0x2a2   :  { %2436 = vmatprep.subr.bf16.mxu1 %v6588_v23  ;;  %2518 = vmatprep.subr.bf16.mxu0 %v6590_v24  ;;  %v6384_v23 = vcombine.high %v799_v5, %v803_v7  ;;  %v6386_v24 = vcombine.high %v800_v8, %v804_v12  ;;  %v843_v60 = vld [vmem:[#allocation11 + $0x170] sm:$0xff]  ;;  %v852_v8 = vld [vmem:[#allocation11 + $0x1b8] sm:$0xff] }
 0x2a3   :  { %v6423_v12 = vcombine.low %v839_v59, %v843_v60 }
 0x2a5   :  { %2437 = vmatpush1.bf16.msra.mxu1 %v6587_v17  ;;  %2519 = vmatpush1.bf16.msra.mxu0 %v6589_v18  ;;  %v812_v17 = vld [vmem:[#allocation11 + $0x78] sm:$0xff] }
 0x2a6   :  { %2438 = vmatprep.subr.bf16.mxu1 %v6596_v25  ;;  %2520 = vmatprep.subr.bf16.mxu0 %v6598_v26  ;;  %v6383_v25 = vcombine.low %v799_v5, %v803_v7  ;;  %v6394_v29 = vcombine.high %v808_v14, %v812_v17  ;;  %v6393_v35 = vcombine.low %v808_v14, %v812_v17  ;;  %v847_v5 = vld [vmem:[#allocation11 + $0x190] sm:$0xff]  ;;  %v848_v7 = vld [vmem:[#allocation11 + $0x198] sm:$0xff] }
 0x2a7   :  { %v864_v14 = vld [vmem:[#allocation11 + $0x218] sm:$0xff] }
 0x2a8   :  { %v868_v17 = vld [vmem:[#allocation11 + $0x238] sm:$0xff] }
 0x2a9   :  { %2439 = vmatpush1.bf16.msra.mxu1 %v6595_v31  ;;  %2521 = vmatpush1.bf16.msra.mxu0 %v6597_v32  ;;  %v819_v31 = vld [vmem:[#allocation11 + $0xb0] sm:$0xff]  ;;  %v816_v32 = vld [vmem:[#allocation11 + $0x98] sm:$0xff] }
 0x2aa   :  { %2440 = vmatprep.subr.bf16.mxu1 %v6604_v33  ;;  %2522 = vmatprep.subr.bf16.mxu0 %v6606_v34  ;;  %v820_v33 = vld [vmem:[#allocation11 + $0xb8] sm:$0xff]  ;;  %v6391_v34 = vcombine.low %v807_v10, %v811_v11  ;;  %v6400_v37 = vcombine.high %v815_v30, %v819_v31  ;;  %v863_v10 = vld [vmem:[#allocation11 + $0x210] sm:$0xff] }
 0x2ab   :  { %v6402_v38 = vcombine.high %v816_v32, %v820_v33  ;;  %v6401_v46 = vcombine.low %v816_v32, %v820_v33  ;;  %v867_v11 = vld [vmem:[#allocation11 + $0x230] sm:$0xff]  ;;  %v872_v32 = vld [vmem:[#allocation11 + $0x258] sm:$0xff] }
 0x2ac   :  { %v876_v33 = vld [vmem:[#allocation11 + $0x278] sm:$0xff] }
 0x2ad   :  { %2441 = vmatpush1.bf16.msra.mxu1 %v6603_v40  ;;  %2523 = vmatpush1.bf16.msra.mxu0 %v6605_v42  ;;  %v827_v40 = vld [vmem:[#allocation11 + $0xf0] sm:$0xff]  ;;  %v824_v42 = vld [vmem:[#allocation11 + $0xd8] sm:$0xff] }
 0x2ae   :  { %2442 = vmatprep.subr.bf16.mxu1 %v6612_v43  ;;  %2524 = vmatprep.subr.bf16.mxu0 %v6614_v45  ;;  %v828_v43 = vld [vmem:[#allocation11 + $0xf8] sm:$0xff]  ;;  %v6399_v45 = vcombine.low %v815_v30, %v819_v31  ;;  %v6408_v47 = vcombine.high %v823_v39, %v827_v40  ;;  %v871_v30 = vld [vmem:[#allocation11 + $0x250] sm:$0xff] }
 0x2af   :  { %v6410_v48 = vcombine.high %v824_v42, %v828_v43  ;;  %v875_v31 = vld [vmem:[#allocation11 + $0x270] sm:$0xff] }
 0x2b1   :  { %2443 = vmatpush1.bf16.msra.mxu1 %v6611_v52  ;;  %2525 = vmatpush1.bf16.msra.mxu0 %v6613_v53  ;;  %v835_v52 = vld [vmem:[#allocation11 + $0x130] sm:$0xff]  ;;  %v836_v53 = vld [vmem:[#allocation11 + $0x138] sm:$0xff] }
 0x2b2   :  { %2444 = vmatprep.subr.bf16.mxu1 %v6620_v55  ;;  %2526 = vmatprep.subr.bf16.mxu0 %v6622_v56  ;;  %v6407_v55 = vcombine.low %v823_v39, %v827_v40  ;;  %v6409_v56 = vcombine.low %v824_v42, %v828_v43  ;;  %v6416_v57 = vcombine.high %v831_v49, %v835_v52  ;;  %v879_v39 = vld [vmem:[#allocation11 + $0x290] sm:$0xff]  ;;  %v880_v42 = vld [vmem:[#allocation11 + $0x298] sm:$0xff] }
 0x2b3   :  { %v782_v6 = vpop.f32.mrb[8].mxu0  ;;  %v883_v40 = vld [vmem:[#allocation11 + $0x2b0] sm:$0xff]  ;;  %v884_v43 = vld [vmem:[#allocation11 + $0x2b8] sm:$0xff] }
 0x2b4   :  { %v783_v13 = vadd.f32 %v782_v6, %v378_v61  ;;  %v784_v15 = vpop.f32.mrb[9].mxu0  ;;  %v840_v61 = vld [vmem:[#allocation11 + $0x158] sm:$0xff]  ;;  %v851_v6 = vld [vmem:[#allocation11 + $0x1b0] sm:$0xff] }
 0x2b5   :  { %v785_v16 = vadd.f32 %v784_v15, %v382_v62  ;;  %v786_v19 = vpop.f32.mrb[10].mxu0  ;;  %2445 = vmatpush1.bf16.msra.mxu1 %v6619_v63  ;;  %2527 = vmatpush1.bf16.msra.mxu0 %v6621_v0  ;;  %v844_v62 = vld [vmem:[#allocation11 + $0x178] sm:$0xff]  ;;  %v6415_v63 = vcombine.low %v831_v49, %v835_v52  ;;  %v6432_v15 = vcombine.high %v847_v5, %v851_v6  ;;  %v887_v49 = vld [vmem:[#allocation11 + $0x2d0] sm:$0xff] }
 0x2b6   :  { %v791_v50 = vmax.f32 %v783_v13, 0.0  ;;  %v787_v22 = vpop.f32.mrb[11].mxu0  ;;  %2446 = vmatprep.subr.bf16.mxu1 %v6628_v3  ;;  %2528 = vmatprep.subr.bf16.mxu0 %v6630_v4  ;;  %v6424_v3 = vcombine.high %v839_v59, %v843_v60  ;;  %v6426_v4 = vcombine.high %v840_v61, %v844_v62  ;;  %v6425_v13 = vcombine.low %v840_v61, %v844_v62  ;;  %v855_v19 = vld [vmem:[#allocation11 + $0x1d0] sm:$0xff]  ;;  %v896_v61 = vld [vmem:[#allocation11 + $0x318] sm:$0xff] }
 0x2b7   :  { %v792_v9 = vmax.f32 %v785_v16, 0.0  ;;  %v6434_v16 = vcombine.high %v848_v7, %v852_v8  ;;  %v6431_v22 = vcombine.low %v847_v5, %v851_v6  ;;  %v891_v52 = vld [vmem:[#allocation11 + $0x2f0] sm:$0xff]  ;;  %v900_v62 = vld [vmem:[#allocation11 + $0x338] sm:$0xff] }
 0x2b8   :  { %v8503_v26 = vpack.c.bf16 %v791_v50, %v791_v50  ;;  %v860_v50 = vld [vmem:[#allocation11 + $0x1f8] sm:$0xff]  ;;  %v895_v59 = vld [vmem:[#allocation11 + $0x310] sm:$0xff] }
 0x2b9   :  { %v8501_v18 = vpack.c.bf16 %v792_v9, %v792_v9  ;;  %2447 = vmatpush1.bf16.msra.mxu1 %v6627_v20  ;;  %2529 = vmatpush1.bf16.msra.mxu0 %v6629_v21  ;;  %v859_v20 = vld [vmem:[#allocation11 + $0x1f0] sm:$0xff]  ;;  %v856_v21 = vld [vmem:[#allocation11 + $0x1d8] sm:$0xff] }
 0x2ba   :  { %2539 = vmatprep.subr.bf16.mxu1 %v6384_v23  ;;  %2621 = vmatprep.subr.bf16.mxu0 %v6386_v24  ;;  %v6433_v23 = vcombine.low %v848_v7, %v852_v8  ;;  %v6440_v24 = vcombine.high %v855_v19, %v859_v20  ;;  %v6442_v9 = vcombine.high %v856_v21, %v860_v50  ;;  %v899_v60 = vld [vmem:[#allocation11 + $0x330] sm:$0xff]  ;;  %v904_v7 = vld [vmem:[#allocation11 + $0x358] sm:$0xff] }
 0x2bb   :  { %2448 = vmatprep.mubr.bf16.mxu1 %v8501_v18  ;;  %2530 = vmatprep.mubr.bf16.mxu0 %v8501_v18  ;;  %v903_v5 = vld [vmem:[#allocation11 + $0x350] sm:$0xff]  ;;  %v908_v8 = vld [vmem:[#allocation11 + $0x378] sm:$0xff] }
 0x2bc   :  { %2449 = vmatmul.mubr.bf16.vlgmr.msra.gmra.mrb[0].mxu1 %v8503_v26  ;;  %2531 = vmatmul.mubr.bf16.vlgmr.msra.gmra.mrb[12].mxu0 %v8503_v26  ;;  %v907_v6 = vld [vmem:[#allocation11 + $0x370] sm:$0xff] }
 0x2bd   :  { %2540 = vmatpush1.bf16.msra.mxu1 %v6383_v25  ;;  %2571 = vmatprep.mubr.bf16.mxu1 %v8477_v1  ;;  %v6439_v25 = vcombine.low %v855_v19, %v859_v20  ;;  %v911_v19 = vld [vmem:[#allocation11 + $0x390] sm:$0xff] }
 0x2be   :  { %2622 = vmatpush1.bf16.msra.mxu0 %v6385_v27  ;;  %2653 = vmatprep.mubr.bf16.mxu0 %v8477_v1  ;;  %v832_v1 = vld [vmem:[#allocation11 + $0x118] sm:$0xff]  ;;  %v6441_v27 = vcombine.low %v856_v21, %v860_v50  ;;  %v915_v20 = vld [vmem:[#allocation11 + $0x3b0] sm:$0xff] }
 0x2bf   :  { %2541 = vmatprep.subr.bf16.mxu1 %v6392_v28  ;;  %2623 = vmatprep.subr.bf16.mxu0 %v6394_v29  ;;  %v6418_v58 = vcombine.high %v832_v1, %v836_v53  ;;  %v6417_v0 = vcombine.low %v832_v1, %v836_v53  ;;  %v6448_v28 = vcombine.high %v863_v10, %v867_v11  ;;  %v888_v1 = vld [vmem:[#allocation11 + $0x2d8] sm:$0xff] }
 0x2c0   :  { %v6450_v29 = vcombine.high %v864_v14, %v868_v17  ;;  %v892_v53 = vld [vmem:[#allocation11 + $0x2f8] sm:$0xff] }
 0x2c1   :  { %2542 = vmatpush1.bf16.msra.mxu1 %v6391_v34  ;;  %v6447_v34 = vcombine.low %v863_v10, %v867_v11  ;;  %v912_v21 = vld [vmem:[#allocation11 + $0x398] sm:$0xff]  ;;  %v919_v10 = vld [vmem:[#allocation11 + $0x3d0] sm:$0xff] }
 0x2c2   :  { %2624 = vmatpush1.bf16.msra.mxu0 %v6393_v35  ;;  %2543 = vmatprep.subr.bf16.mxu1 %v6400_v37  ;;  %v6449_v35 = vcombine.low %v864_v14, %v868_v17  ;;  %v6456_v37 = vcombine.high %v871_v30, %v875_v31  ;;  %v916_v50 = vld [vmem:[#allocation11 + $0x3b8] sm:$0xff]  ;;  %v923_v11 = vld [vmem:[#allocation11 + $0x3f0] sm:$0xff] }
 0x2c3   :  { %2625 = vmatprep.subr.bf16.mxu0 %v6402_v38  ;;  %v6458_v38 = vcombine.high %v872_v32, %v876_v33  ;;  %v920_v14 = vld [vmem:[#allocation11 + $0x3d8] sm:$0xff] }
 0x2c4   :  { %v924_v17 = vld [vmem:[#allocation11 + $0x3f8] sm:$0xff] }
 0x2c5   :  { %2544 = vmatpush1.bf16.msra.mxu1 %v6399_v45  ;;  %v6455_v45 = vcombine.low %v871_v30, %v875_v31  ;;  %v927_v30 = vld [vmem:[#allocation11 + $0x410] sm:$0xff] }
 0x2c6   :  { %2626 = vmatpush1.bf16.msra.mxu0 %v6401_v46  ;;  %2545 = vmatprep.subr.bf16.mxu1 %v6408_v47  ;;  %v6457_v46 = vcombine.low %v872_v32, %v876_v33  ;;  %v6464_v47 = vcombine.high %v879_v39, %v883_v40  ;;  %v931_v31 = vld [vmem:[#allocation11 + $0x430] sm:$0xff]  ;;  %v928_v32 = vld [vmem:[#allocation11 + $0x418] sm:$0xff] }
 0x2c7   :  { %2627 = vmatprep.subr.bf16.mxu0 %v6410_v48  ;;  %v6466_v48 = vcombine.high %v880_v42, %v884_v43  ;;  %v932_v33 = vld [vmem:[#allocation11 + $0x438] sm:$0xff] }
 0x2c9   :  { %2546 = vmatpush1.bf16.msra.mxu1 %v6407_v55  ;;  %v6463_v55 = vcombine.low %v879_v39, %v883_v40  ;;  %v935_v39 = vld [vmem:[#allocation11 + $0x450] sm:$0xff] }
 0x2ca   :  { %2628 = vmatpush1.bf16.msra.mxu0 %v6409_v56  ;;  %2547 = vmatprep.subr.bf16.mxu1 %v6416_v57  ;;  %v6465_v56 = vcombine.low %v880_v42, %v884_v43  ;;  %v6472_v57 = vcombine.high %v887_v49, %v891_v52  ;;  %v939_v40 = vld [vmem:[#allocation11 + $0x470] sm:$0xff]  ;;  %v6511_v42 = vcombine.low %v927_v30, %v931_v31  ;;  %v936_v43 = vld [vmem:[#allocation11 + $0x458] sm:$0xff] }
 0x2cb   :  { %2629 = vmatprep.subr.bf16.mxu0 %v6418_v58  ;;  %v6474_v58 = vcombine.high %v888_v1, %v892_v53 }
 0x2cd   :  { %2548 = vmatpush1.bf16.msra.mxu1 %v6415_v63  ;;  %v6471_v63 = vcombine.low %v887_v49, %v891_v52  ;;  %v947_v49 = vld [vmem:[#allocation11 + $0x4b0] sm:$0xff] }
 0x2ce   :  { %2630 = vmatpush1.bf16.msra.mxu0 %v6417_v0  ;;  %2549 = vmatprep.subr.bf16.mxu1 %v6424_v3  ;;  %v6473_v0 = vcombine.low %v888_v1, %v892_v53  ;;  %v6480_v3 = vcombine.high %v895_v59, %v899_v60  ;;  %v944_v1 = vld [vmem:[#allocation11 + $0x498] sm:$0xff] }
 0x2cf   :  { %2631 = vmatprep.subr.bf16.mxu0 %v6426_v4  ;;  %v6482_v4 = vcombine.high %v896_v61, %v900_v62  ;;  %v948_v53 = vld [vmem:[#allocation11 + $0x4b8] sm:$0xff] }
 0x2d1   :  { %2550 = vmatpush1.bf16.msra.mxu1 %v6423_v12  ;;  %v6479_v12 = vcombine.low %v895_v59, %v899_v60  ;;  %v951_v59 = vld [vmem:[#allocation11 + $0x4d0] sm:$0xff] }
 0x2d2   :  { %2632 = vmatpush1.bf16.msra.mxu0 %v6425_v13  ;;  %2551 = vmatprep.subr.bf16.mxu1 %v6432_v15  ;;  %v6481_v13 = vcombine.low %v896_v61, %v900_v62  ;;  %v6488_v15 = vcombine.high %v903_v5, %v907_v6  ;;  %v955_v60 = vld [vmem:[#allocation11 + $0x4f0] sm:$0xff]  ;;  %v952_v61 = vld [vmem:[#allocation11 + $0x4d8] sm:$0xff] }
 0x2d3   :  { %2633 = vmatprep.subr.bf16.mxu0 %v6434_v16  ;;  %v6490_v16 = vcombine.high %v904_v7, %v908_v8  ;;  %v956_v62 = vld [vmem:[#allocation11 + $0x4f8] sm:$0xff] }
 0x2d5   :  { %2552 = vmatpush1.bf16.msra.mxu1 %v6431_v22  ;;  %v6487_v22 = vcombine.low %v903_v5, %v907_v6  ;;  %v963_v5 = vld [vmem:[#allocation11 + $0x530] sm:$0xff]  ;;  %v960_v6 = vld [vmem:[#allocation11 + $0x518] sm:$0xff] }
 0x2d6   :  { %2634 = vmatpush1.bf16.msra.mxu0 %v6433_v23  ;;  %2553 = vmatprep.subr.bf16.mxu1 %v6440_v24  ;;  %v6489_v23 = vcombine.low %v904_v7, %v908_v8  ;;  %v6496_v24 = vcombine.high %v911_v19, %v915_v20  ;;  %v964_v7 = vld [vmem:[#allocation11 + $0x538] sm:$0xff]  ;;  %v6537_v8 = vcombine.low %v952_v61, %v956_v62 }
 0x2d7   :  { %2635 = vmatprep.subr.bf16.mxu0 %v6442_v9  ;;  %v6498_v9 = vcombine.high %v912_v21, %v916_v50 }
 0x2d9   :  { %2554 = vmatpush1.bf16.msra.mxu1 %v6439_v25  ;;  %v6495_v25 = vcombine.low %v911_v19, %v915_v20  ;;  %v968_v19 = vld [vmem:[#allocation11 + $0x558] sm:$0xff] }
 0x2da   :  { %2636 = vmatpush1.bf16.msra.mxu0 %v6441_v27  ;;  %2555 = vmatprep.subr.bf16.mxu1 %v6448_v28  ;;  %v6497_v27 = vcombine.low %v912_v21, %v916_v50  ;;  %v6504_v28 = vcombine.high %v919_v10, %v923_v11  ;;  %v972_v20 = vld [vmem:[#allocation11 + $0x578] sm:$0xff]  ;;  %v6545_v50 = vcombine.low %v960_v6, %v964_v7 }
 0x2db   :  { %2637 = vmatprep.subr.bf16.mxu0 %v6450_v29  ;;  %v6506_v29 = vcombine.high %v920_v14, %v924_v17 }
 0x2dd   :  { %2556 = vmatpush1.bf16.msra.mxu1 %v6447_v34  ;;  %v6503_v34 = vcombine.low %v919_v10, %v923_v11  ;;  %v976_v10 = vld [vmem:[#allocation11 + $0x598] sm:$0xff] }
 0x2de   :  { %2638 = vmatpush1.bf16.msra.mxu0 %v6449_v35  ;;  %2557 = vmatprep.subr.bf16.mxu1 %v6456_v37  ;;  %v6505_v35 = vcombine.low %v920_v14, %v924_v17  ;;  %v6512_v37 = vcombine.high %v927_v30, %v931_v31  ;;  %v980_v11 = vld [vmem:[#allocation11 + $0x5b8] sm:$0xff]  ;;  %v6553_v17 = vcombine.low %v968_v19, %v972_v20 }
 0x2df   :  { %2639 = vmatprep.subr.bf16.mxu0 %v6458_v38  ;;  %v6514_v38 = vcombine.high %v928_v32, %v932_v33  ;;  %v984_v30 = vld [vmem:[#allocation11 + $0x5d8] sm:$0xff] }
 0x2e0   :  { %v988_v31 = vld [vmem:[#allocation11 + $0x5f8] sm:$0xff] }
 0x2e1   :  { %2558 = vmatpush1.bf16.msra.mxu1 %v6455_v45  ;;  %v940_v45 = vld [vmem:[#allocation11 + $0x478] sm:$0xff] }
 0x2e2   :  { %2640 = vmatpush1.bf16.msra.mxu0 %v6457_v46  ;;  %2559 = vmatprep.subr.bf16.mxu1 %v6464_v47  ;;  %v6513_v46 = vcombine.low %v928_v32, %v932_v33  ;;  %v6520_v47 = vcombine.high %v935_v39, %v939_v40  ;;  %v6522_v52 = vcombine.high %v936_v43, %v940_v45 }
 0x2e3   :  { %2641 = vmatprep.subr.bf16.mxu0 %v6466_v48  ;;  %v943_v48 = vld [vmem:[#allocation11 + $0x490] sm:$0xff]  ;;  %v6561_v33 = vcombine.low %v976_v10, %v980_v11 }
 0x2e5   :  { %2560 = vmatpush1.bf16.msra.mxu1 %v6463_v55  ;;  %v6519_v55 = vcombine.low %v935_v39, %v939_v40  ;;  %v992_v39 = vld [vmem:[#allocation11 + $0x618] sm:$0xff] }
 0x2e6   :  { %2642 = vmatpush1.bf16.msra.mxu0 %v6465_v56  ;;  %2561 = vmatprep.subr.bf16.mxu1 %v6472_v57  ;;  %v6521_v56 = vcombine.low %v936_v43, %v940_v45  ;;  %v6528_v57 = vcombine.high %v943_v48, %v947_v49  ;;  %v996_v40 = vld [vmem:[#allocation11 + $0x638] sm:$0xff]  ;;  %v6569_v43 = vcombine.low %v984_v30, %v988_v31 }
 0x2e7   :  { %2643 = vmatprep.subr.bf16.mxu0 %v6474_v58  ;;  %v6530_v58 = vcombine.high %v944_v1, %v948_v53 }
 0x2e9   :  { %2562 = vmatpush1.bf16.msra.mxu1 %v6471_v63  ;;  %v6527_v63 = vcombine.low %v943_v48, %v947_v49  ;;  %v1003_v48 = vld [vmem:[#allocation11 + $0x670] sm:$0xff]  ;;  %v1000_v49 = vld [vmem:[#allocation11 + $0x658] sm:$0xff] }
 0x2ea   :  { %2644 = vmatpush1.bf16.msra.mxu0 %v6473_v0  ;;  %2563 = vmatprep.subr.bf16.mxu1 %v6480_v3  ;;  %v6536_v0 = vcombine.high %v951_v59, %v955_v60  ;;  %v6538_v3 = vcombine.high %v952_v61, %v956_v62 }
 0x2eb   :  { %2645 = vmatprep.subr.bf16.mxu0 %v6482_v4  ;;  %v959_v4 = vld [vmem:[#allocation11 + $0x510] sm:$0xff] }
 0x2ec   :  { %v6543_v21 = vcombine.low %v959_v4, %v963_v5 }
 0x2ed   :  { %2564 = vmatpush1.bf16.msra.mxu1 %v6479_v12  ;;  %v6544_v12 = vcombine.high %v959_v4, %v963_v5  ;;  %v1016_v4 = vld [vmem:[#allocation11 + $0x6d8] sm:$0xff] }
 0x2ee   :  { %2646 = vmatpush1.bf16.msra.mxu0 %v6481_v13  ;;  %2565 = vmatprep.subr.bf16.mxu1 %v6488_v15  ;;  %v6546_v13 = vcombine.high %v960_v6, %v964_v7  ;;  %v967_v15 = vld [vmem:[#allocation11 + $0x550] sm:$0xff]  ;;  %v1020_v5 = vld [vmem:[#allocation11 + $0x6f8] sm:$0xff] }
 0x2ef   :  { %2647 = vmatprep.subr.bf16.mxu0 %v6490_v16  ;;  %v971_v16 = vld [vmem:[#allocation11 + $0x570] sm:$0xff] }
 0x2f0   :  { %v6551_v14 = vcombine.low %v967_v15, %v971_v16 }
 0x2f1   :  { %2566 = vmatpush1.bf16.msra.mxu1 %v6487_v22  ;;  %v6552_v22 = vcombine.high %v967_v15, %v971_v16  ;;  %v1024_v15 = vld [vmem:[#allocation11 + $0x718] sm:$0xff] }
 0x2f2   :  { %2648 = vmatpush1.bf16.msra.mxu0 %v6489_v23  ;;  %2567 = vmatprep.subr.bf16.mxu1 %v6496_v24  ;;  %v6554_v23 = vcombine.high %v968_v19, %v972_v20  ;;  %v975_v24 = vld [vmem:[#allocation11 + $0x590] sm:$0xff]  ;;  %v1028_v16 = vld [vmem:[#allocation11 + $0x738] sm:$0xff]  ;;  %v6601_v20 = vcombine.low %v1016_v4, %v1020_v5 }
 0x2f3   :  { %2649 = vmatprep.subr.bf16.mxu0 %v6498_v9  ;;  %v979_v9 = vld [vmem:[#allocation11 + $0x5b0] sm:$0xff] }
 0x2f4   :  { %v6559_v32 = vcombine.low %v975_v24, %v979_v9 }
 0x2f5   :  { %2568 = vmatpush1.bf16.msra.mxu1 %v6495_v25  ;;  %v6560_v25 = vcombine.high %v975_v24, %v979_v9  ;;  %v1032_v24 = vld [vmem:[#allocation11 + $0x758] sm:$0xff] }
 0x2f6   :  { %2650 = vmatpush1.bf16.msra.mxu0 %v6497_v27  ;;  %2569 = vmatprep.subr.bf16.mxu1 %v6504_v28  ;;  %v6562_v27 = vcombine.high %v976_v10, %v980_v11  ;;  %v983_v28 = vld [vmem:[#allocation11 + $0x5d0] sm:$0xff]  ;;  %v1036_v9 = vld [vmem:[#allocation11 + $0x778] sm:$0xff]  ;;  %v6609_v11 = vcombine.low %v1024_v15, %v1028_v16 }
 0x2f7   :  { %2651 = vmatprep.subr.bf16.mxu0 %v6506_v29  ;;  %v987_v29 = vld [vmem:[#allocation11 + $0x5f0] sm:$0xff] }
 0x2f9   :  { %2570 = vmatpush1.bf16.msra.mxu1 %v6503_v34  ;;  %v6568_v34 = vcombine.high %v983_v28, %v987_v29 }
 0x2fa   :  { %2652 = vmatpush1.bf16.msra.mxu0 %v6505_v35  ;;  %2580 = vmatprep.subr.bf16.mxu1 %v6512_v37  ;;  %v6570_v35 = vcombine.high %v984_v30, %v988_v31  ;;  %v991_v37 = vld [vmem:[#allocation11 + $0x610] sm:$0xff]  ;;  %v6617_v31 = vcombine.low %v1032_v24, %v1036_v9 }
 0x2fb   :  { %2662 = vmatprep.subr.bf16.mxu0 %v6514_v38  ;;  %v995_v38 = vld [vmem:[#allocation11 + $0x630] sm:$0xff] }
 0x2fc   :  { %2572 = vmatmul.mubr.bf16.vlgmr.msra.gmra.mrb[4].mxu1 %v8479_v2  ;;  %v6576_v45 = vcombine.high %v991_v37, %v995_v38 }
 0x2fd   :  { %2654 = vmatmul.mubr.bf16.vlgmr.msra.gmra.mrb[16].mxu0 %v8479_v2  ;;  %2581 = vmatpush1.bf16.msra.mxu1 %v6511_v42  ;;  %v6529_v2 = vcombine.low %v944_v1, %v948_v53  ;;  %v6567_v42 = vcombine.low %v983_v28, %v987_v29  ;;  %v6575_v1 = vcombine.low %v991_v37, %v995_v38  ;;  %v1040_v28 = vld [vmem:[#allocation11 + $0x798] sm:$0xff] }
 0x2fe   :  { %2612 = vmatprep.mubr.bf16.mxu1 %v8501_v18  ;;  %2663 = vmatpush1.bf16.msra.mxu0 %v6513_v46  ;;  %v6578_v46 = vcombine.high %v992_v39, %v996_v40  ;;  %v6577_v53 = vcombine.low %v992_v39, %v996_v40  ;;  %v1044_v29 = vld [vmem:[#allocation11 + $0x7b8] sm:$0xff] }
 0x2ff   :  { %2694 = vmatprep.mubr.bf16.mxu0 %v8501_v18  ;;  %2582 = vmatprep.subr.bf16.mxu1 %v6520_v47  ;;  %v6535_v18 = vcombine.low %v951_v59, %v955_v60  ;;  %v999_v47 = vld [vmem:[#allocation11 + $0x650] sm:$0xff]  ;;  %v1008_v59 = vld [vmem:[#allocation11 + $0x698] sm:$0xff]  ;;  %v6625_v40 = vcombine.low %v1040_v28, %v1044_v29 }
 0x300   :  { %2664 = vmatprep.subr.bf16.mxu0 %v6522_v52  ;;  %v1004_v52 = vld [vmem:[#allocation11 + $0x678] sm:$0xff]  ;;  %v6583_v61 = vcombine.low %v999_v47, %v1003_v48 }
 0x301   :  { %2583 = vmatpush1.bf16.msra.mxu1 %v6519_v55  ;;  %v6584_v55 = vcombine.high %v999_v47, %v1003_v48  ;;  %v1012_v60 = vld [vmem:[#allocation11 + $0x6b8] sm:$0xff]  ;;  %v6585_v62 = vcombine.low %v1000_v49, %v1004_v52  ;;  %v7379_v47 = vld [vmem:[#allocation14 + $0x4] ss:$28 sps:$4 sm:$0xff]   ;;  %v7382_v48 = vld [vmem:[#allocation14 + $0xc] ss:$28 sps:$4 sm:$0xff]  }
 0x302   :  { %2665 = vmatpush1.bf16.msra.mxu0 %v6521_v56  ;;  %2584 = vmatprep.subr.bf16.mxu1 %v6528_v57  ;;  %v6586_v56 = vcombine.high %v1000_v49, %v1004_v52  ;;  %v1007_v57 = vld [vmem:[#allocation11 + $0x690] sm:$0xff]  ;;  %v6593_v7 = vcombine.low %v1008_v59, %v1012_v60  ;;  %v1048_v37 = vld [vmem:[#allocation11 + $0x7d8] sm:$0xff]  ;;  %v7377_v49 = vld [vmem:[#allocation14] ss:$28 sps:$4 sm:$0xff]  }
 0x303   :  { %2666 = vmatprep.subr.bf16.mxu0 %v6530_v58  ;;  %v1011_v58 = vld [vmem:[#allocation11 + $0x6b0] sm:$0xff]  ;;  %v1052_v38 = vld [vmem:[#allocation11 + $0x7f8] sm:$0xff] }
 0x304   :  { %v6591_v6 = vcombine.low %v1007_v57, %v1011_v58  ;;  %v7380_v52 = vld [vmem:[#allocation14 + $0x8] ss:$28 sps:$4 sm:$0xff]  }
 0x305   :  { %2585 = vmatpush1.bf16.msra.mxu1 %v6527_v63  ;;  %v6592_v63 = vcombine.high %v1007_v57, %v1011_v58  ;;  %v7391_v57 = vld [vmem:[#allocation14 + $0x74] ss:$28 sps:$4 sm:$0xff]   ;;  %v7394_v58 = vld [vmem:[#allocation14 + $0x7c] ss:$28 sps:$4 sm:$0xff]  }
 0x306   :  { %2667 = vmatpush1.bf16.msra.mxu0 %v6529_v2  ;;  %2586 = vmatprep.subr.bf16.mxu1 %v6536_v0  ;;  %v6594_v2 = vcombine.high %v1008_v59, %v1012_v60  ;;  %v1015_v0 = vld [vmem:[#allocation11 + $0x6d0] sm:$0xff]  ;;  %v7392_v60 = vld [vmem:[#allocation14 + $0x78] ss:$28 sps:$4 sm:$0xff]  }
 0x307   :  { %2668 = vmatprep.subr.bf16.mxu0 %v6538_v3  ;;  %v1019_v3 = vld [vmem:[#allocation11 + $0x6f0] sm:$0xff] }
 0x308   :  { %v6599_v19 = vcombine.low %v1015_v0, %v1019_v3  ;;  %v7389_v59 = vld [vmem:[#allocation14 + $0x70] ss:$28 sps:$4 sm:$0xff]  }
 0x309   :  { %2587 = vmatpush1.bf16.msra.mxu1 %v6535_v18  ;;  %v6600_v18 = vcombine.high %v1015_v0, %v1019_v3  ;;  %v7406_v0 = vld [vmem:[#allocation14 + $0xec] ss:$28 sps:$4 sm:$0xff]   ;;  %v7401_v3 = vld [vmem:[#allocation14 + $0xe0] ss:$28 sps:$4 sm:$0xff]  }
 0x30a   :  { %2669 = vmatpush1.bf16.msra.mxu0 %v6537_v8  ;;  %2588 = vmatprep.subr.bf16.mxu1 %v6544_v12  ;;  %v6602_v8 = vcombine.high %v1016_v4, %v1020_v5  ;;  %v1023_v12 = vld [vmem:[#allocation11 + $0x710] sm:$0xff]  ;;  %v7409_v5 = vld [vmem:[#allocation14 + $0x11c] ss:$28 sps:$4 sm:$0xff]  }
 0x30b   :  { %2670 = vmatprep.subr.bf16.mxu0 %v6546_v13  ;;  %v1027_v13 = vld [vmem:[#allocation11 + $0x730] sm:$0xff] }
 0x30c   :  { %v6607_v10 = vcombine.low %v1023_v12, %v1027_v13  ;;  %v7404_v4 = vld [vmem:[#allocation14 + $0xe8] ss:$28 sps:$4 sm:$0xff]  }
 0x30d   :  { %2589 = vmatpush1.bf16.msra.mxu1 %v6543_v21  ;;  %v6608_v21 = vcombine.high %v1023_v12, %v1027_v13  ;;  %v7418_v12 = vld [vmem:[#allocation14 + $0x15c] ss:$28 sps:$4 sm:$0xff]   ;;  %v7413_v13 = vld [vmem:[#allocation14 + $0x150] ss:$28 sps:$4 sm:$0xff]  }
 0x30e   :  { %2671 = vmatpush1.bf16.msra.mxu0 %v6545_v50  ;;  %2590 = vmatprep.subr.bf16.mxu1 %v6552_v22  ;;  %v6610_v50 = vcombine.high %v1024_v15, %v1028_v16  ;;  %v1031_v22 = vld [vmem:[#allocation11 + $0x750] sm:$0xff]  ;;  %v7416_v15 = vld [vmem:[#allocation14 + $0x158] ss:$28 sps:$4 sm:$0xff]  }
 0x30f   :  { %2672 = vmatprep.subr.bf16.mxu0 %v6554_v23  ;;  %v1035_v23 = vld [vmem:[#allocation11 + $0x770] sm:$0xff] }
 0x310   :  { %v6615_v30 = vcombine.low %v1031_v22, %v1035_v23  ;;  %v7421_v16 = vld [vmem:[#allocation14 + $0x18c] ss:$28 sps:$4 sm:$0xff]  }
 0x311   :  { %2591 = vmatpush1.bf16.msra.mxu1 %v6551_v14  ;;  %v6616_v14 = vcombine.high %v1031_v22, %v1035_v23  ;;  %v7430_v22 = vld [vmem:[#allocation14 + $0x1cc] ss:$28 sps:$4 sm:$0xff]   ;;  %v7425_v23 = vld [vmem:[#allocation14 + $0x1c0] ss:$28 sps:$4 sm:$0xff]  }
 0x312   :  { %2673 = vmatpush1.bf16.msra.mxu0 %v6553_v17  ;;  %2592 = vmatprep.subr.bf16.mxu1 %v6560_v25  ;;  %v6618_v17 = vcombine.high %v1032_v24, %v1036_v9  ;;  %v1039_v25 = vld [vmem:[#allocation11 + $0x790] sm:$0xff]  ;;  %v7433_v9 = vld [vmem:[#allocation14 + $0x1fc] ss:$28 sps:$4 sm:$0xff]  }
 0x313   :  { %2674 = vmatprep.subr.bf16.mxu0 %v6562_v27  ;;  %v1043_v27 = vld [vmem:[#allocation11 + $0x7b0] sm:$0xff] }
 0x314   :  { %v6623_v39 = vcombine.low %v1039_v25, %v1043_v27  ;;  %v7428_v24 = vld [vmem:[#allocation14 + $0x1c8] ss:$28 sps:$4 sm:$0xff]  }
 0x315   :  { %2593 = vmatpush1.bf16.msra.mxu1 %v6559_v32  ;;  %v6624_v32 = vcombine.high %v1039_v25, %v1043_v27  ;;  %v7442_v25 = vld [vmem:[#allocation14 + $0x23c] ss:$28 sps:$4 sm:$0xff]   ;;  %v7437_v27 = vld [vmem:[#allocation14 + $0x230] ss:$28 sps:$4 sm:$0xff]  }
 0x316   :  { %2675 = vmatpush1.bf16.msra.mxu0 %v6561_v33  ;;  %2594 = vmatprep.subr.bf16.mxu1 %v6568_v34  ;;  %v6626_v33 = vcombine.high %v1040_v28, %v1044_v29  ;;  %v1047_v34 = vld [vmem:[#allocation11 + $0x7d0] sm:$0xff]  ;;  %v7440_v28 = vld [vmem:[#allocation14 + $0x238] ss:$28 sps:$4 sm:$0xff]  }
 0x317   :  { %2676 = vmatprep.subr.bf16.mxu0 %v6570_v35  ;;  %v1051_v35 = vld [vmem:[#allocation11 + $0x7f0] sm:$0xff] }
 0x318   :  { %v7445_v29 = vld [vmem:[#allocation14 + $0x26c] ss:$28 sps:$4 sm:$0xff]  }
 0x319   :  { %2595 = vmatpush1.bf16.msra.mxu1 %v6567_v42  ;;  %v6632_v42 = vcombine.high %v1047_v34, %v1051_v35 }
 0x31a   :  { %2677 = vmatpush1.bf16.msra.mxu0 %v6569_v43  ;;  %2596 = vmatprep.subr.bf16.mxu1 %v6576_v45  ;;  %v6634_v43 = vcombine.high %v1048_v37, %v1052_v38  ;;  %v6631_v45 = vcombine.low %v1047_v34, %v1051_v35  ;;  %v7454_v34 = vld [vmem:[#allocation14 + $0x2ac] ss:$28 sps:$4 sm:$0xff]   ;;  %v7449_v35 = vld [vmem:[#allocation14 + $0x2a0] ss:$28 sps:$4 sm:$0xff]  }
 0x31b   :  { %2678 = vmatprep.subr.bf16.mxu0 %v6578_v46  ;;  %v6633_v46 = vcombine.low %v1048_v37, %v1052_v38  ;;  %v7452_v37 = vld [vmem:[#allocation14 + $0x2a8] ss:$28 sps:$4 sm:$0xff]   ;;  %v7457_v38 = vld [vmem:[#allocation14 + $0x2dc] ss:$28 sps:$4 sm:$0xff]  }
 0x31d   :  { %2597 = vmatpush1.bf16.msra.mxu1 %v6575_v1  ;;  %v7385_v1 = vld [vmem:[#allocation14 + $0x3c] ss:$28 sps:$4 sm:$0xff]  }
 0x31e   :  { %2679 = vmatpush1.bf16.msra.mxu0 %v6577_v53  ;;  %2598 = vmatprep.subr.bf16.mxu1 %v6584_v55  ;;  %v7388_v53 = vld [vmem:[#allocation14 + $0x44] ss:$28 sps:$4 sm:$0xff]   ;;  %v7383_v55 = vld [vmem:[#allocation14 + $0x38] ss:$28 sps:$4 sm:$0xff]  }
 0x31f   :  { %2680 = vmatprep.subr.bf16.mxu0 %v6586_v56  ;;  %v7386_v56 = vld [vmem:[#allocation14 + $0x40] ss:$28 sps:$4 sm:$0xff]  }
 0x321   :  { %2599 = vmatpush1.bf16.msra.mxu1 %v6583_v61  ;;  %v7397_v61 = vld [vmem:[#allocation14 + $0xac] ss:$28 sps:$4 sm:$0xff]  }
 0x322   :  { %2681 = vmatpush1.bf16.msra.mxu0 %v6585_v62  ;;  %2600 = vmatprep.subr.bf16.mxu1 %v6592_v63  ;;  %v7400_v62 = vld [vmem:[#allocation14 + $0xb4] ss:$28 sps:$4 sm:$0xff]   ;;  %v7395_v63 = vld [vmem:[#allocation14 + $0xa8] ss:$28 sps:$4 sm:$0xff]  }
 0x323   :  { %2682 = vmatprep.subr.bf16.mxu0 %v6594_v2  ;;  %v7403_v2 = vld [vmem:[#allocation14 + $0xe4] ss:$28 sps:$4 sm:$0xff]  }
 0x325   :  { %2601 = vmatpush1.bf16.msra.mxu1 %v6591_v6  ;;  %v7412_v6 = vld [vmem:[#allocation14 + $0x124] ss:$28 sps:$4 sm:$0xff]  }
 0x326   :  { %2683 = vmatpush1.bf16.msra.mxu0 %v6593_v7  ;;  %2602 = vmatprep.subr.bf16.mxu1 %v6600_v18  ;;  %v7407_v7 = vld [vmem:[#allocation14 + $0x118] ss:$28 sps:$4 sm:$0xff]   ;;  %v7410_v18 = vld [vmem:[#allocation14 + $0x120] ss:$28 sps:$4 sm:$0xff]  }
 0x327   :  { %2684 = vmatprep.subr.bf16.mxu0 %v6602_v8  ;;  %v7415_v8 = vld [vmem:[#allocation14 + $0x154] ss:$28 sps:$4 sm:$0xff]  }
 0x329   :  { %2603 = vmatpush1.bf16.msra.mxu1 %v6599_v19  ;;  %v7424_v19 = vld [vmem:[#allocation14 + $0x194] ss:$28 sps:$4 sm:$0xff]  }
 0x32a   :  { %2685 = vmatpush1.bf16.msra.mxu0 %v6601_v20  ;;  %2604 = vmatprep.subr.bf16.mxu1 %v6608_v21  ;;  %v7419_v20 = vld [vmem:[#allocation14 + $0x188] ss:$28 sps:$4 sm:$0xff]   ;;  %v7422_v21 = vld [vmem:[#allocation14 + $0x190] ss:$28 sps:$4 sm:$0xff]  }
 0x32b   :  { %2686 = vmatprep.subr.bf16.mxu0 %v6610_v50  ;;  %v7427_v50 = vld [vmem:[#allocation14 + $0x1c4] ss:$28 sps:$4 sm:$0xff]  }
 0x32d   :  { %2605 = vmatpush1.bf16.msra.mxu1 %v6607_v10  ;;  %v7436_v10 = vld [vmem:[#allocation14 + $0x204] ss:$28 sps:$4 sm:$0xff]  }
 0x32e   :  { %2687 = vmatpush1.bf16.msra.mxu0 %v6609_v11  ;;  %2606 = vmatprep.subr.bf16.mxu1 %v6616_v14  ;;  %v7431_v11 = vld [vmem:[#allocation14 + $0x1f8] ss:$28 sps:$4 sm:$0xff]   ;;  %v7434_v14 = vld [vmem:[#allocation14 + $0x200] ss:$28 sps:$4 sm:$0xff]  }
 0x32f   :  { %2688 = vmatprep.subr.bf16.mxu0 %v6618_v17  ;;  %v7439_v17 = vld [vmem:[#allocation14 + $0x234] ss:$28 sps:$4 sm:$0xff]  }
 0x331   :  { %2607 = vmatpush1.bf16.msra.mxu1 %v6615_v30  ;;  %v7448_v30 = vld [vmem:[#allocation14 + $0x274] ss:$28 sps:$4 sm:$0xff]  }
 0x332   :  { %2689 = vmatpush1.bf16.msra.mxu0 %v6617_v31  ;;  %2608 = vmatprep.subr.bf16.mxu1 %v6624_v32  ;;  %v7443_v31 = vld [vmem:[#allocation14 + $0x268] ss:$28 sps:$4 sm:$0xff]   ;;  %v7446_v32 = vld [vmem:[#allocation14 + $0x270] ss:$28 sps:$4 sm:$0xff]  }
 0x333   :  { %2690 = vmatprep.subr.bf16.mxu0 %v6626_v33  ;;  %v7451_v33 = vld [vmem:[#allocation14 + $0x2a4] ss:$28 sps:$4 sm:$0xff]  }
 0x335   :  { %2609 = vmatpush1.bf16.msra.mxu1 %v6623_v39  ;;  %v7460_v39 = vld [vmem:[#allocation14 + $0x2e4] ss:$28 sps:$4 sm:$0xff]  }
 0x336   :  { %2691 = vmatpush1.bf16.msra.mxu0 %v6625_v40  ;;  %2610 = vmatprep.subr.bf16.mxu1 %v6632_v42  ;;  %v7455_v40 = vld [vmem:[#allocation14 + $0x2d8] ss:$28 sps:$4 sm:$0xff]   ;;  %v7458_v42 = vld [vmem:[#allocation14 + $0x2e0] ss:$28 sps:$4 sm:$0xff]  }
 0x337   :  { %2692 = vmatprep.subr.bf16.mxu0 %v6634_v43  ;;  %v7463_v43 = vld [vmem:[#allocation14 + $0x314] ss:$28 sps:$4 sm:$0xff]  }
 0x339   :  { %2611 = vmatpush1.bf16.msra.mxu1 %v6631_v45  ;;  %v7466_v45 = vld [vmem:[#allocation14 + $0x31c] ss:$28 sps:$4 sm:$0xff]  }
 0x33a   :  { %2693 = vmatpush1.bf16.msra.mxu0 %v6633_v46  ;;  %5572 = vmatprep.subr.bf16.mxu1 %v7379_v47  ;;  %v7461_v46 = vld [vmem:[#allocation14 + $0x310] ss:$28 sps:$4 sm:$0xff]   ;;  %v7464_v47 = vld [vmem:[#allocation14 + $0x318] ss:$28 sps:$4 sm:$0xff]  }
 0x33b   :  { %5736 = vmatprep.subr.bf16.mxu0 %v7382_v48  ;;  %v7469_v48 = vld [vmem:[#allocation14 + $0x34c] ss:$28 sps:$4 sm:$0xff]  }
 0x33c   :  { %2613 = vmatmul.mubr.bf16.vlgmr.msra.gmra.mrb[4].mxu1 %v8503_v26 }
 0x33d   :  { %2695 = vmatmul.mubr.bf16.vlgmr.msra.gmra.mrb[16].mxu0 %v8503_v26  ;;  %5573 = vmatpush1.bf16.msra.mxu1 %v7377_v49  ;;  %v7398_v26 = vld [vmem:[#allocation14 + $0xb0] ss:$28 sps:$4 sm:$0xff]  }
 0x33e   :  { %5737 = vmatpush1.bf16.msra.mxu0 %v7380_v52  ;;  %5574 = vmatprep.subr.bf16.mxu1 %v7385_v1  ;;  %v7472_v49 = vld [vmem:[#allocation14 + $0x354] ss:$28 sps:$4 sm:$0xff]   ;;  %v7467_v52 = vld [vmem:[#allocation14 + $0x348] ss:$28 sps:$4 sm:$0xff]  }
 0x33f   :  { %5738 = vmatprep.subr.bf16.mxu0 %v7388_v53  ;;  %v7470_v1 = vld [vmem:[#allocation14 + $0x350] ss:$28 sps:$4 sm:$0xff]   ;;  %v7475_v53 = vld [vmem:[#allocation14 + $0x384] ss:$28 sps:$4 sm:$0xff]  }
 0x341   :  { %5575 = vmatpush1.bf16.msra.mxu1 %v7383_v55  ;;  %v7478_v55 = vld [vmem:[#allocation14 + $0x38c] ss:$28 sps:$4 sm:$0xff]  }
 0x342   :  { %5739 = vmatpush1.bf16.msra.mxu0 %v7386_v56  ;;  %5576 = vmatprep.subr.bf16.mxu1 %v7391_v57  ;;  %v8517_v56 = vld [vmem:[#allocation13] sm:$0xff] }
 0x343   :  { %5740 = vmatprep.subr.bf16.mxu0 %v7394_v58  ;;  %v1058_v57 = vrot.slane %v8517_v56, %v8444_v41  ;;  %v1062_v58 = vrot.slane %v8517_v56, %v8447_v44 }
 0x345   :  { %5577 = vmatpush1.bf16.msra.mxu1 %v7389_v59  ;;  %v1070_v59 = vrot.slane %v8517_v56, %v8495_v54 }
 0x346   :  { %5741 = vmatpush1.bf16.msra.mxu0 %v7392_v60  ;;  %5578 = vmatprep.subr.bf16.mxu1 %v7397_v61 }
 0x347   :  { %5742 = vmatprep.subr.bf16.mxu0 %v7400_v62 }
 0x349   :  { %5579 = vmatpush1.bf16.msra.mxu1 %v7395_v63 }
 0x34a   :  { %5743 = vmatpush1.bf16.msra.mxu0 %v7398_v26  ;;  %5580 = vmatprep.subr.bf16.mxu1 %v7403_v2 }
 0x34b   :  { %5744 = vmatprep.subr.bf16.mxu0 %v7406_v0 }
 0x34d   :  { %5581 = vmatpush1.bf16.msra.mxu1 %v7401_v3 }
 0x34e   :  { %5745 = vmatpush1.bf16.msra.mxu0 %v7404_v4  ;;  %5582 = vmatprep.subr.bf16.mxu1 %v7409_v5 }
 0x34f   :  { %5746 = vmatprep.subr.bf16.mxu0 %v7412_v6 }
 0x351   :  { %5583 = vmatpush1.bf16.msra.mxu1 %v7407_v7 }
 0x352   :  { %5747 = vmatpush1.bf16.msra.mxu0 %v7410_v18  ;;  %5584 = vmatprep.subr.bf16.mxu1 %v7415_v8 }
 0x353   :  { %5748 = vmatprep.subr.bf16.mxu0 %v7418_v12 }
 0x355   :  { %5585 = vmatpush1.bf16.msra.mxu1 %v7413_v13  ;;  %v7473_v13 = vld [vmem:[#allocation14 + $0x380] ss:$28 sps:$4 sm:$0xff]  }
 0x356   :  { %5749 = vmatpush1.bf16.msra.mxu0 %v7416_v15  ;;  %5586 = vmatprep.subr.bf16.mxu1 %v7421_v16  ;;  %v7476_v15 = vld [vmem:[#allocation14 + $0x388] ss:$28 sps:$4 sm:$0xff]  }
 0x357   :  { %5750 = vmatprep.subr.bf16.mxu0 %v7424_v19  ;;  %v7481_v19 = vld [vmem:[#allocation14 + $0x3bc] ss:$28 sps:$4 sm:$0xff]  }
 0x359   :  { %5587 = vmatpush1.bf16.msra.mxu1 %v7419_v20  ;;  %v7484_v20 = vld [vmem:[#allocation14 + $0x3c4] ss:$28 sps:$4 sm:$0xff]  }
 0x35a   :  { %5751 = vmatpush1.bf16.msra.mxu0 %v7422_v21  ;;  %5588 = vmatprep.subr.bf16.mxu1 %v7427_v50  ;;  %v7479_v50 = vld [vmem:[#allocation14 + $0x3b8] ss:$28 sps:$4 sm:$0xff]  }
 0x35b   :  { %5752 = vmatprep.subr.bf16.mxu0 %v7430_v22  ;;  %v7482_v22 = vld [vmem:[#allocation14 + $0x3c0] ss:$28 sps:$4 sm:$0xff]  }
 0x35d   :  { %5589 = vmatpush1.bf16.msra.mxu1 %v7425_v23  ;;  %v7487_v23 = vld [vmem:[#allocation14 + $0x3f4] ss:$28 sps:$4 sm:$0xff]  }
 0x35e   :  { %5753 = vmatpush1.bf16.msra.mxu0 %v7428_v24  ;;  %5590 = vmatprep.subr.bf16.mxu1 %v7433_v9  ;;  %v7490_v24 = vld [vmem:[#allocation14 + $0x3fc] ss:$28 sps:$4 sm:$0xff]   ;;  %v7485_v9 = vld [vmem:[#allocation14 + $0x3f0] ss:$28 sps:$4 sm:$0xff]  }
 0x35f   :  { %5754 = vmatprep.subr.bf16.mxu0 %v7436_v10  ;;  %v7488_v10 = vld [vmem:[#allocation14 + $0x3f8] ss:$28 sps:$4 sm:$0xff]  }
 0x361   :  { %5591 = vmatpush1.bf16.msra.mxu1 %v7431_v11  ;;  %v7493_v11 = vld [vmem:[#allocation14 + $0x42c] ss:$28 sps:$4 sm:$0xff]  }
 0x362   :  { %5755 = vmatpush1.bf16.msra.mxu0 %v7434_v14  ;;  %5592 = vmatprep.subr.bf16.mxu1 %v7439_v17  ;;  %v7496_v14 = vld [vmem:[#allocation14 + $0x434] ss:$28 sps:$4 sm:$0xff]   ;;  %v7491_v17 = vld [vmem:[#allocation14 + $0x428] ss:$28 sps:$4 sm:$0xff]  }
 0x363   :  { %5756 = vmatprep.subr.bf16.mxu0 %v7442_v25  ;;  %v7494_v25 = vld [vmem:[#allocation14 + $0x430] ss:$28 sps:$4 sm:$0xff]  }
 0x365   :  { %5593 = vmatpush1.bf16.msra.mxu1 %v7437_v27  ;;  %v7499_v27 = vld [vmem:[#allocation14 + $0x464] ss:$28 sps:$4 sm:$0xff]  }
 0x366   :  { %5757 = vmatpush1.bf16.msra.mxu0 %v7440_v28  ;;  %5594 = vmatprep.subr.bf16.mxu1 %v7445_v29  ;;  %v7502_v28 = vld [vmem:[#allocation14 + $0x46c] ss:$28 sps:$4 sm:$0xff]   ;;  %v7497_v29 = vld [vmem:[#allocation14 + $0x460] ss:$28 sps:$4 sm:$0xff]  }
 0x367   :  { %5758 = vmatprep.subr.bf16.mxu0 %v7448_v30  ;;  %v7500_v30 = vld [vmem:[#allocation14 + $0x468] ss:$28 sps:$4 sm:$0xff]  }
 0x369   :  { %5595 = vmatpush1.bf16.msra.mxu1 %v7443_v31  ;;  %v7505_v31 = vld [vmem:[#allocation14 + $0x49c] ss:$28 sps:$4 sm:$0xff]  }
 0x36a   :  { %5759 = vmatpush1.bf16.msra.mxu0 %v7446_v32  ;;  %5596 = vmatprep.subr.bf16.mxu1 %v7451_v33  ;;  %v7508_v32 = vld [vmem:[#allocation14 + $0x4a4] ss:$28 sps:$4 sm:$0xff]   ;;  %v7503_v33 = vld [vmem:[#allocation14 + $0x498] ss:$28 sps:$4 sm:$0xff]  }
 0x36b   :  { %5760 = vmatprep.subr.bf16.mxu0 %v7454_v34  ;;  %v7506_v34 = vld [vmem:[#allocation14 + $0x4a0] ss:$28 sps:$4 sm:$0xff]  }
 0x36d   :  { %5597 = vmatpush1.bf16.msra.mxu1 %v7449_v35  ;;  %v7511_v35 = vld [vmem:[#allocation14 + $0x4d4] ss:$28 sps:$4 sm:$0xff]  }
 0x36e   :  { %5761 = vmatpush1.bf16.msra.mxu0 %v7452_v37  ;;  %5598 = vmatprep.subr.bf16.mxu1 %v7457_v38  ;;  %v7514_v37 = vld [vmem:[#allocation14 + $0x4dc] ss:$28 sps:$4 sm:$0xff]   ;;  %v7509_v38 = vld [vmem:[#allocation14 + $0x4d0] ss:$28 sps:$4 sm:$0xff]  }
 0x36f   :  { %5762 = vmatprep.subr.bf16.mxu0 %v7460_v39  ;;  %v7512_v39 = vld [vmem:[#allocation14 + $0x4d8] ss:$28 sps:$4 sm:$0xff]  }
 0x371   :  { %5599 = vmatpush1.bf16.msra.mxu1 %v7455_v40  ;;  %v7517_v40 = vld [vmem:[#allocation14 + $0x50c] ss:$28 sps:$4 sm:$0xff]  }
 0x372   :  { %5763 = vmatpush1.bf16.msra.mxu0 %v7458_v42  ;;  %5600 = vmatprep.subr.bf16.mxu1 %v7463_v43  ;;  %v7520_v42 = vld [vmem:[#allocation14 + $0x514] ss:$28 sps:$4 sm:$0xff]   ;;  %v7515_v43 = vld [vmem:[#allocation14 + $0x508] ss:$28 sps:$4 sm:$0xff]  }
 0x373   :  { %5764 = vmatprep.subr.bf16.mxu0 %v7466_v45  ;;  %v7518_v45 = vld [vmem:[#allocation14 + $0x510] ss:$28 sps:$4 sm:$0xff]  }
 0x375   :  { %5601 = vmatpush1.bf16.msra.mxu1 %v7461_v46  ;;  %v7523_v46 = vld [vmem:[#allocation14 + $0x544] ss:$28 sps:$4 sm:$0xff]  }
 0x376   :  { %5765 = vmatpush1.bf16.msra.mxu0 %v7464_v47  ;;  %5602 = vmatprep.subr.bf16.mxu1 %v7469_v48  ;;  %v7526_v47 = vld [vmem:[#allocation14 + $0x54c] ss:$28 sps:$4 sm:$0xff]   ;;  %v7521_v48 = vld [vmem:[#allocation14 + $0x540] ss:$28 sps:$4 sm:$0xff]  }
 0x377   :  { %5766 = vmatprep.subr.bf16.mxu0 %v7472_v49  ;;  %v7524_v49 = vld [vmem:[#allocation14 + $0x548] ss:$28 sps:$4 sm:$0xff]  }
 0x379   :  { %5603 = vmatpush1.bf16.msra.mxu1 %v7467_v52  ;;  %v7529_v52 = vld [vmem:[#allocation14 + $0x57c] ss:$28 sps:$4 sm:$0xff]  }
 0x37a   :  { %5767 = vmatpush1.bf16.msra.mxu0 %v7470_v1  ;;  %5613 = vmatprep.subr.bf16.mxu1 %v7475_v53  ;;  %v7532_v1 = vld [vmem:[#allocation14 + $0x584] ss:$28 sps:$4 sm:$0xff]   ;;  %v7527_v53 = vld [vmem:[#allocation14 + $0x578] ss:$28 sps:$4 sm:$0xff]  }
 0x37b   :  { %5777 = vmatprep.subr.bf16.mxu0 %v7478_v55  ;;  %v7530_v55 = vld [vmem:[#allocation14 + $0x580] ss:$28 sps:$4 sm:$0xff]  }
 0x38f   :  { %v2450_v60 = vpop.f32.mrb[0].mxu1  ;;  %v8525_v61 = vpop.f32.mrb[12].mxu0 }
 0x390   :  { %v7171_v62 = vadd.f32 %v2450_v60, %v1058_v57  ;;  %v2452_v63 = vpop.f32.mrb[1].mxu1  ;;  %v2534_v26 = vpop.f32.mrb[13].mxu0  ;;  %v7535_v57 = vld [vmem:[#allocation14 + $0x5b4] ss:$28 sps:$4 sm:$0xff]  }
 0x391   :  { %v7172_v2 = vadd.f32 %v2452_v63, %v1062_v58  ;;  %v7174_v0 = vadd.f32 %v2534_v26, %v1070_v59  ;;  %v2454_v3 = vpop.f32.mrb[2].mxu1  ;;  %v2536_v4 = vpop.f32.mrb[14].mxu0  ;;  %v7538_v58 = vld [vmem:[#allocation14 + $0x5bc] ss:$28 sps:$4 sm:$0xff]   ;;  %v7533_v59 = vld [vmem:[#allocation14 + $0x5b0] ss:$28 sps:$4 sm:$0xff]  }
 0x392   :  { %v2703_v5 = vmax.f32 %v7171_v62, 0.0  ;;  %v2455_v6 = vpop.f32.mrb[3].mxu1  ;;  %v2537_v7 = vpop.f32.mrb[15].mxu0  ;;  %v7536_v60 = vld [vmem:[#allocation14 + $0x5b8] ss:$28 sps:$4 sm:$0xff]  }
 0x393   :  { %v2704_v18 = vmax.f32 %v7172_v2, 0.0  ;;  %v2706_v8 = vmax.f32 %v7174_v0, 0.0  ;;  %v7541_v62 = vld [vmem:[#allocation14 + $0x5ec] ss:$28 sps:$4 sm:$0xff]   ;;  %v7544_v63 = vld [vmem:[#allocation14 + $0x5f4] ss:$28 sps:$4 sm:$0xff]  }
 0x394   :  { %v8529_v16 = vpack.c.bf16 %v2703_v5, %v2703_v5  ;;  %v7539_v26 = vld [vmem:[#allocation14 + $0x5e8] ss:$28 sps:$4 sm:$0xff]   ;;  %v7542_v2 = vld [vmem:[#allocation14 + $0x5f0] ss:$28 sps:$4 sm:$0xff]   ;;  %v7545_v4 = vld [vmem:[#allocation14 + $0x620] ss:$28 sps:$4 sm:$0xff]  }
 0x395   :  { %v8527_v12 = vpack.c.bf16 %v2704_v18, %v2704_v18  ;;  %v8533_v21 = vpack.c.bf16 %v2706_v8, %v2706_v8  ;;  %v7547_v0 = vld [vmem:[#allocation14 + $0x624] ss:$28 sps:$4 sm:$0xff]   ;;  %v7550_v3 = vld [vmem:[#allocation14 + $0x62c] ss:$28 sps:$4 sm:$0xff]   ;;  %v7553_v6 = vld [vmem:[#allocation14 + $0x65c] ss:$28 sps:$4 sm:$0xff]  }
 0x396   :  { %v7548_v5 = vld [vmem:[#allocation14 + $0x628] ss:$28 sps:$4 sm:$0xff]   ;;  %v7551_v18 = vld [vmem:[#allocation14 + $0x658] ss:$28 sps:$4 sm:$0xff]   ;;  %v7554_v8 = vld [vmem:[#allocation14 + $0x660] ss:$28 sps:$4 sm:$0xff]  }
 0x397   :  { %5604 = vmatprep.mubr.bf16.mxu1 %v8527_v12  ;;  %5768 = vmatprep.mubr.bf16.mxu0 %v8527_v12  ;;  %v7556_v7 = vld [vmem:[#allocation14 + $0x664] ss:$28 sps:$4 sm:$0xff]  }
 0x398   :  { %5605 = vmatmul.mubr.bf16.vlgmr.msra.gmra.mrb[8].mxu1 %v8529_v16  ;;  %5769 = vmatmul.mubr.bf16.vlgmr.msra.gmra.mrb[20].mxu0 %v8529_v16 }
 0x399   :  { %5614 = vmatpush1.bf16.msra.mxu1 %v7473_v13  ;;  %5778 = vmatpush1.bf16.msra.mxu0 %v7476_v15  ;;  %v1066_v13 = vrot.slane %v8517_v56, %v8492_v51  ;;  %v7559_v15 = vld [vmem:[#allocation14 + $0x694] ss:$28 sps:$4 sm:$0xff]  }
 0x39a   :  { %5645 = vmatprep.mubr.bf16.mxu1 %v8533_v21  ;;  %5809 = vmatprep.mubr.bf16.mxu0 %v8533_v21 }
 0x39b   :  { %5615 = vmatprep.subr.bf16.mxu1 %v7481_v19  ;;  %5779 = vmatprep.subr.bf16.mxu0 %v7484_v20  ;;  %v7562_v19 = vld [vmem:[#allocation14 + $0x69c] ss:$28 sps:$4 sm:$0xff]   ;;  %v7557_v20 = vld [vmem:[#allocation14 + $0x690] ss:$28 sps:$4 sm:$0xff]  }
 0x39d   :  { %5616 = vmatpush1.bf16.msra.mxu1 %v7479_v50  ;;  %5780 = vmatpush1.bf16.msra.mxu0 %v7482_v22  ;;  %v7560_v50 = vld [vmem:[#allocation14 + $0x698] ss:$28 sps:$4 sm:$0xff]   ;;  %v7173_v22 = vadd.f32 %v8525_v61, %v1066_v13 }
 0x39e   :  { %5617 = vmatprep.subr.bf16.mxu1 %v7487_v23  ;;  %5781 = vmatprep.subr.bf16.mxu0 %v7490_v24  ;;  %v7565_v23 = vld [vmem:[#allocation14 + $0x6cc] ss:$28 sps:$4 sm:$0xff]   ;;  %v7568_v24 = vld [vmem:[#allocation14 + $0x6d4] ss:$28 sps:$4 sm:$0xff]   ;;  %v7577_v61 = vld [vmem:[#allocation14 + $0x73c] ss:$28 sps:$4 sm:$0xff]  }
 0x39f   :  { %v7632_v13 = vld [vmem:[#allocation14 + $0x938] ss:$28 sps:$4 sm:$0xff]  }
 0x3a1   :  { %5618 = vmatpush1.bf16.msra.mxu1 %v7485_v9  ;;  %5782 = vmatpush1.bf16.msra.mxu0 %v7488_v10  ;;  %v7563_v9 = vld [vmem:[#allocation14 + $0x6c8] ss:$28 sps:$4 sm:$0xff]   ;;  %v7566_v10 = vld [vmem:[#allocation14 + $0x6d0] ss:$28 sps:$4 sm:$0xff]  }
 0x3a2   :  { %5619 = vmatprep.subr.bf16.mxu1 %v7493_v11  ;;  %5783 = vmatprep.subr.bf16.mxu0 %v7496_v14  ;;  %v2705_v11 = vmax.f32 %v7173_v22, 0.0  ;;  %v7571_v14 = vld [vmem:[#allocation14 + $0x704] ss:$28 sps:$4 sm:$0xff]  }
 0x3a3   :  { %v7643_v22 = vld [vmem:[#allocation14 + $0x9a4] ss:$28 sps:$4 sm:$0xff]  }
 0x3a5   :  { %5620 = vmatpush1.bf16.msra.mxu1 %v7491_v17  ;;  %5784 = vmatpush1.bf16.msra.mxu0 %v7494_v25  ;;  %v7574_v17 = vld [vmem:[#allocation14 + $0x70c] ss:$28 sps:$4 sm:$0xff]   ;;  %v7569_v25 = vld [vmem:[#allocation14 + $0x700] ss:$28 sps:$4 sm:$0xff]  }
 0x3a6   :  { %5621 = vmatprep.subr.bf16.mxu1 %v7499_v27  ;;  %5785 = vmatprep.subr.bf16.mxu0 %v7502_v28  ;;  %v7572_v27 = vld [vmem:[#allocation14 + $0x708] ss:$28 sps:$4 sm:$0xff]   ;;  %v8542_v28 = vpack.c.bf16 %v2705_v11, %v2705_v11 }
 0x3a7   :  { %v7652_v11 = vld [vmem:[#allocation14 + $0x9e4] ss:$28 sps:$4 sm:$0xff]  }
 0x3a9   :  { %5622 = vmatpush1.bf16.msra.mxu1 %v7497_v29  ;;  %5786 = vmatpush1.bf16.msra.mxu0 %v7500_v30  ;;  %v7580_v29 = vld [vmem:[#allocation14 + $0x744] ss:$28 sps:$4 sm:$0xff]   ;;  %v7575_v30 = vld [vmem:[#allocation14 + $0x738] ss:$28 sps:$4 sm:$0xff]  }
 0x3aa   :  { %5623 = vmatprep.subr.bf16.mxu1 %v7505_v31  ;;  %5787 = vmatprep.subr.bf16.mxu0 %v7508_v32  ;;  %v7578_v31 = vld [vmem:[#allocation14 + $0x740] ss:$28 sps:$4 sm:$0xff]   ;;  %v7583_v32 = vld [vmem:[#allocation14 + $0x774] ss:$28 sps:$4 sm:$0xff]  }
 0x3ad   :  { %5624 = vmatpush1.bf16.msra.mxu1 %v7503_v33  ;;  %5788 = vmatpush1.bf16.msra.mxu0 %v7506_v34  ;;  %v7586_v33 = vld [vmem:[#allocation14 + $0x77c] ss:$28 sps:$4 sm:$0xff]   ;;  %v7581_v34 = vld [vmem:[#allocation14 + $0x770] ss:$28 sps:$4 sm:$0xff]  }
 0x3ae   :  { %5625 = vmatprep.subr.bf16.mxu1 %v7511_v35  ;;  %5789 = vmatprep.subr.bf16.mxu0 %v7514_v37  ;;  %v7584_v35 = vld [vmem:[#allocation14 + $0x778] ss:$28 sps:$4 sm:$0xff]   ;;  %v7589_v37 = vld [vmem:[#allocation14 + $0x7ac] ss:$28 sps:$4 sm:$0xff]  }
 0x3b1   :  { %5626 = vmatpush1.bf16.msra.mxu1 %v7509_v38  ;;  %5790 = vmatpush1.bf16.msra.mxu0 %v7512_v39  ;;  %v7592_v38 = vld [vmem:[#allocation14 + $0x7b4] ss:$28 sps:$4 sm:$0xff]   ;;  %v7587_v39 = vld [vmem:[#allocation14 + $0x7a8] ss:$28 sps:$4 sm:$0xff]  }
 0x3b2   :  { %5627 = vmatprep.subr.bf16.mxu1 %v7517_v40  ;;  %5791 = vmatprep.subr.bf16.mxu0 %v7520_v42  ;;  %v7590_v40 = vld [vmem:[#allocation14 + $0x7b0] ss:$28 sps:$4 sm:$0xff]   ;;  %v7595_v42 = vld [vmem:[#allocation14 + $0x7e4] ss:$28 sps:$4 sm:$0xff]  }
 0x3b5   :  { %5628 = vmatpush1.bf16.msra.mxu1 %v7515_v43  ;;  %5792 = vmatpush1.bf16.msra.mxu0 %v7518_v45  ;;  %v7598_v43 = vld [vmem:[#allocation14 + $0x7ec] ss:$28 sps:$4 sm:$0xff]   ;;  %v7593_v45 = vld [vmem:[#allocation14 + $0x7e0] ss:$28 sps:$4 sm:$0xff]  }
 0x3b6   :  { %5629 = vmatprep.subr.bf16.mxu1 %v7523_v46  ;;  %5793 = vmatprep.subr.bf16.mxu0 %v7526_v47  ;;  %v7596_v46 = vld [vmem:[#allocation14 + $0x7e8] ss:$28 sps:$4 sm:$0xff]   ;;  %v7601_v47 = vld [vmem:[#allocation14 + $0x81c] ss:$28 sps:$4 sm:$0xff]  }
 0x3b9   :  { %5630 = vmatpush1.bf16.msra.mxu1 %v7521_v48  ;;  %5794 = vmatpush1.bf16.msra.mxu0 %v7524_v49  ;;  %v7604_v48 = vld [vmem:[#allocation14 + $0x824] ss:$28 sps:$4 sm:$0xff]   ;;  %v7599_v49 = vld [vmem:[#allocation14 + $0x818] ss:$28 sps:$4 sm:$0xff]  }
 0x3ba   :  { %5631 = vmatprep.subr.bf16.mxu1 %v7529_v52  ;;  %5795 = vmatprep.subr.bf16.mxu0 %v7532_v1  ;;  %v7602_v52 = vld [vmem:[#allocation14 + $0x820] ss:$28 sps:$4 sm:$0xff]   ;;  %v7607_v1 = vld [vmem:[#allocation14 + $0x854] ss:$28 sps:$4 sm:$0xff]  }
 0x3bd   :  { %5632 = vmatpush1.bf16.msra.mxu1 %v7527_v53  ;;  %5796 = vmatpush1.bf16.msra.mxu0 %v7530_v55  ;;  %v7610_v53 = vld [vmem:[#allocation14 + $0x85c] ss:$28 sps:$4 sm:$0xff]   ;;  %v7605_v55 = vld [vmem:[#allocation14 + $0x850] ss:$28 sps:$4 sm:$0xff]  }
 0x3be   :  { %5633 = vmatprep.subr.bf16.mxu1 %v7535_v57  ;;  %5797 = vmatprep.subr.bf16.mxu0 %v7538_v58  ;;  %v7608_v57 = vld [vmem:[#allocation14 + $0x858] ss:$28 sps:$4 sm:$0xff]   ;;  %v7613_v58 = vld [vmem:[#allocation14 + $0x88c] ss:$28 sps:$4 sm:$0xff]  }
 0x3c1   :  { %5634 = vmatpush1.bf16.msra.mxu1 %v7533_v59  ;;  %5798 = vmatpush1.bf16.msra.mxu0 %v7536_v60  ;;  %v7616_v59 = vld [vmem:[#allocation14 + $0x894] ss:$28 sps:$4 sm:$0xff]   ;;  %v7611_v60 = vld [vmem:[#allocation14 + $0x888] ss:$28 sps:$4 sm:$0xff]  }
 0x3c2   :  { %5635 = vmatprep.subr.bf16.mxu1 %v7541_v62  ;;  %5799 = vmatprep.subr.bf16.mxu0 %v7544_v63  ;;  %v7614_v62 = vld [vmem:[#allocation14 + $0x890] ss:$28 sps:$4 sm:$0xff]   ;;  %v7619_v63 = vld [vmem:[#allocation14 + $0x8c4] ss:$28 sps:$4 sm:$0xff]  }
 0x3c5   :  { %5636 = vmatpush1.bf16.msra.mxu1 %v7539_v26  ;;  %5800 = vmatpush1.bf16.msra.mxu0 %v7542_v2  ;;  %v7622_v26 = vld [vmem:[#allocation14 + $0x8cc] ss:$28 sps:$4 sm:$0xff]   ;;  %v7617_v2 = vld [vmem:[#allocation14 + $0x8c0] ss:$28 sps:$4 sm:$0xff]  }
 0x3c6   :  { %5637 = vmatprep.subr.bf16.mxu1 %v7547_v0  ;;  %5801 = vmatprep.subr.bf16.mxu0 %v7550_v3  ;;  %v7620_v0 = vld [vmem:[#allocation14 + $0x8c8] ss:$28 sps:$4 sm:$0xff]   ;;  %v7625_v3 = vld [vmem:[#allocation14 + $0x8fc] ss:$28 sps:$4 sm:$0xff]  }
 0x3c9   :  { %5638 = vmatpush1.bf16.msra.mxu1 %v7545_v4  ;;  %5802 = vmatpush1.bf16.msra.mxu0 %v7548_v5  ;;  %v7628_v4 = vld [vmem:[#allocation14 + $0x904] ss:$28 sps:$4 sm:$0xff]   ;;  %v7623_v5 = vld [vmem:[#allocation14 + $0x8f8] ss:$28 sps:$4 sm:$0xff]  }
 0x3ca   :  { %5639 = vmatprep.subr.bf16.mxu1 %v7553_v6  ;;  %5803 = vmatprep.subr.bf16.mxu0 %v7556_v7  ;;  %v7626_v6 = vld [vmem:[#allocation14 + $0x900] ss:$28 sps:$4 sm:$0xff]   ;;  %v7631_v7 = vld [vmem:[#allocation14 + $0x934] ss:$28 sps:$4 sm:$0xff]  }
 0x3cd   :  { %5640 = vmatpush1.bf16.msra.mxu1 %v7551_v18  ;;  %5804 = vmatpush1.bf16.msra.mxu0 %v7554_v8  ;;  %v7634_v18 = vld [vmem:[#allocation14 + $0x93c] ss:$28 sps:$4 sm:$0xff]   ;;  %v7629_v8 = vld [vmem:[#allocation14 + $0x930] ss:$28 sps:$4 sm:$0xff]  }
 0x3ce   :  { %5641 = vmatprep.subr.bf16.mxu1 %v7559_v15  ;;  %5805 = vmatprep.subr.bf16.mxu0 %v7562_v19  ;;  %v7637_v15 = vld [vmem:[#allocation14 + $0x96c] ss:$28 sps:$4 sm:$0xff]   ;;  %v7640_v19 = vld [vmem:[#allocation14 + $0x974] ss:$28 sps:$4 sm:$0xff]  }
 0x3d1   :  { %5642 = vmatpush1.bf16.msra.mxu1 %v7557_v20  ;;  %5806 = vmatpush1.bf16.msra.mxu0 %v7560_v50  ;;  %v7635_v20 = vld [vmem:[#allocation14 + $0x968] ss:$28 sps:$4 sm:$0xff]   ;;  %v7638_v50 = vld [vmem:[#allocation14 + $0x970] ss:$28 sps:$4 sm:$0xff]  }
 0x3d2   :  { %5643 = vmatprep.subr.bf16.mxu1 %v7565_v23  ;;  %5807 = vmatprep.subr.bf16.mxu0 %v7568_v24  ;;  %v7646_v23 = vld [vmem:[#allocation14 + $0x9ac] ss:$28 sps:$4 sm:$0xff]   ;;  %v7641_v24 = vld [vmem:[#allocation14 + $0x9a0] ss:$28 sps:$4 sm:$0xff]  }
 0x3d5   :  { %5644 = vmatpush1.bf16.msra.mxu1 %v7563_v9  ;;  %5808 = vmatpush1.bf16.msra.mxu0 %v7566_v10  ;;  %v7644_v9 = vld [vmem:[#allocation14 + $0x9a8] ss:$28 sps:$4 sm:$0xff]   ;;  %v7649_v10 = vld [vmem:[#allocation14 + $0x9dc] ss:$28 sps:$4 sm:$0xff]  }
 0x3d6   :  { %5654 = vmatprep.subr.bf16.mxu1 %v7571_v14  ;;  %5818 = vmatprep.subr.bf16.mxu0 %v7574_v17  ;;  %v1073_v14 = vsub.s32 4, %v8441_v36  ;;  %v7647_v17 = vld [vmem:[#allocation14 + $0x9d8] ss:$28 sps:$4 sm:$0xff]  }
 0x3d8   :  { %5646 = vmatmul.mubr.bf16.vlgmr.msra.gmra.mrb[8].mxu1 %v8542_v28  ;;  %5810 = vmatmul.mubr.bf16.vlgmr.msra.gmra.mrb[20].mxu0 %v8542_v28 }
 0x3d9   :  { %5655 = vmatpush1.bf16.msra.mxu1 %v7569_v25  ;;  %5819 = vmatpush1.bf16.msra.mxu0 %v7572_v27  ;;  %v7650_v25 = vld [vmem:[#allocation14 + $0x9e0] ss:$28 sps:$4 sm:$0xff]   ;;  %v1077_v27 = vsub.s32 5, %v8441_v36 }
 0x3da   :  { %5656 = vmatprep.subr.bf16.mxu1 %v7577_v61  ;;  %5820 = vmatprep.subr.bf16.mxu0 %v7580_v29  ;;  %v7655_v61 = vld [vmem:[#allocation14 + $0xa14] ss:$28 sps:$4 sm:$0xff]   ;;  %v7658_v29 = vld [vmem:[#allocation14 + $0xa1c] ss:$28 sps:$4 sm:$0xff]  }
 0x3dd   :  { %5657 = vmatpush1.bf16.msra.mxu1 %v7575_v30  ;;  %5821 = vmatpush1.bf16.msra.mxu0 %v7578_v31  ;;  %v1085_v30 = vsub.s32 7, %v8441_v36  ;;  %v1074_v31 = vrot.slane %v8517_v56, %v1073_v14 }
 0x3de   :  { %5658 = vmatprep.subr.bf16.mxu1 %v7583_v32  ;;  %5822 = vmatprep.subr.bf16.mxu0 %v7586_v33  ;;  %v7653_v32 = vld [vmem:[#allocation14 + $0xa10] ss:$28 sps:$4 sm:$0xff]   ;;  %v7656_v33 = vld [vmem:[#allocation14 + $0xa18] ss:$28 sps:$4 sm:$0xff]  }
 0x3e1   :  { %5659 = vmatpush1.bf16.msra.mxu1 %v7581_v34  ;;  %5823 = vmatpush1.bf16.msra.mxu0 %v7584_v35  ;;  %v1078_v34 = vrot.slane %v8517_v56, %v1077_v27  ;;  %v1086_v35 = vrot.slane %v8517_v56, %v1085_v30  ;;  %v7706_v30 = vld [vmem:[#allocation14 + $0xbdc] ss:$28 sps:$4 sm:$0xff]  }
 0x3e2   :  { %5660 = vmatprep.subr.bf16.mxu1 %v7589_v37  ;;  %5824 = vmatprep.subr.bf16.mxu0 %v7592_v38  ;;  %v7661_v37 = vld [vmem:[#allocation14 + $0xa4c] ss:$28 sps:$4 sm:$0xff]   ;;  %v7664_v38 = vld [vmem:[#allocation14 + $0xa54] ss:$28 sps:$4 sm:$0xff]  }
 0x3e5   :  { %5661 = vmatpush1.bf16.msra.mxu1 %v7587_v39  ;;  %5825 = vmatpush1.bf16.msra.mxu0 %v7590_v40 }
 0x3e6   :  { %5662 = vmatprep.subr.bf16.mxu1 %v7595_v42  ;;  %5826 = vmatprep.subr.bf16.mxu0 %v7598_v43 }
 0x3e9   :  { %5663 = vmatpush1.bf16.msra.mxu1 %v7593_v45  ;;  %5827 = vmatpush1.bf16.msra.mxu0 %v7596_v46  ;;  %v7659_v45 = vld [vmem:[#allocation14 + $0xa48] ss:$28 sps:$4 sm:$0xff]  }
 0x3ea   :  { %5664 = vmatprep.subr.bf16.mxu1 %v7601_v47  ;;  %5828 = vmatprep.subr.bf16.mxu0 %v7604_v48 }
 0x3ed   :  { %5665 = vmatpush1.bf16.msra.mxu1 %v7599_v49  ;;  %5829 = vmatpush1.bf16.msra.mxu0 %v7602_v52  ;;  %v7662_v49 = vld [vmem:[#allocation14 + $0xa50] ss:$28 sps:$4 sm:$0xff]   ;;  %v7667_v52 = vld [vmem:[#allocation14 + $0xa84] ss:$28 sps:$4 sm:$0xff]  }
 0x3ee   :  { %5666 = vmatprep.subr.bf16.mxu1 %v7607_v1  ;;  %5830 = vmatprep.subr.bf16.mxu0 %v7610_v53 }
 0x3f1   :  { %5667 = vmatpush1.bf16.msra.mxu1 %v7605_v55  ;;  %5831 = vmatpush1.bf16.msra.mxu0 %v7608_v57 }
 0x3f2   :  { %5668 = vmatprep.subr.bf16.mxu1 %v7613_v58  ;;  %5832 = vmatprep.subr.bf16.mxu0 %v7616_v59  ;;  %v7670_v58 = vld [vmem:[#allocation14 + $0xa8c] ss:$28 sps:$4 sm:$0xff]  }
 0x3f5   :  { %5669 = vmatpush1.bf16.msra.mxu1 %v7611_v60  ;;  %5833 = vmatpush1.bf16.msra.mxu0 %v7614_v62 }
 0x3f6   :  { %5670 = vmatprep.subr.bf16.mxu1 %v7619_v63  ;;  %5834 = vmatprep.subr.bf16.mxu0 %v7622_v26  ;;  %v7665_v26 = vld [vmem:[#allocation14 + $0xa80] ss:$28 sps:$4 sm:$0xff]  }
 0x3f9   :  { %5671 = vmatpush1.bf16.msra.mxu1 %v7617_v2  ;;  %5835 = vmatpush1.bf16.msra.mxu0 %v7620_v0  ;;  %v7668_v2 = vld [vmem:[#allocation14 + $0xa88] ss:$28 sps:$4 sm:$0xff]  }
 0x3fa   :  { %5672 = vmatprep.subr.bf16.mxu1 %v7625_v3  ;;  %5836 = vmatprep.subr.bf16.mxu0 %v7628_v4  ;;  %v7673_v3 = vld [vmem:[#allocation14 + $0xabc] ss:$28 sps:$4 sm:$0xff]   ;;  %v7676_v4 = vld [vmem:[#allocation14 + $0xac4] ss:$28 sps:$4 sm:$0xff]  }
 0x3fd   :  { %5673 = vmatpush1.bf16.msra.mxu1 %v7623_v5  ;;  %5837 = vmatpush1.bf16.msra.mxu0 %v7626_v6  ;;  %v7671_v6 = vld [vmem:[#allocation14 + $0xab8] ss:$28 sps:$4 sm:$0xff]  }
 0x3fe   :  { %5674 = vmatprep.subr.bf16.mxu1 %v7631_v7  ;;  %5838 = vmatprep.subr.bf16.mxu0 %v7634_v18  ;;  %v7674_v7 = vld [vmem:[#allocation14 + $0xac0] ss:$28 sps:$4 sm:$0xff]   ;;  %v7679_v18 = vld [vmem:[#allocation14 + $0xaf4] ss:$28 sps:$4 sm:$0xff]  }
 0x401   :  { %5675 = vmatpush1.bf16.msra.mxu1 %v7629_v8  ;;  %5839 = vmatpush1.bf16.msra.mxu0 %v7632_v13  ;;  %v7682_v8 = vld [vmem:[#allocation14 + $0xafc] ss:$28 sps:$4 sm:$0xff]   ;;  %v7677_v13 = vld [vmem:[#allocation14 + $0xaf0] ss:$28 sps:$4 sm:$0xff]  }
 0x402   :  { %5676 = vmatprep.subr.bf16.mxu1 %v7637_v15  ;;  %5840 = vmatprep.subr.bf16.mxu0 %v7640_v19  ;;  %v7680_v15 = vld [vmem:[#allocation14 + $0xaf8] ss:$28 sps:$4 sm:$0xff]   ;;  %v7685_v19 = vld [vmem:[#allocation14 + $0xb2c] ss:$28 sps:$4 sm:$0xff]  }
 0x405   :  { %5677 = vmatpush1.bf16.msra.mxu1 %v7635_v20  ;;  %5841 = vmatpush1.bf16.msra.mxu0 %v7638_v50  ;;  %v7688_v20 = vld [vmem:[#allocation14 + $0xb34] ss:$28 sps:$4 sm:$0xff]   ;;  %v7683_v50 = vld [vmem:[#allocation14 + $0xb28] ss:$28 sps:$4 sm:$0xff]  }
 0x406   :  { %5678 = vmatprep.subr.bf16.mxu1 %v7643_v22  ;;  %5842 = vmatprep.subr.bf16.mxu0 %v7646_v23  ;;  %v7686_v22 = vld [vmem:[#allocation14 + $0xb30] ss:$28 sps:$4 sm:$0xff]   ;;  %v7691_v23 = vld [vmem:[#allocation14 + $0xb64] ss:$28 sps:$4 sm:$0xff]  }
 0x409   :  { %5679 = vmatpush1.bf16.msra.mxu1 %v7641_v24  ;;  %5843 = vmatpush1.bf16.msra.mxu0 %v7644_v9  ;;  %v7694_v24 = vld [vmem:[#allocation14 + $0xb6c] ss:$28 sps:$4 sm:$0xff]   ;;  %v7689_v9 = vld [vmem:[#allocation14 + $0xb60] ss:$28 sps:$4 sm:$0xff]  }
 0x40a   :  { %5680 = vmatprep.subr.bf16.mxu1 %v7649_v10  ;;  %5844 = vmatprep.subr.bf16.mxu0 %v7652_v11  ;;  %v7692_v10 = vld [vmem:[#allocation14 + $0xb68] ss:$28 sps:$4 sm:$0xff]   ;;  %v7697_v11 = vld [vmem:[#allocation14 + $0xb9c] ss:$28 sps:$4 sm:$0xff]  }
 0x40d   :  { %5681 = vmatpush1.bf16.msra.mxu1 %v7647_v17  ;;  %5845 = vmatpush1.bf16.msra.mxu0 %v7650_v25  ;;  %v7700_v17 = vld [vmem:[#allocation14 + $0xba4] ss:$28 sps:$4 sm:$0xff]   ;;  %v7695_v25 = vld [vmem:[#allocation14 + $0xb98] ss:$28 sps:$4 sm:$0xff]  }
 0x40e   :  { %5682 = vmatprep.subr.bf16.mxu1 %v7655_v61  ;;  %5846 = vmatprep.subr.bf16.mxu0 %v7658_v29  ;;  %v7698_v61 = vld [vmem:[#allocation14 + $0xba0] ss:$28 sps:$4 sm:$0xff]   ;;  %v7703_v29 = vld [vmem:[#allocation14 + $0xbd4] ss:$28 sps:$4 sm:$0xff]  }
 0x40f   :  { %v2614_v39 = vpop.f32.mrb[4].mxu1 }
 0x410   :  { %v7175_v40 = vadd.f32 %v2614_v39, %v1074_v31  ;;  %v8556_v42 = vpop.f32.mrb[16].mxu0  ;;  %v2616_v43 = vpop.f32.mrb[5].mxu1  ;;  %v7701_v31 = vld [vmem:[#allocation14 + $0xbd0] ss:$28 sps:$4 sm:$0xff]  }
 0x411   :  { %v7176_v46 = vadd.f32 %v2616_v43, %v1078_v34  ;;  %v2698_v47 = vpop.f32.mrb[17].mxu0  ;;  %5683 = vmatpush1.bf16.msra.mxu1 %v7653_v32  ;;  %5847 = vmatpush1.bf16.msra.mxu0 %v7656_v33  ;;  %v2618_v48 = vpop.f32.mrb[6].mxu1  ;;  %v7704_v32 = vld [vmem:[#allocation14 + $0xbd8] ss:$28 sps:$4 sm:$0xff]   ;;  %v7709_v33 = vld [vmem:[#allocation14 + $0xc0c] ss:$28 sps:$4 sm:$0xff]  }
 0x412   :  { %v2707_v1 = vmax.f32 %v7175_v40, 0.0  ;;  %v7178_v53 = vadd.f32 %v2698_v47, %v1086_v35  ;;  %v2700_v55 = vpop.f32.mrb[18].mxu0  ;;  %v2619_v57 = vpop.f32.mrb[7].mxu1  ;;  %5684 = vmatprep.subr.bf16.mxu1 %v7661_v37  ;;  %5848 = vmatprep.subr.bf16.mxu0 %v7664_v38  ;;  %v7712_v34 = vld [vmem:[#allocation14 + $0xc14] ss:$28 sps:$4 sm:$0xff]  }
 0x413   :  { %v2708_v59 = vmax.f32 %v7176_v46, 0.0  ;;  %v2701_v60 = vpop.f32.mrb[19].mxu0  ;;  %v7707_v35 = vld [vmem:[#allocation14 + $0xc08] ss:$28 sps:$4 sm:$0xff]   ;;  %v7710_v37 = vld [vmem:[#allocation14 + $0xc10] ss:$28 sps:$4 sm:$0xff]  }
 0x414   :  { %v2710_v62 = vmax.f32 %v7178_v53, 0.0  ;;  %v8560_v0 = vpack.c.bf16 %v2707_v1, %v2707_v1  ;;  %v7715_v38 = vld [vmem:[#allocation14 + $0xc44] ss:$28 sps:$4 sm:$0xff]   ;;  %v7718_v39 = vld [vmem:[#allocation14 + $0xc4c] ss:$28 sps:$4 sm:$0xff]  }
 0x415   :  { %v8558_v63 = vpack.c.bf16 %v2708_v59, %v2708_v59  ;;  %5685 = vmatpush1.bf16.msra.mxu1 %v7659_v45  ;;  %5849 = vmatpush1.bf16.msra.mxu0 %v7662_v49  ;;  %v7713_v40 = vld [vmem:[#allocation14 + $0xc40] ss:$28 sps:$4 sm:$0xff]   ;;  %v7716_v43 = vld [vmem:[#allocation14 + $0xc48] ss:$28 sps:$4 sm:$0xff]   ;;  %v7719_v47 = vld [vmem:[#allocation14 + $0xc78] ss:$28 sps:$4 sm:$0xff]  }
 0x416   :  { %5695 = vmatprep.subr.bf16.mxu1 %v7667_v52  ;;  %5859 = vmatprep.subr.bf16.mxu0 %v7670_v58  ;;  %v8564_v5 = vpack.c.bf16 %v2710_v62, %v2710_v62  ;;  %v7721_v45 = vld [vmem:[#allocation14 + $0xc7c] ss:$28 sps:$4 sm:$0xff]   ;;  %v7724_v46 = vld [vmem:[#allocation14 + $0xc84] ss:$28 sps:$4 sm:$0xff]   ;;  %v7727_v49 = vld [vmem:[#allocation14 + $0xcb4] ss:$28 sps:$4 sm:$0xff]  }
 0x417   :  { %5686 = vmatprep.mubr.bf16.mxu1 %v8558_v63  ;;  %5850 = vmatprep.mubr.bf16.mxu0 %v8558_v63  ;;  %v7722_v48 = vld [vmem:[#allocation14 + $0xc80] ss:$28 sps:$4 sm:$0xff]   ;;  %v7725_v1 = vld [vmem:[#allocation14 + $0xcb0] ss:$28 sps:$4 sm:$0xff]   ;;  %v7728_v53 = vld [vmem:[#allocation14 + $0xcb8] ss:$28 sps:$4 sm:$0xff]  }
 0x418   :  { %5687 = vmatmul.mubr.bf16.vlgmr.msra.gmra.mrb[8].mxu1 %v8560_v0  ;;  %5851 = vmatmul.mubr.bf16.vlgmr.msra.gmra.mrb[20].mxu0 %v8560_v0  ;;  %v7730_v52 = vld [vmem:[#allocation14 + $0xcbc] ss:$28 sps:$4 sm:$0xff]   ;;  %v7733_v55 = vld [vmem:[#allocation14 + $0xcec] ss:$28 sps:$4 sm:$0xff]   ;;  %v7736_v57 = vld [vmem:[#allocation14 + $0xcf4] ss:$28 sps:$4 sm:$0xff]  }
 0x419   :  { %5696 = vmatpush1.bf16.msra.mxu1 %v7665_v26  ;;  %5860 = vmatpush1.bf16.msra.mxu0 %v7668_v2  ;;  %v7731_v58 = vld [vmem:[#allocation14 + $0xce8] ss:$28 sps:$4 sm:$0xff]   ;;  %v7734_v59 = vld [vmem:[#allocation14 + $0xcf0] ss:$28 sps:$4 sm:$0xff]   ;;  %v7737_v26 = vld [vmem:[#allocation14 + $0xd20] ss:$28 sps:$4 sm:$0xff]  }
 0x41a   :  { %5727 = vmatprep.mubr.bf16.mxu1 %v8564_v5  ;;  %5891 = vmatprep.mubr.bf16.mxu0 %v8564_v5  ;;  %v7739_v60 = vld [vmem:[#allocation14 + $0xd24] ss:$28 sps:$4 sm:$0xff]   ;;  %v7742_v62 = vld [vmem:[#allocation14 + $0xd2c] ss:$28 sps:$4 sm:$0xff]  }
 0x41b   :  { %5697 = vmatprep.subr.bf16.mxu1 %v7673_v3  ;;  %5861 = vmatprep.subr.bf16.mxu0 %v7676_v4  ;;  %v7740_v2 = vld [vmem:[#allocation14 + $0xd28] ss:$28 sps:$4 sm:$0xff]   ;;  %v1081_v3 = vsub.s32 6, %v8441_v36  ;;  %v7745_v4 = vld [vmem:[#allocation14 + $0xd5c] ss:$28 sps:$4 sm:$0xff]  }
 0x41d   :  { %5698 = vmatpush1.bf16.msra.mxu1 %v7671_v6  ;;  %5862 = vmatpush1.bf16.msra.mxu0 %v7674_v7  ;;  %v7748_v6 = vld [vmem:[#allocation14 + $0xd64] ss:$28 sps:$4 sm:$0xff]   ;;  %v7743_v7 = vld [vmem:[#allocation14 + $0xd58] ss:$28 sps:$4 sm:$0xff]  }
 0x41e   :  { %5699 = vmatprep.subr.bf16.mxu1 %v7679_v18  ;;  %5863 = vmatprep.subr.bf16.mxu0 %v7682_v8  ;;  %v7746_v18 = vld [vmem:[#allocation14 + $0xd60] ss:$28 sps:$4 sm:$0xff]   ;;  %v1082_v8 = vrot.slane %v8517_v56, %v1081_v3  ;;  %v7763_v56 = vld [vmem:[#allocation14 + $0x14] ss:$28 sps:$4 sm:$0xff]  }
 0x421   :  { %5700 = vmatpush1.bf16.msra.mxu1 %v7677_v13  ;;  %5864 = vmatpush1.bf16.msra.mxu0 %v7680_v15  ;;  %v7751_v13 = vld [vmem:[#allocation14 + $0xd94] ss:$28 sps:$4 sm:$0xff]   ;;  %v7754_v15 = vld [vmem:[#allocation14 + $0xd9c] ss:$28 sps:$4 sm:$0xff]  }
 0x422   :  { %5701 = vmatprep.subr.bf16.mxu1 %v7685_v19  ;;  %5865 = vmatprep.subr.bf16.mxu0 %v7688_v20  ;;  %v7749_v19 = vld [vmem:[#allocation14 + $0xd90] ss:$28 sps:$4 sm:$0xff]   ;;  %v7752_v20 = vld [vmem:[#allocation14 + $0xd98] ss:$28 sps:$4 sm:$0xff]  }
 0x425   :  { %5702 = vmatpush1.bf16.msra.mxu1 %v7683_v50  ;;  %5866 = vmatpush1.bf16.msra.mxu0 %v7686_v22  ;;  %v7177_v50 = vadd.f32 %v8556_v42, %v1082_v8  ;;  %v7757_v22 = vld [vmem:[#allocation14 + $0xdcc] ss:$28 sps:$4 sm:$0xff]   ;;  %v7765_v42 = vld [vmem:[#allocation14 + $0x18] ss:$28 sps:$4 sm:$0xff]  }
 0x426   :  { %5703 = vmatprep.subr.bf16.mxu1 %v7691_v23  ;;  %5867 = vmatprep.subr.bf16.mxu0 %v7694_v24  ;;  %v7760_v23 = vld [vmem:[#allocation14 + $0xdd4] ss:$28 sps:$4 sm:$0xff]   ;;  %v7755_v24 = vld [vmem:[#allocation14 + $0xdc8] ss:$28 sps:$4 sm:$0xff]  }
 0x427   :  { %v7806_v8 = vld [vmem:[#allocation14 + $0x208] ss:$28 sps:$4 sm:$0xff]  }
 0x429   :  { %5704 = vmatpush1.bf16.msra.mxu1 %v7689_v9  ;;  %5868 = vmatpush1.bf16.msra.mxu0 %v7692_v10  ;;  %v7758_v9 = vld [vmem:[#allocation14 + $0xdd0] ss:$28 sps:$4 sm:$0xff]   ;;  %v2709_v10 = vmax.f32 %v7177_v50, 0.0  ;;  %v7815_v50 = vld [vmem:[#allocation14 + $0x408] ss:$28 sps:$4 sm:$0xff]  }
 0x42a   :  { %5705 = vmatprep.subr.bf16.mxu1 %v7697_v11  ;;  %5869 = vmatprep.subr.bf16.mxu0 %v7700_v17  ;;  %v7764_v11 = vld [vmem:[#allocation14 + $0x1d8] ss:$28 sps:$4 sm:$0xff]   ;;  %v7761_v17 = vld [vmem:[#allocation14 + $0x10] ss:$28 sps:$4 sm:$0xff]  }
 0x42d   :  { %5706 = vmatpush1.bf16.msra.mxu1 %v7695_v25  ;;  %5870 = vmatpush1.bf16.msra.mxu0 %v7698_v61  ;;  %v8575_v25 = vpack.c.bf16 %v2709_v10, %v2709_v10  ;;  %v7768_v61 = vld [vmem:[#allocation14 + $0x4c] ss:$28 sps:$4 sm:$0xff]   ;;  %v7823_v10 = vld [vmem:[#allocation14 + $0x2b4] ss:$28 sps:$4 sm:$0xff]  }
 0x42e   :  { %5707 = vmatprep.subr.bf16.mxu1 %v7703_v29  ;;  %5871 = vmatprep.subr.bf16.mxu0 %v7706_v30  ;;  %v7769_v29 = vld [vmem:[#allocation14 + $0x210] ss:$28 sps:$4 sm:$0xff]   ;;  %v7766_v30 = vld [vmem:[#allocation14 + $0x48] ss:$28 sps:$4 sm:$0xff]  }
 0x431   :  { %5708 = vmatpush1.bf16.msra.mxu1 %v7701_v31  ;;  %5872 = vmatpush1.bf16.msra.mxu0 %v7704_v32  ;;  %v7770_v31 = vld [vmem:[#allocation14 + $0x50] ss:$28 sps:$4 sm:$0xff]   ;;  %v7773_v32 = vld [vmem:[#allocation14 + $0x84] ss:$28 sps:$4 sm:$0xff]  }
 0x432   :  { %5709 = vmatprep.subr.bf16.mxu1 %v7709_v33  ;;  %5873 = vmatprep.subr.bf16.mxu0 %v7712_v34  ;;  %v7774_v33 = vld [vmem:[#allocation14 + $0x248] ss:$28 sps:$4 sm:$0xff]   ;;  %v7771_v34 = vld [vmem:[#allocation14 + $0x80] ss:$28 sps:$4 sm:$0xff]  }
 0x435   :  { %5710 = vmatpush1.bf16.msra.mxu1 %v7707_v35  ;;  %5874 = vmatpush1.bf16.msra.mxu0 %v7710_v37  ;;  %v7775_v35 = vld [vmem:[#allocation14 + $0x88] ss:$28 sps:$4 sm:$0xff]   ;;  %v7778_v37 = vld [vmem:[#allocation14 + $0xbc] ss:$28 sps:$4 sm:$0xff]  }
 0x436   :  { %5711 = vmatprep.subr.bf16.mxu1 %v7715_v38  ;;  %5875 = vmatprep.subr.bf16.mxu0 %v7718_v39  ;;  %v7779_v38 = vld [vmem:[#allocation14 + $0x280] ss:$28 sps:$4 sm:$0xff]   ;;  %v7776_v39 = vld [vmem:[#allocation14 + $0xb8] ss:$28 sps:$4 sm:$0xff]  }
 0x439   :  { %5712 = vmatpush1.bf16.msra.mxu1 %v7713_v40  ;;  %5876 = vmatpush1.bf16.msra.mxu0 %v7716_v43  ;;  %v7780_v40 = vld [vmem:[#allocation14 + $0xc0] ss:$28 sps:$4 sm:$0xff]   ;;  %v7783_v43 = vld [vmem:[#allocation14 + $0xf4] ss:$28 sps:$4 sm:$0xff]  }
 0x43a   :  { %5713 = vmatprep.subr.bf16.mxu1 %v7721_v45  ;;  %5877 = vmatprep.subr.bf16.mxu0 %v7724_v46  ;;  %v7781_v45 = vld [vmem:[#allocation14 + $0xf0] ss:$28 sps:$4 sm:$0xff]   ;;  %v7785_v46 = vld [vmem:[#allocation14 + $0xf8] ss:$28 sps:$4 sm:$0xff]  }
 0x43d   :  { %5714 = vmatpush1.bf16.msra.mxu1 %v7719_v47  ;;  %5878 = vmatpush1.bf16.msra.mxu0 %v7722_v48  ;;  %v7788_v47 = vld [vmem:[#allocation14 + $0x12c] ss:$28 sps:$4 sm:$0xff]  }
 0x43e   :  { %5715 = vmatprep.subr.bf16.mxu1 %v7727_v49  ;;  %5879 = vmatprep.subr.bf16.mxu0 %v7730_v52  ;;  %v7789_v48 = vld [vmem:[#allocation14 + $0x2f0] ss:$28 sps:$4 sm:$0xff]   ;;  %v7786_v49 = vld [vmem:[#allocation14 + $0x128] ss:$28 sps:$4 sm:$0xff]  }
 0x43f   :  { %v7790_v52 = vld [vmem:[#allocation14 + $0x130] ss:$28 sps:$4 sm:$0xff]  }
 0x441   :  { %5716 = vmatpush1.bf16.msra.mxu1 %v7725_v1  ;;  %5880 = vmatpush1.bf16.msra.mxu0 %v7728_v53  ;;  %v7793_v1 = vld [vmem:[#allocation14 + $0x164] ss:$28 sps:$4 sm:$0xff]  }
 0x442   :  { %5717 = vmatprep.subr.bf16.mxu1 %v7733_v55  ;;  %5881 = vmatprep.subr.bf16.mxu0 %v7736_v57  ;;  %v7794_v53 = vld [vmem:[#allocation14 + $0x328] ss:$28 sps:$4 sm:$0xff]   ;;  %v7791_v55 = vld [vmem:[#allocation14 + $0x160] ss:$28 sps:$4 sm:$0xff]  }
 0x443   :  { %v7795_v57 = vld [vmem:[#allocation14 + $0x168] ss:$28 sps:$4 sm:$0xff]  }
 0x445   :  { %5718 = vmatpush1.bf16.msra.mxu1 %v7731_v58  ;;  %5882 = vmatpush1.bf16.msra.mxu0 %v7734_v59  ;;  %v7798_v58 = vld [vmem:[#allocation14 + $0x19c] ss:$28 sps:$4 sm:$0xff]  }
 0x446   :  { %5719 = vmatprep.subr.bf16.mxu1 %v7739_v60  ;;  %5883 = vmatprep.subr.bf16.mxu0 %v7742_v62  ;;  %v7799_v59 = vld [vmem:[#allocation14 + $0x360] ss:$28 sps:$4 sm:$0xff]   ;;  %v7796_v60 = vld [vmem:[#allocation14 + $0x198] ss:$28 sps:$4 sm:$0xff]  }
 0x447   :  { %v7800_v62 = vld [vmem:[#allocation14 + $0x1a0] ss:$28 sps:$4 sm:$0xff]  }
 0x449   :  { %5720 = vmatpush1.bf16.msra.mxu1 %v7737_v26  ;;  %5884 = vmatpush1.bf16.msra.mxu0 %v7740_v2  ;;  %v7803_v26 = vld [vmem:[#allocation14 + $0x1d4] ss:$28 sps:$4 sm:$0xff]  }
 0x44a   :  { %5721 = vmatprep.subr.bf16.mxu1 %v7745_v4  ;;  %5885 = vmatprep.subr.bf16.mxu0 %v7748_v6  ;;  %v7804_v2 = vld [vmem:[#allocation14 + $0x558] ss:$28 sps:$4 sm:$0xff]   ;;  %v7801_v4 = vld [vmem:[#allocation14 + $0x1d0] ss:$28 sps:$4 sm:$0xff]  }
 0x44b   :  { %v7805_v6 = vld [vmem:[#allocation14 + $0x398] ss:$28 sps:$4 sm:$0xff]  }
 0x44d   :  { %5722 = vmatpush1.bf16.msra.mxu1 %v7743_v7  ;;  %5886 = vmatpush1.bf16.msra.mxu0 %v7746_v18  ;;  %v7808_v7 = vld [vmem:[#allocation14 + $0x20c] ss:$28 sps:$4 sm:$0xff]  }
 0x44e   :  { %5723 = vmatprep.subr.bf16.mxu1 %v7751_v13  ;;  %5887 = vmatprep.subr.bf16.mxu0 %v7754_v15  ;;  %v7809_v18 = vld [vmem:[#allocation14 + $0x590] ss:$28 sps:$4 sm:$0xff]   ;;  %v7813_v15 = vld [vmem:[#allocation14 + $0x244] ss:$28 sps:$4 sm:$0xff]  }
 0x44f   :  { %v7810_v13 = vld [vmem:[#allocation14 + $0x3d0] ss:$28 sps:$4 sm:$0xff]  }
 0x451   :  { %5724 = vmatpush1.bf16.msra.mxu1 %v7749_v19  ;;  %5888 = vmatpush1.bf16.msra.mxu0 %v7752_v20  ;;  %v7814_v19 = vld [vmem:[#allocation14 + $0x5c8] ss:$28 sps:$4 sm:$0xff]   ;;  %v7811_v20 = vld [vmem:[#allocation14 + $0x240] ss:$28 sps:$4 sm:$0xff]  }
 0x452   :  { %5725 = vmatprep.subr.bf16.mxu1 %v7757_v22  ;;  %5889 = vmatprep.subr.bf16.mxu0 %v7760_v23  ;;  %v7818_v22 = vld [vmem:[#allocation14 + $0x27c] ss:$28 sps:$4 sm:$0xff]  }
 0x453   :  { %v7819_v23 = vld [vmem:[#allocation14 + $0x600] ss:$28 sps:$4 sm:$0xff]  }
 0x455   :  { %5726 = vmatpush1.bf16.msra.mxu1 %v7755_v24  ;;  %5890 = vmatpush1.bf16.msra.mxu0 %v7758_v9  ;;  %v7816_v24 = vld [vmem:[#allocation14 + $0x278] ss:$28 sps:$4 sm:$0xff]   ;;  %v7820_v9 = vld [vmem:[#allocation14 + $0x440] ss:$28 sps:$4 sm:$0xff]  }
 0x456   :  { %5900 = vmatprep.subr.bf16.mxu1 %v7763_v56  ;;  %7083 = vmatprep.subr.bf16.mxu0 %v7764_v11  ;;  %v7824_v56 = vld [vmem:[#allocation14 + $0x638] ss:$28 sps:$4 sm:$0xff]   ;;  %v7821_v11 = vld [vmem:[#allocation14 + $0x2b0] ss:$28 sps:$4 sm:$0xff]  }
 0x458   :  { %5728 = vmatmul.mubr.bf16.vlgmr.msra.gmra.mrb[8].mxu1 %v8575_v25  ;;  %5892 = vmatmul.mubr.bf16.vlgmr.msra.gmra.mrb[20].mxu0 %v8575_v25 }
 0x459   :  { %5901 = vmatpush1.bf16.msra.mxu1 %v7761_v17  ;;  %5932 = vmatprep.mubr.bf16.mxu1 %v8527_v12  ;;  %v7825_v17 = vld [vmem:[#allocation14 + $0x478] ss:$28 sps:$4 sm:$0xff]  }
 0x45a   :  { %7084 = vmatpush3.bf16.msra.mxu0 %v7765_v42  ;;  %6096 = vmatprep.mubr.bf16.mxu0 %v8527_v12  ;;  %v7784_v12 = vld [vmem:[#allocation14 + $0x2b8] ss:$28 sps:$4 sm:$0xff]   ;;  %v7828_v42 = vld [vmem:[#allocation14 + $0x2ec] ss:$28 sps:$4 sm:$0xff]  }
 0x45b   :  { %5902 = vmatprep.subr.bf16.mxu1 %v7768_v61  ;;  %7085 = vmatprep.subr.bf16.mxu0 %v7769_v29  ;;  %v7829_v61 = vld [vmem:[#allocation14 + $0x670] ss:$28 sps:$4 sm:$0xff]   ;;  %v7826_v29 = vld [vmem:[#allocation14 + $0x2e8] ss:$28 sps:$4 sm:$0xff]  }
 0x45d   :  { %5903 = vmatpush1.bf16.msra.mxu1 %v7766_v30  ;;  %v7830_v30 = vld [vmem:[#allocation14 + $0x4b0] ss:$28 sps:$4 sm:$0xff]  }
 0x45e   :  { %7086 = vmatpush3.bf16.msra.mxu0 %v7770_v31  ;;  %5904 = vmatprep.subr.bf16.mxu1 %v7773_v32  ;;  %v7833_v31 = vld [vmem:[#allocation14 + $0x324] ss:$28 sps:$4 sm:$0xff]  }
 0x45f   :  { %7087 = vmatprep.subr.bf16.mxu0 %v7774_v33  ;;  %v7834_v32 = vld [vmem:[#allocation14 + $0x6a8] ss:$28 sps:$4 sm:$0xff]   ;;  %v7831_v33 = vld [vmem:[#allocation14 + $0x320] ss:$28 sps:$4 sm:$0xff]  }
 0x461   :  { %5905 = vmatpush1.bf16.msra.mxu1 %v7771_v34  ;;  %v7835_v34 = vld [vmem:[#allocation14 + $0x4e8] ss:$28 sps:$4 sm:$0xff]  }
 0x462   :  { %7088 = vmatpush3.bf16.msra.mxu0 %v7775_v35  ;;  %5906 = vmatprep.subr.bf16.mxu1 %v7778_v37  ;;  %v7838_v35 = vld [vmem:[#allocation14 + $0x35c] ss:$28 sps:$4 sm:$0xff]  }
 0x463   :  { %7089 = vmatprep.subr.bf16.mxu0 %v7779_v38  ;;  %v7839_v37 = vld [vmem:[#allocation14 + $0x6e0] ss:$28 sps:$4 sm:$0xff]   ;;  %v7836_v38 = vld [vmem:[#allocation14 + $0x358] ss:$28 sps:$4 sm:$0xff]  }
 0x465   :  { %5907 = vmatpush1.bf16.msra.mxu1 %v7776_v39  ;;  %v7840_v39 = vld [vmem:[#allocation14 + $0x520] ss:$28 sps:$4 sm:$0xff]  }
 0x466   :  { %7090 = vmatpush3.bf16.msra.mxu0 %v7780_v40  ;;  %5908 = vmatprep.subr.bf16.mxu1 %v7783_v43  ;;  %v7843_v40 = vld [vmem:[#allocation14 + $0x394] ss:$28 sps:$4 sm:$0xff]  }
 0x467   :  { %7091 = vmatprep.subr.bf16.mxu0 %v7784_v12  ;;  %v7844_v43 = vld [vmem:[#allocation14 + $0x8d8] ss:$28 sps:$4 sm:$0xff]   ;;  %v7841_v12 = vld [vmem:[#allocation14 + $0x390] ss:$28 sps:$4 sm:$0xff]  }
 0x469   :  { %5909 = vmatpush1.bf16.msra.mxu1 %v7781_v45  ;;  %v7845_v45 = vld [vmem:[#allocation14 + $0x718] ss:$28 sps:$4 sm:$0xff]  }
 0x46a   :  { %7092 = vmatpush3.bf16.msra.mxu0 %v7785_v46  ;;  %5910 = vmatprep.subr.bf16.mxu1 %v7788_v47  ;;  %v7848_v46 = vld [vmem:[#allocation14 + $0x3cc] ss:$28 sps:$4 sm:$0xff]  }
 0x46b   :  { %7093 = vmatprep.subr.bf16.mxu0 %v7789_v48  ;;  %v7849_v47 = vld [vmem:[#allocation14 + $0x910] ss:$28 sps:$4 sm:$0xff]   ;;  %v7846_v48 = vld [vmem:[#allocation14 + $0x3c8] ss:$28 sps:$4 sm:$0xff]  }
 0x46d   :  { %5911 = vmatpush1.bf16.msra.mxu1 %v7786_v49  ;;  %v7850_v49 = vld [vmem:[#allocation14 + $0x750] ss:$28 sps:$4 sm:$0xff]  }
 0x46e   :  { %7094 = vmatpush3.bf16.msra.mxu0 %v7790_v52  ;;  %5912 = vmatprep.subr.bf16.mxu1 %v7793_v1  ;;  %v7853_v52 = vld [vmem:[#allocation14 + $0x404] ss:$28 sps:$4 sm:$0xff]  }
 0x46f   :  { %7095 = vmatprep.subr.bf16.mxu0 %v7794_v53  ;;  %v7854_v1 = vld [vmem:[#allocation14 + $0x948] ss:$28 sps:$4 sm:$0xff]   ;;  %v7851_v53 = vld [vmem:[#allocation14 + $0x400] ss:$28 sps:$4 sm:$0xff]  }
 0x471   :  { %5913 = vmatpush1.bf16.msra.mxu1 %v7791_v55  ;;  %v7858_v55 = vld [vmem:[#allocation14 + $0x43c] ss:$28 sps:$4 sm:$0xff]  }
 0x472   :  { %7096 = vmatpush3.bf16.msra.mxu0 %v7795_v57  ;;  %5914 = vmatprep.subr.bf16.mxu1 %v7798_v58  ;;  %v7859_v57 = vld [vmem:[#allocation14 + $0x980] ss:$28 sps:$4 sm:$0xff]   ;;  %v7856_v58 = vld [vmem:[#allocation14 + $0x438] ss:$28 sps:$4 sm:$0xff]  }
 0x473   :  { %7097 = vmatprep.subr.bf16.mxu0 %v7799_v59  ;;  %v7863_v59 = vld [vmem:[#allocation14 + $0x474] ss:$28 sps:$4 sm:$0xff]  }
 0x475   :  { %5915 = vmatpush1.bf16.msra.mxu1 %v7796_v60  ;;  %v7864_v60 = vld [vmem:[#allocation14 + $0x9b8] ss:$28 sps:$4 sm:$0xff]  }
 0x476   :  { %7098 = vmatpush3.bf16.msra.mxu0 %v7800_v62  ;;  %5916 = vmatprep.subr.bf16.mxu1 %v7803_v26  ;;  %v7861_v62 = vld [vmem:[#allocation14 + $0x470] ss:$28 sps:$4 sm:$0xff]   ;;  %v7865_v26 = vld [vmem:[#allocation14 + $0x7f8] ss:$28 sps:$4 sm:$0xff]  }
 0x477   :  { %7105 = vmatprep.subr.bf16.mxu0 %v7804_v2  ;;  %v7868_v2 = vld [vmem:[#allocation14 + $0x4ac] ss:$28 sps:$4 sm:$0xff]  }
 0x479   :  { %6097 = vmatmul.mubr.bf16.vlgmr.msra.gmra.mrb[24].mxu0 %v8529_v16  ;;  %5917 = vmatpush1.bf16.msra.mxu1 %v7801_v4  ;;  %v7869_v4 = vld [vmem:[#allocation14 + $0x9f0] ss:$28 sps:$4 sm:$0xff]  }
 0x47a   :  { %7106 = vmatpush3.bf16.msra.mxu0 %v7805_v6  ;;  %6136 = vmatprep.mubr.bf16.mxu0 %v8533_v21  ;;  %v7866_v6 = vld [vmem:[#allocation14 + $0x4a8] ss:$28 sps:$4 sm:$0xff]  }
 0x47b   :  { %5918 = vmatprep.subr.bf16.mxu1 %v7808_v7  ;;  %7107 = vmatprep.subr.bf16.mxu0 %v7809_v18  ;;  %v7870_v7 = vld [vmem:[#allocation14 + $0x830] ss:$28 sps:$4 sm:$0xff]   ;;  %v7873_v18 = vld [vmem:[#allocation14 + $0x4e4] ss:$28 sps:$4 sm:$0xff]  }
 0x47d   :  { %5919 = vmatpush1.bf16.msra.mxu1 %v7806_v8  ;;  %v7874_v8 = vld [vmem:[#allocation14 + $0xa28] ss:$28 sps:$4 sm:$0xff]  }
 0x47e   :  { %7108 = vmatpush3.bf16.msra.mxu0 %v7810_v13  ;;  %5920 = vmatprep.subr.bf16.mxu1 %v7813_v15  ;;  %v7871_v13 = vld [vmem:[#allocation14 + $0x4e0] ss:$28 sps:$4 sm:$0xff]   ;;  %v7875_v15 = vld [vmem:[#allocation14 + $0x868] ss:$28 sps:$4 sm:$0xff]  }
 0x47f   :  { %7109 = vmatprep.subr.bf16.mxu0 %v7814_v19  ;;  %v7878_v19 = vld [vmem:[#allocation14 + $0x51c] ss:$28 sps:$4 sm:$0xff]  }
 0x481   :  { %5921 = vmatpush1.bf16.msra.mxu1 %v7811_v20  ;;  %v7879_v20 = vld [vmem:[#allocation14 + $0xa60] ss:$28 sps:$4 sm:$0xff]  }
 0x482   :  { %7110 = vmatpush3.bf16.msra.mxu0 %v7815_v50  ;;  %5922 = vmatprep.subr.bf16.mxu1 %v7818_v22  ;;  %v7876_v50 = vld [vmem:[#allocation14 + $0x518] ss:$28 sps:$4 sm:$0xff]   ;;  %v7880_v22 = vld [vmem:[#allocation14 + $0x8a0] ss:$28 sps:$4 sm:$0xff]  }
 0x483   :  { %7111 = vmatprep.subr.bf16.mxu0 %v7819_v23  ;;  %v7883_v23 = vld [vmem:[#allocation14 + $0x554] ss:$28 sps:$4 sm:$0xff]  }
 0x485   :  { %5923 = vmatpush1.bf16.msra.mxu1 %v7816_v24  ;;  %v7884_v24 = vld [vmem:[#allocation14 + $0xc58] ss:$28 sps:$4 sm:$0xff]  }
 0x486   :  { %7112 = vmatpush3.bf16.msra.mxu0 %v7820_v9  ;;  %5924 = vmatprep.subr.bf16.mxu1 %v7823_v10  ;;  %v7881_v9 = vld [vmem:[#allocation14 + $0x550] ss:$28 sps:$4 sm:$0xff]   ;;  %v7885_v10 = vld [vmem:[#allocation14 + $0xa98] ss:$28 sps:$4 sm:$0xff]  }
 0x487   :  { %7113 = vmatprep.subr.bf16.mxu0 %v7824_v56  ;;  %v7888_v56 = vld [vmem:[#allocation14 + $0x58c] ss:$28 sps:$4 sm:$0xff]  }
 0x489   :  { %5925 = vmatpush1.bf16.msra.mxu1 %v7821_v11  ;;  %v7889_v11 = vld [vmem:[#allocation14 + $0xc90] ss:$28 sps:$4 sm:$0xff]  }
 0x48a   :  { %7114 = vmatpush3.bf16.msra.mxu0 %v7825_v17  ;;  %5926 = vmatprep.subr.bf16.mxu1 %v7828_v42  ;;  %v7886_v17 = vld [vmem:[#allocation14 + $0x588] ss:$28 sps:$4 sm:$0xff]   ;;  %v7890_v42 = vld [vmem:[#allocation14 + $0xad0] ss:$28 sps:$4 sm:$0xff]  }
 0x48b   :  { %7115 = vmatprep.subr.bf16.mxu0 %v7829_v61  ;;  %v7893_v61 = vld [vmem:[#allocation14 + $0x5c4] ss:$28 sps:$4 sm:$0xff]  }
 0x48d   :  { %5927 = vmatpush1.bf16.msra.mxu1 %v7826_v29  ;;  %v7894_v29 = vld [vmem:[#allocation14 + $0xcc8] ss:$28 sps:$4 sm:$0xff]  }
 0x48e   :  { %7116 = vmatpush3.bf16.msra.mxu0 %v7830_v30  ;;  %5928 = vmatprep.subr.bf16.mxu1 %v7833_v31  ;;  %v7891_v30 = vld [vmem:[#allocation14 + $0x5c0] ss:$28 sps:$4 sm:$0xff]   ;;  %v7895_v31 = vld [vmem:[#allocation14 + $0xb08] ss:$28 sps:$4 sm:$0xff]  }
 0x48f   :  { %7117 = vmatprep.subr.bf16.mxu0 %v7834_v32  ;;  %v7898_v32 = vld [vmem:[#allocation14 + $0x5fc] ss:$28 sps:$4 sm:$0xff]  }
 0x491   :  { %5929 = vmatpush1.bf16.msra.mxu1 %v7831_v33  ;;  %v7899_v33 = vld [vmem:[#allocation14 + $0xd00] ss:$28 sps:$4 sm:$0xff]  }
 0x492   :  { %7118 = vmatpush3.bf16.msra.mxu0 %v7835_v34  ;;  %5930 = vmatprep.subr.bf16.mxu1 %v7838_v35  ;;  %v7896_v34 = vld [vmem:[#allocation14 + $0x5f8] ss:$28 sps:$4 sm:$0xff]   ;;  %v7900_v35 = vld [vmem:[#allocation14 + $0xb40] ss:$28 sps:$4 sm:$0xff]  }
 0x493   :  { %7119 = vmatprep.subr.bf16.mxu0 %v7839_v37  ;;  %v7903_v37 = vld [vmem:[#allocation14 + $0x634] ss:$28 sps:$4 sm:$0xff]  }
 0x495   :  { %5931 = vmatpush1.bf16.msra.mxu1 %v7836_v38  ;;  %v7904_v38 = vld [vmem:[#allocation14 + $0xd38] ss:$28 sps:$4 sm:$0xff]  }
 0x496   :  { %7120 = vmatpush3.bf16.msra.mxu0 %v7840_v39  ;;  %5941 = vmatprep.subr.bf16.mxu1 %v7843_v40  ;;  %v7901_v39 = vld [vmem:[#allocation14 + $0x630] ss:$28 sps:$4 sm:$0xff]   ;;  %v7905_v40 = vld [vmem:[#allocation14 + $0xb78] ss:$28 sps:$4 sm:$0xff]  }
 0x497   :  { %7127 = vmatprep.subr.bf16.mxu0 %v7844_v43  ;;  %v7908_v43 = vld [vmem:[#allocation14 + $0x66c] ss:$28 sps:$4 sm:$0xff]  }
 0x498   :  { %5933 = vmatmul.mubr.bf16.vlgmr.msra.gmra.mrb[12].mxu1 %v8529_v16  ;;  %v7855_v16 = vld [vmem:[#allocation14 + $0x788] ss:$28 sps:$4 sm:$0xff]  }
 0x499   :  { %6137 = vmatmul.mubr.bf16.vlgmr.msra.gmra.mrb[28].mxu0 %v8542_v28  ;;  %5942 = vmatpush1.bf16.msra.mxu1 %v7841_v12  ;;  %v7909_v12 = vld [vmem:[#allocation14 + $0xd70] ss:$28 sps:$4 sm:$0xff]  }
 0x49a   :  { %5973 = vmatprep.mubr.bf16.mxu1 %v8533_v21  ;;  %7128 = vmatpush3.bf16.msra.mxu0 %v7845_v45  ;;  %v7860_v21 = vld [vmem:[#allocation14 + $0x7c0] ss:$28 sps:$4 sm:$0xff]   ;;  %v7906_v45 = vld [vmem:[#allocation14 + $0x668] ss:$28 sps:$4 sm:$0xff]  }
 0x49b   :  { %6176 = vmatprep.mubr.bf16.mxu0 %v8558_v63  ;;  %5943 = vmatprep.subr.bf16.mxu1 %v7848_v46  ;;  %v7910_v46 = vld [vmem:[#allocation14 + $0xbb0] ss:$28 sps:$4 sm:$0xff]  }
 0x49c   :  { %7129 = vmatprep.subr.bf16.mxu0 %v7849_v47  ;;  %v7913_v47 = vld [vmem:[#allocation14 + $0x6a4] ss:$28 sps:$4 sm:$0xff]  }
 0x49d   :  { %5944 = vmatpush1.bf16.msra.mxu1 %v7846_v48  ;;  %v7914_v48 = vld [vmem:[#allocation14 + $0xda8] ss:$28 sps:$4 sm:$0xff]  }
 0x49e   :  { %7130 = vmatpush3.bf16.msra.mxu0 %v7850_v49  ;;  %5945 = vmatprep.subr.bf16.mxu1 %v7853_v52  ;;  %v7911_v49 = vld [vmem:[#allocation14 + $0x6a0] ss:$28 sps:$4 sm:$0xff]   ;;  %v7915_v52 = vld [vmem:[#allocation14 + $0xbe8] ss:$28 sps:$4 sm:$0xff]  }
 0x49f   :  { %7131 = vmatprep.subr.bf16.mxu0 %v7854_v1  ;;  %v7918_v1 = vld [vmem:[#allocation14 + $0x6dc] ss:$28 sps:$4 sm:$0xff]  }
 0x4a1   :  { %5946 = vmatpush1.bf16.msra.mxu1 %v7851_v53  ;;  %v7919_v53 = vld [vmem:[#allocation14 + $0xde0] ss:$28 sps:$4 sm:$0xff]  }
 0x4a2   :  { %7132 = vmatpush3.bf16.msra.mxu0 %v7855_v16  ;;  %5947 = vmatprep.subr.bf16.mxu1 %v7858_v55  ;;  %v7916_v16 = vld [vmem:[#allocation14 + $0x6d8] ss:$28 sps:$4 sm:$0xff]   ;;  %v7920_v55 = vld [vmem:[#allocation14 + $0xc20] ss:$28 sps:$4 sm:$0xff]  }
 0x4a3   :  { %7133 = vmatprep.subr.bf16.mxu0 %v7859_v57  ;;  %v7923_v57 = vld [vmem:[#allocation14 + $0x714] ss:$28 sps:$4 sm:$0xff]  }
 0x4a5   :  { %5948 = vmatpush1.bf16.msra.mxu1 %v7856_v58  ;;  %v7921_v58 = vld [vmem:[#allocation14 + $0x710] ss:$28 sps:$4 sm:$0xff]  }
 0x4a6   :  { %7134 = vmatpush3.bf16.msra.mxu0 %v7860_v21  ;;  %5949 = vmatprep.subr.bf16.mxu1 %v7863_v59  ;;  %v7926_v21 = vld [vmem:[#allocation14 + $0x74c] ss:$28 sps:$4 sm:$0xff]  }
 0x4a7   :  { %7135 = vmatprep.subr.bf16.mxu0 %v7864_v60  ;;  %v7924_v59 = vld [vmem:[#allocation14 + $0x748] ss:$28 sps:$4 sm:$0xff]  }
 0x4a8   :  { %v7929_v60 = vld [vmem:[#allocation14 + $0x784] ss:$28 sps:$4 sm:$0xff]  }
 0x4a9   :  { %5950 = vmatpush1.bf16.msra.mxu1 %v7861_v62  ;;  %v7927_v62 = vld [vmem:[#allocation14 + $0x780] ss:$28 sps:$4 sm:$0xff]  }
 0x4aa   :  { %7136 = vmatpush3.bf16.msra.mxu0 %v7865_v26  ;;  %5951 = vmatprep.subr.bf16.mxu1 %v7868_v2  ;;  %v7932_v26 = vld [vmem:[#allocation14 + $0x7bc] ss:$28 sps:$4 sm:$0xff]  }
 0x4ab   :  { %7137 = vmatprep.subr.bf16.mxu0 %v7869_v4  ;;  %v7930_v2 = vld [vmem:[#allocation14 + $0x7b8] ss:$28 sps:$4 sm:$0xff]  }
 0x4ac   :  { %v7935_v4 = vld [vmem:[#allocation14 + $0x7f4] ss:$28 sps:$4 sm:$0xff]  }
 0x4ad   :  { %5952 = vmatpush1.bf16.msra.mxu1 %v7866_v6  ;;  %v7933_v6 = vld [vmem:[#allocation14 + $0x7f0] ss:$28 sps:$4 sm:$0xff]  }
 0x4ae   :  { %7138 = vmatpush3.bf16.msra.mxu0 %v7870_v7  ;;  %5953 = vmatprep.subr.bf16.mxu1 %v7873_v18  ;;  %v7936_v7 = vld [vmem:[#allocation14 + $0x828] ss:$28 sps:$4 sm:$0xff]  }
 0x4af   :  { %7139 = vmatprep.subr.bf16.mxu0 %v7874_v8  ;;  %v7941_v18 = vld [vmem:[#allocation14 + $0x864] ss:$28 sps:$4 sm:$0xff]   ;;  %v7944_v8 = vld [vmem:[#allocation14 + $0x89c] ss:$28 sps:$4 sm:$0xff]  }
 0x4b1   :  { %5954 = vmatpush1.bf16.msra.mxu1 %v7871_v13  ;;  %v7942_v13 = vld [vmem:[#allocation14 + $0x898] ss:$28 sps:$4 sm:$0xff]  }
 0x4b2   :  { %7140 = vmatpush3.bf16.msra.mxu0 %v7875_v15  ;;  %5955 = vmatprep.subr.bf16.mxu1 %v7878_v19  ;;  %v7947_v15 = vld [vmem:[#allocation14 + $0x8d4] ss:$28 sps:$4 sm:$0xff]  }
 0x4b3   :  { %7141 = vmatprep.subr.bf16.mxu0 %v7879_v20  ;;  %v7945_v19 = vld [vmem:[#allocation14 + $0x8d0] ss:$28 sps:$4 sm:$0xff]  }
 0x4b4   :  { %v7950_v20 = vld [vmem:[#allocation14 + $0x90c] ss:$28 sps:$4 sm:$0xff]  }
 0x4b5   :  { %5956 = vmatpush1.bf16.msra.mxu1 %v7876_v50  ;;  %v7948_v50 = vld [vmem:[#allocation14 + $0x908] ss:$28 sps:$4 sm:$0xff]  }
 0x4b6   :  { %7142 = vmatpush3.bf16.msra.mxu0 %v7880_v22  ;;  %5957 = vmatprep.subr.bf16.mxu1 %v7883_v23  ;;  %v7953_v22 = vld [vmem:[#allocation14 + $0x944] ss:$28 sps:$4 sm:$0xff]  }
 0x4b7   :  { %7149 = vmatprep.subr.bf16.mxu0 %v7884_v24  ;;  %v7951_v23 = vld [vmem:[#allocation14 + $0x940] ss:$28 sps:$4 sm:$0xff]  }
 0x4b8   :  { %v7956_v24 = vld [vmem:[#allocation14 + $0x97c] ss:$28 sps:$4 sm:$0xff]  }
 0x4b9   :  { %6177 = vmatmul.mubr.bf16.vlgmr.msra.gmra.mrb[32].mxu0 %v8560_v0  ;;  %5958 = vmatpush1.bf16.msra.mxu1 %v7881_v9  ;;  %v7954_v9 = vld [vmem:[#allocation14 + $0x978] ss:$28 sps:$4 sm:$0xff]  }
 0x4ba   :  { %7150 = vmatpush3.bf16.msra.mxu0 %v7885_v10  ;;  %6216 = vmatprep.mubr.bf16.mxu0 %v8564_v5  ;;  %v7959_v10 = vld [vmem:[#allocation14 + $0x9b4] ss:$28 sps:$4 sm:$0xff]  }
 0x4bb   :  { %5959 = vmatprep.subr.bf16.mxu1 %v7888_v56  ;;  %7151 = vmatprep.subr.bf16.mxu0 %v7889_v11  ;;  %v7957_v56 = vld [vmem:[#allocation14 + $0x9b0] ss:$28 sps:$4 sm:$0xff]  }
 0x4bc   :  { %v7962_v11 = vld [vmem:[#allocation14 + $0x9ec] ss:$28 sps:$4 sm:$0xff]  }
 0x4bd   :  { %5960 = vmatpush1.bf16.msra.mxu1 %v7886_v17  ;;  %v7960_v17 = vld [vmem:[#allocation14 + $0x9e8] ss:$28 sps:$4 sm:$0xff]  }
 0x4be   :  { %7152 = vmatpush3.bf16.msra.mxu0 %v7890_v42  ;;  %5961 = vmatprep.subr.bf16.mxu1 %v7893_v61  ;;  %v7965_v42 = vld [vmem:[#allocation14 + $0xa24] ss:$28 sps:$4 sm:$0xff]  }
 0x4bf   :  { %7153 = vmatprep.subr.bf16.mxu0 %v7894_v29  ;;  %v7963_v61 = vld [vmem:[#allocation14 + $0xa20] ss:$28 sps:$4 sm:$0xff]  }
 0x4c0   :  { %v7968_v29 = vld [vmem:[#allocation14 + $0xa5c] ss:$28 sps:$4 sm:$0xff]  }
 0x4c1   :  { %5962 = vmatpush1.bf16.msra.mxu1 %v7891_v30  ;;  %v7966_v30 = vld [vmem:[#allocation14 + $0xa58] ss:$28 sps:$4 sm:$0xff]  }
 0x4c2   :  { %7154 = vmatpush3.bf16.msra.mxu0 %v7895_v31  ;;  %5963 = vmatprep.subr.bf16.mxu1 %v7898_v32  ;;  %v7971_v31 = vld [vmem:[#allocation14 + $0xa94] ss:$28 sps:$4 sm:$0xff]  }
 0x4c3   :  { %7155 = vmatprep.subr.bf16.mxu0 %v7899_v33  ;;  %v7969_v32 = vld [vmem:[#allocation14 + $0xa90] ss:$28 sps:$4 sm:$0xff]  }
 0x4c4   :  { %v7974_v33 = vld [vmem:[#allocation14 + $0xacc] ss:$28 sps:$4 sm:$0xff]  }
 0x4c5   :  { %5964 = vmatpush1.bf16.msra.mxu1 %v7896_v34  ;;  %v7972_v34 = vld [vmem:[#allocation14 + $0xac8] ss:$28 sps:$4 sm:$0xff]  }
 0x4c6   :  { %7156 = vmatpush3.bf16.msra.mxu0 %v7900_v35  ;;  %5965 = vmatprep.subr.bf16.mxu1 %v7903_v37  ;;  %v7977_v35 = vld [vmem:[#allocation14 + $0xb04] ss:$28 sps:$4 sm:$0xff]  }
 0x4c7   :  { %7157 = vmatprep.subr.bf16.mxu0 %v7904_v38  ;;  %v7975_v37 = vld [vmem:[#allocation14 + $0xb00] ss:$28 sps:$4 sm:$0xff]  }
 0x4c8   :  { %v7980_v38 = vld [vmem:[#allocation14 + $0xb3c] ss:$28 sps:$4 sm:$0xff]  }
 0x4c9   :  { %5966 = vmatpush1.bf16.msra.mxu1 %v7901_v39  ;;  %v7978_v39 = vld [vmem:[#allocation14 + $0xb38] ss:$28 sps:$4 sm:$0xff]  }
 0x4ca   :  { %7158 = vmatpush3.bf16.msra.mxu0 %v7905_v40  ;;  %5967 = vmatprep.subr.bf16.mxu1 %v7908_v43  ;;  %v7983_v40 = vld [vmem:[#allocation14 + $0xb74] ss:$28 sps:$4 sm:$0xff]  }
 0x4cb   :  { %7159 = vmatprep.subr.bf16.mxu0 %v7909_v12  ;;  %v7981_v43 = vld [vmem:[#allocation14 + $0xb70] ss:$28 sps:$4 sm:$0xff]   ;;  %v8594_v12 = vld [vmem:[#allocation16] sm:$0xff] }
 0x4cd   :  { %5968 = vmatpush1.bf16.msra.mxu1 %v7906_v45  ;;  %v3244_v45 = vrot.slane %v8594_v12, %v8492_v51 }
 0x4ce   :  { %7160 = vmatpush3.bf16.msra.mxu0 %v7910_v46  ;;  %5969 = vmatprep.subr.bf16.mxu1 %v7913_v47  ;;  %v3240_v46 = vrot.slane %v8594_v12, %v8447_v44  ;;  %v3248_v47 = vrot.slane %v8594_v12, %v8495_v54  ;;  %v7992_v54 = vld [vmem:[#allocation14 + $0xc1c] ss:$28 sps:$4 sm:$0xff]  }
 0x4cf   :  { %7161 = vmatprep.subr.bf16.mxu0 %v7914_v48  ;;  %v7984_v48 = vld [vmem:[#allocation14 + $0xba8] ss:$28 sps:$4 sm:$0xff]  }
 0x4d1   :  { %5970 = vmatpush1.bf16.msra.mxu1 %v7911_v49  ;;  %v7989_v49 = vld [vmem:[#allocation14 + $0xbe4] ss:$28 sps:$4 sm:$0xff]  }
 0x4d2   :  { %7162 = vmatpush3.bf16.msra.mxu0 %v7915_v52  ;;  %5971 = vmatprep.subr.bf16.mxu1 %v7918_v1 }
 0x4d3   :  { %7163 = vmatprep.subr.bf16.mxu0 %v7919_v53 }
 0x4d5   :  { %5972 = vmatpush1.bf16.msra.mxu1 %v7916_v16 }
 0x4d6   :  { %7164 = vmatpush3.bf16.msra.mxu0 %v7920_v55  ;;  %5982 = vmatprep.subr.bf16.mxu1 %v7923_v57 }
 0x4d8   :  { %5974 = vmatmul.mubr.bf16.vlgmr.msra.gmra.mrb[12].mxu1 %v8542_v28  ;;  %v7938_v28 = vld [vmem:[#allocation14 + $0x82c] ss:$28 sps:$4 sm:$0xff]  }
 0x4d9   :  { %6217 = vmatmul.mubr.bf16.vlgmr.msra.gmra.mrb[36].mxu0 %v8575_v25  ;;  %5983 = vmatpush1.bf16.msra.mxu1 %v7921_v58 }
 0x4da   :  { %6014 = vmatprep.mubr.bf16.mxu1 %v8558_v63  ;;  %5984 = vmatprep.subr.bf16.mxu1 %v7926_v21  ;;  %v7939_v63 = vld [vmem:[#allocation14 + $0x860] ss:$28 sps:$4 sm:$0xff]  }
 0x4dd   :  { %5985 = vmatpush1.bf16.msra.mxu1 %v7924_v59  ;;  %v7987_v59 = vld [vmem:[#allocation14 + $0xbe0] ss:$28 sps:$4 sm:$0xff]  }
 0x4de   :  { %5986 = vmatprep.subr.bf16.mxu1 %v7929_v60 }
 0x4e1   :  { %5987 = vmatpush1.bf16.msra.mxu1 %v7927_v62  ;;  %v7990_v62 = vld [vmem:[#allocation14 + $0xc18] ss:$28 sps:$4 sm:$0xff]  }
 0x4e2   :  { %5988 = vmatprep.subr.bf16.mxu1 %v7932_v26  ;;  %v8281_v26 = vmov 1983009808  }
 0x4e5   :  { %5989 = vmatpush1.bf16.msra.mxu1 %v7930_v2  ;;  %v6241_v2 = vunpack.c.l.s4 %v8281_v26 }
 0x4e6   :  { %5990 = vmatprep.subr.bf16.mxu1 %v7935_v4  ;;  %v7995_v4 = vld [vmem:[#allocation14 + $0xc54] ss:$28 sps:$4 sm:$0xff]  }
 0x4e9   :  { %5991 = vmatpush1.bf16.msra.mxu1 %v7933_v6  ;;  %v7993_v6 = vld [vmem:[#allocation14 + $0xc50] ss:$28 sps:$4 sm:$0xff]  }
 0x4ea   :  { %5992 = vmatprep.subr.bf16.mxu1 %v7938_v28  ;;  %v6242_v28 = vunpack.c.0.s8 %v6241_v2 }
 0x4ed   :  { %5993 = vmatpush1.bf16.msra.mxu1 %v7936_v7  ;;  %v7998_v7 = vld [vmem:[#allocation14 + $0xc8c] ss:$28 sps:$4 sm:$0xff]  }
 0x4ee   :  { %5994 = vmatprep.subr.bf16.mxu1 %v7941_v18 }
 0x4f1   :  { %5995 = vmatpush1.bf16.msra.mxu1 %v7939_v63 }
 0x4f2   :  { %5996 = vmatprep.subr.bf16.mxu1 %v7944_v8  ;;  %v7996_v8 = vld [vmem:[#allocation14 + $0xc88] ss:$28 sps:$4 sm:$0xff]  }
 0x4f5   :  { %5997 = vmatpush1.bf16.msra.mxu1 %v7942_v13  ;;  %v8605_v13 = vsub.s32 %v6242_v28, %v8441_v36 }
 0x4f6   :  { %5998 = vmatprep.subr.bf16.mxu1 %v7947_v15 }
 0x4f9   :  { %5999 = vmatpush1.bf16.msra.mxu1 %v7945_v19  ;;  %v8001_v19 = vld [vmem:[#allocation14 + $0xcc4] ss:$28 sps:$4 sm:$0xff]  }
 0x4fa   :  { %6000 = vmatprep.subr.bf16.mxu1 %v7950_v20 }
 0x4fd   :  { %6001 = vmatpush1.bf16.msra.mxu1 %v7948_v50 }
 0x4fe   :  { %6002 = vmatprep.subr.bf16.mxu1 %v7953_v22 }
 0x501   :  { %6003 = vmatpush1.bf16.msra.mxu1 %v7951_v23  ;;  %v7999_v23 = vld [vmem:[#allocation14 + $0xcc0] ss:$28 sps:$4 sm:$0xff]  }
 0x502   :  { %6004 = vmatprep.subr.bf16.mxu1 %v7956_v24 }
 0x505   :  { %6005 = vmatpush1.bf16.msra.mxu1 %v7954_v9  ;;  %v8004_v9 = vld [vmem:[#allocation14 + $0xcfc] ss:$28 sps:$4 sm:$0xff]  }
 0x506   :  { %6006 = vmatprep.subr.bf16.mxu1 %v7959_v10 }
 0x509   :  { %6007 = vmatpush1.bf16.msra.mxu1 %v7957_v56 }
 0x50a   :  { %6008 = vmatprep.subr.bf16.mxu1 %v7962_v11  ;;  %v8002_v11 = vld [vmem:[#allocation14 + $0xcf8] ss:$28 sps:$4 sm:$0xff]  }
 0x50d   :  { %6009 = vmatpush1.bf16.msra.mxu1 %v7960_v17  ;;  %v8007_v17 = vld [vmem:[#allocation14 + $0xd34] ss:$28 sps:$4 sm:$0xff]  }
 0x50e   :  { %6010 = vmatprep.subr.bf16.mxu1 %v7965_v42  ;;  %v8005_v42 = vld [vmem:[#allocation14 + $0xd30] ss:$28 sps:$4 sm:$0xff]  }
 0x511   :  { %6011 = vmatpush1.bf16.msra.mxu1 %v7963_v61  ;;  %v8010_v61 = vld [vmem:[#allocation14 + $0xd6c] ss:$28 sps:$4 sm:$0xff]  }
 0x512   :  { %6012 = vmatprep.subr.bf16.mxu1 %v7968_v29  ;;  %v8008_v29 = vld [vmem:[#allocation14 + $0xd68] ss:$28 sps:$4 sm:$0xff]  }
 0x515   :  { %6013 = vmatpush1.bf16.msra.mxu1 %v7966_v30  ;;  %v8013_v30 = vld [vmem:[#allocation14 + $0xda4] ss:$28 sps:$4 sm:$0xff]  }
 0x516   :  { %6023 = vmatprep.subr.bf16.mxu1 %v7971_v31 }
 0x518   :  { %6015 = vmatmul.mubr.bf16.vlgmr.msra.gmra.mrb[12].mxu1 %v8560_v0  ;;  %v7986_v0 = vld [vmem:[#allocation14 + $0xbac] ss:$28 sps:$4 sm:$0xff]  }
 0x519   :  { %6024 = vmatpush1.bf16.msra.mxu1 %v7969_v32  ;;  %6055 = vmatprep.mubr.bf16.mxu1 %v8564_v5  ;;  %v3236_v5 = vrot.slane %v8594_v12, %v8444_v41 }
 0x51a   :  { %6025 = vmatprep.subr.bf16.mxu1 %v7974_v33  ;;  %v8011_v33 = vld [vmem:[#allocation14 + $0xda0] ss:$28 sps:$4 sm:$0xff]  }
 0x51d   :  { %6026 = vmatpush1.bf16.msra.mxu1 %v7972_v34 }
 0x51e   :  { %6027 = vmatprep.subr.bf16.mxu1 %v7977_v35 }
 0x521   :  { %6028 = vmatpush1.bf16.msra.mxu1 %v7975_v37  ;;  %v8016_v37 = vld [vmem:[#allocation14 + $0xddc] ss:$28 sps:$4 sm:$0xff]  }
 0x522   :  { %6029 = vmatprep.subr.bf16.mxu1 %v7980_v38 }
 0x525   :  { %6030 = vmatpush1.bf16.msra.mxu1 %v7978_v39  ;;  %v8014_v39 = vld [vmem:[#allocation14 + $0xdd8] ss:$28 sps:$4 sm:$0xff]  }
 0x526   :  { %6031 = vmatprep.subr.bf16.mxu1 %v7983_v40  ;;  %v3260_v40 = vrot.slane %v8594_v12, %v1081_v3  ;;  %v3252_v3 = vrot.slane %v8594_v12, %v1073_v14 }
 0x529   :  { %6032 = vmatpush1.bf16.msra.mxu1 %v7981_v43 }
 0x52a   :  { %6033 = vmatprep.subr.bf16.mxu1 %v7986_v0 }
 0x52b   :  { %v5729_v52 = vpop.f32.mrb[8].mxu1  ;;  %v5893_v1 = vpop.f32.mrb[20].mxu0 }
 0x52c   :  { %v7179_v53 = vadd.f32 %v5729_v52, %v3236_v5  ;;  %v7181_v16 = vadd.f32 %v5893_v1, %v3244_v45  ;;  %v5731_v55 = vpop.f32.mrb[9].mxu1  ;;  %v5895_v57 = vpop.f32.mrb[21].mxu0 }
 0x52d   :  { %v7180_v41 = vadd.f32 %v5731_v55, %v3240_v46  ;;  %v7182_v58 = vadd.f32 %v5895_v57, %v3248_v47  ;;  %v5733_v21 = vpop.f32.mrb[10].mxu1  ;;  %v5897_v51 = vpop.f32.mrb[22].mxu0  ;;  %6034 = vmatpush1.bf16.msra.mxu1 %v7984_v48 }
 0x52e   :  { %8017 = vtanh.f32 %v7179_v53  ;;  %v5734_v44 = vpop.f32.mrb[11].mxu1  ;;  %v5898_v60 = vpop.f32.mrb[23].mxu0  ;;  %6035 = vmatprep.subr.bf16.mxu1 %v7989_v49 }
 0x52f   :  { %8019 = vtanh.f32 %v7181_v16 }
 0x530   :  { %8021 = vtanh.f32 %v7180_v41 }
 0x531   :  { %8023 = vtanh.f32 %v7182_v58  ;;  %6036 = vmatpush1.bf16.msra.mxu1 %v7987_v59  ;;  %v3256_v59 = vrot.slane %v8594_v12, %v1077_v27 }
 0x532   :  { %6037 = vmatprep.subr.bf16.mxu1 %v7992_v54 }
 0x535   :  { %6038 = vmatpush1.bf16.msra.mxu1 %v7990_v62 }
 0x536   :  { %6039 = vmatprep.subr.bf16.mxu1 %v7995_v4 }
 0x538   :  { %v8018_v18 = vpop.eup %8017 }
 0x539   :  { %v8020_v63 = vpop.eup %8019  ;;  %6040 = vmatpush1.bf16.msra.mxu1 %v7993_v6 }
 0x53a   :  { %v8022_v15 = vpop.eup %8021  ;;  %6041 = vmatprep.subr.bf16.mxu1 %v7998_v7 }
 0x53b   :  { %v8024_v20 = vpop.eup %8023  ;;  %v6238_v50 = vcombine.low %v8018_v18, %v8022_v15 }
 0x53c   :  { %v6239_v22 = vcombine.low %v8020_v63, %v8024_v20 }
 0x53d   :  { %6042 = vmatpush1.bf16.msra.mxu1 %v7996_v8  ;;  %v6246_v24 = vrot.slane %v6238_v50, %v8605_v13 }
 0x53e   :  { %6043 = vmatprep.subr.bf16.mxu1 %v8001_v19  ;;  %v6253_v10 = vrot.slane %v6239_v22, %v8605_v13 }
 0x540   :  { %v6254_v56 = vcombine.low %v6246_v24, %v6253_v10 }
 0x541   :  { %6044 = vmatpush1.bf16.msra.mxu1 %v7999_v23 }
 0x542   :  { %6045 = vmatprep.subr.bf16.mxu1 %v8004_v9  ;;  %6273 = vst [vmem:[#allocation17] sm:$0xff] %v6254_v56 }
 0x545   :  { %6046 = vmatpush1.bf16.msra.mxu1 %v8002_v11 }
 0x546   :  { %6047 = vmatprep.subr.bf16.mxu1 %v8007_v17 }
 0x549   :  { %6048 = vmatpush1.bf16.msra.mxu1 %v8005_v42 }
 0x54a   :  { %6049 = vmatprep.subr.bf16.mxu1 %v8010_v61 }
 0x54c   :  { %v7099_v31 = vpop.f32.mrb[24].mxu0 }
 0x54d   :  { %v7100_v32 = vpop.f32.mrb[25].mxu0  ;;  %6050 = vmatpush1.bf16.msra.mxu1 %v8008_v29 }
 0x54e   :  { %v7101_v34 = vadd.f32 %v7100_v32, %v7099_v31  ;;  %v7102_v35 = vpop.f32.mrb[26].mxu0  ;;  %6051 = vmatprep.subr.bf16.mxu1 %v8013_v30 }
 0x54f   :  { %v7103_v38 = vpop.f32.mrb[27].mxu0 }
 0x550   :  { %v6099_v5 = vadd.f32 %v7101_v34, %v3260_v40 }
 0x551   :  { %6052 = vmatpush1.bf16.msra.mxu1 %v8011_v33 }
 0x552   :  { %6053 = vmatprep.subr.bf16.mxu1 %v8016_v37 }
 0x555   :  { %6054 = vmatpush1.bf16.msra.mxu1 %v8014_v39 }
 0x558   :  { %6056 = vmatmul.mubr.bf16.vlgmr.msra.gmra.mrb[12].mxu1 %v8575_v25 }
 0x56c   :  { %v7121_v43 = vpop.f32.mrb[28].mxu0 }
 0x56d   :  { %v7122_v0 = vpop.f32.mrb[29].mxu0 }
 0x56e   :  { %v7123_v45 = vadd.f32 %v7122_v0, %v7121_v43  ;;  %v7124_v46 = vpop.f32.mrb[30].mxu0 }
 0x56f   :  { %v7125_v47 = vpop.f32.mrb[31].mxu0 }
 0x570   :  { %v6139_v48 = vadd.f32 %v7123_v45, %v6099_v5 }
 0x58c   :  { %v7143_v49 = vpop.f32.mrb[32].mxu0 }
 0x58d   :  { %v7144_v52 = vpop.f32.mrb[33].mxu0 }
 0x58e   :  { %v7145_v1 = vadd.f32 %v7144_v52, %v7143_v49  ;;  %v7146_v53 = vpop.f32.mrb[34].mxu0 }
 0x58f   :  { %v7147_v16 = vpop.f32.mrb[35].mxu0 }
 0x590   :  { %v6179_v55 = vadd.f32 %v7145_v1, %v6139_v48 }
 0x5ac   :  { %v7165_v57 = vpop.f32.mrb[36].mxu0 }
 0x5ad   :  { %v7166_v41 = vpop.f32.mrb[37].mxu0 }
 0x5ae   :  { %v7167_v25 = vadd.f32 %v7166_v41, %v7165_v57  ;;  %v7168_v58 = vpop.f32.mrb[38].mxu0 }
 0x5af   :  { %v7169_v21 = vpop.f32.mrb[39].mxu0 }
 0x5b0   :  { %v6219_v51 = vadd.f32 %v7167_v25, %v6179_v55 }
 0x5b2   :  { %8025 = vtanh.f32 %v6219_v51 }
 0x5bc   :  { %v8026_v4 = vpop.eup %8025 }
 0x5bd   :  { %v6269_v14 = vrot.slane %v8026_v4, %v8605_v13 }
 0x62b   :  { %v6057_v44 = vpop.f32.mrb[12].mxu1 }
 0x62c   :  { %v7183_v60 = vadd.f32 %v6057_v44, %v3252_v3  ;;  %v6059_v54 = vpop.f32.mrb[13].mxu1 }
 0x62d   :  { %v7184_v62 = vadd.f32 %v6059_v54, %v3256_v59  ;;  %v6061_v26 = vpop.f32.mrb[14].mxu1 }
 0x62e   :  { %8027 = vtanh.f32 %v7183_v60  ;;  %v6062_v2 = vpop.f32.mrb[15].mxu1 }
 0x62f   :  { %8029 = vtanh.f32 %v7184_v62 }
 0x638   :  { %v8028_v6 = vpop.eup %8027 }
 0x639   :  { %v8030_v28 = vpop.eup %8029 }
 0x63a   :  { %v6255_v7 = vcombine.low %v8028_v6, %v8030_v28 }
 0x63c   :  { %v6262_v36 = vrot.slane %v6255_v7, %v8605_v13 }
 0x63e   :  { %v6270_v27 = vcombine.low %v6262_v36, %v6269_v14 }
 0x640   :  { %6279 = vst.msk [vmem:[#allocation17 + $0x8] sm:$0x3f] %vm6278_vm4, %v6270_v27 }
 0x641   :  { %8240 = shalt.err (!%p8237_p6)
}
 0x642   :  { %s8241_s22 = scalar_lea.hbm %s8642_s9, 224 }
 0x643   :  { %p8242_p7 = scmp.ne.s32.totalorder %s8642_s9, %s8241_s22  ;;  %p8245_p8 = scmp.lt.u32.totalorder %s8241_s22, %s8642_s9 }
 0x645   :  { %p8247_p9 = pnand %p8245_p8, %p8242_p7 }
 0x647   :  { %8250 = shalt.err (!%p8247_p9)
}
 0x648   :  { %6289 = dma.vmem_to_hbm [thread:$0]  %s6287_s24, 224, %s8642_s9, [#allocation4]  }
 0x649   :  { %8261 = dma.done.wait [#allocation4], 224  }
 0x64a   :  { %8262 = vsyncadd [#allocation4], 4294967072 }
 0x64b   :  { %6293 = vsyncpa [#allocation3], 1 }
 0x64c   :  { %6294 = vsyncpa [#allocation6], 1 }
 0x64d   :  { %6295 = vsyncpa [#allocation9], 1 }
 0x64e   :  { %6296 = vsyncpa [#allocation12], 1 }
 0x64f   :  { %6297 = vsyncpa [#allocation15], 1 }
 0x650   :  { %6298 = vsyncpa [#allocation4], 1 }

</bundles_post_ra>
